<compile_context>
chip_gen: v7x
topology: tpu7x:2x2x1
jax: 0.10.0
libtpu: 0.0.40
codegen_flags: <defaults>
</compile_context>

<pallas_src>
import functools
import math

import jax
import jax.numpy as jnp
from jax import lax
from jax.experimental import pallas as pl
from jax.experimental.pallas import tpu as pltpu


# -----------------------------------------------------------------------------
# Small helpers
# -----------------------------------------------------------------------------
def _round_up(x, m):
    return ((x + m - 1) // m) * m


def _pick_tile(dim, target, align):
    """Largest multiple of `align` that divides `dim` and is <= target."""
    t = min(target, dim)
    t -= t % align
    while t >= align:
        if dim % t == 0:
            return t
        t -= align
    return dim


def _pick_time_chunk(seq_len, target=32):
    if seq_len <= target:
        return seq_len
    t = target - target % 8
    while t >= 8:
        if seq_len % t == 0:
            return t
        t -= 8
    return seq_len


# -----------------------------------------------------------------------------
# Kernel 1: stacked 2-layer LSTM recurrence (gridded over time chunks).
# -----------------------------------------------------------------------------
def _lstm_stack_kernel(x_ref,        # (tc*Bp, Ep)  bf16 embedded chunk (time-major flat)
                       wih0_ref,     # (Ep, 4Hp)    bf16
                       whh0_ref,     # (Hp, 4Hp)    bf16
                       b0_ref,       # (1, 4Hp)     f32  (bias_ih0 + bias_hh0)
                       w1_ref,       # (2Hp, 4Hp)   bf16 [Wih1; Whh1] stacked
                       b1_ref,       # (1, 4Hp)     f32  (bias_ih1 + bias_hh1)
                       h_out_ref,    # (Bp, tc, Hp) bf16 top-layer hidden states (batch-major)
                       xg_scr,       # (tc*Bp, 4Hp) f32  precomputed layer-0 input gates
                       hbuf_scr,     # (Bp, tc, Hp) f32  chunk output buffer
                       h0_scr, c0_scr, h1_scr, c1_scr,   # (Bp, Hp) f32 carried state
                       *, tc, bp, hp):
    f32 = jnp.float32
    bf16 = jnp.bfloat16

    @pl.when(pl.program_id(0) == 0)
    def _init_state():
        zeros = jnp.zeros((bp, hp), f32)
        h0_scr[...] = zeros
        c0_scr[...] = zeros
        h1_scr[...] = zeros
        c1_scr[...] = zeros

    # Layer-0 input projection for the whole chunk: one MXU matmul, hoisted out
    # of the sequential time loop.
    xg_scr[...] = (jnp.dot(x_ref[...], wih0_ref[...], preferred_element_type=f32)
                   + b0_ref[...])

    whh0 = whh0_ref[...]
    w1 = w1_ref[...]
    b1 = b1_ref[...]

    def gates_to_hc(g, c_prev):
        # PyTorch gate order [i, f, g, o]; slices fall on 128-lane boundaries (Hp % 128 == 0).
        i_g = jax.nn.sigmoid(g[:, 0 * hp:1 * hp])
        f_g = jax.nn.sigmoid(g[:, 1 * hp:2 * hp])
        g_g = jnp.tanh(g[:, 2 * hp:3 * hp])
        o_g = jax.nn.sigmoid(g[:, 3 * hp:4 * hp])
        c_new = f_g * c_prev + i_g * g_g
        h_new = o_g * jnp.tanh(c_new)
        return h_new, c_new

    def step(s, carry):
        h0, c0, h1, c1 = carry
        off = pl.multiple_of(s * bp, bp)
        # Layer 0: only the recurrent matmul remains per step.
        g0 = xg_scr[pl.ds(off, bp), :] + jnp.dot(
            h0.astype(bf16), whh0, preferred_element_type=f32)
        h0, c0 = gates_to_hc(g0, c0)
        # Layer 1: input + recurrent matmuls fused into a single MXU push.
        # (inter-layer dropout is identity in eval mode)
        x1 = jnp.concatenate([h0, h1], axis=1).astype(bf16)      # (Bp, 2Hp)
        g1 = jnp.dot(x1, w1, preferred_element_type=f32) + b1
        h1, c1 = gates_to_hc(g1, c1)
        hbuf_scr[:, pl.ds(s, 1), :] = h1.reshape(bp, 1, hp)
        return (h0, c0, h1, c1)

    carry = (h0_scr[...], c0_scr[...], h1_scr[...], c1_scr[...])
    h0, c0, h1, c1 = lax.fori_loop(0, tc, step, carry, unroll=True)
    h0_scr[...] = h0
    c0_scr[...] = c0
    h1_scr[...] = h1
    c1_scr[...] = c1

    # Single bulk, lane-dense store of the chunk's top-layer hidden states.
    h_out_ref[...] = hbuf_scr[...].astype(h_out_ref.dtype)


def lstm_stack(x_tm, wih0, whh0, b0, w1, b1, *, seq_len, bp, tc):
    ep = x_tm.shape[1]
    hp = whh0.shape[0]
    n_chunks = seq_len // tc
    kernel = functools.partial(_lstm_stack_kernel, tc=tc, bp=bp, hp=hp)
    return pl.pallas_call(
        kernel,
        out_shape=jax.ShapeDtypeStruct((bp, seq_len, hp), jnp.bfloat16),
        grid_spec=pltpu.PrefetchScalarGridSpec(
            num_scalar_prefetch=0,
            grid=(n_chunks,),
            in_specs=[
                pl.BlockSpec((tc * bp, ep), lambda ti: (ti, 0)),
                pl.BlockSpec((ep, 4 * hp), lambda ti: (0, 0)),
                pl.BlockSpec((hp, 4 * hp), lambda ti: (0, 0)),
                pl.BlockSpec((1, 4 * hp), lambda ti: (0, 0)),
                pl.BlockSpec((2 * hp, 4 * hp), lambda ti: (0, 0)),
                pl.BlockSpec((1, 4 * hp), lambda ti: (0, 0)),
            ],
            out_specs=pl.BlockSpec((bp, tc, hp), lambda ti: (0, ti, 0)),
            scratch_shapes=[
                pltpu.VMEM((tc * bp, 4 * hp), jnp.float32),
                pltpu.VMEM((bp, tc, hp), jnp.float32),
                pltpu.VMEM((bp, hp), jnp.float32),
                pltpu.VMEM((bp, hp), jnp.float32),
                pltpu.VMEM((bp, hp), jnp.float32),
                pltpu.VMEM((bp, hp), jnp.float32),
            ]),
        compiler_params=pltpu.CompilerParams(
            dimension_semantics=("arbitrary",)),
    )(x_tm, wih0, whh0, b0, w1, b1)


# -----------------------------------------------------------------------------
# Kernel 2: tiled output projection (H is small -> single K block, no reduction axis).
# -----------------------------------------------------------------------------
def _projection_kernel(h_ref, w_ref, b_ref, out_ref):
    out_ref[...] = (jnp.dot(h_ref[...], w_ref[...], preferred_element_type=jnp.float32)
                    + b_ref[...])


def tiled_projection(h_flat, wout, bout, *, tm, tn):
    m, hp = h_flat.shape
    n_pad = wout.shape[1]
    return pl.pallas_call(
        _projection_kernel,
        out_shape=jax.ShapeDtypeStruct((m, n_pad), jnp.float32),
        grid_spec=pltpu.PrefetchScalarGridSpec(
            num_scalar_prefetch=0,
            grid=(m // tm, n_pad // tn),
            in_specs=[
                pl.BlockSpec((tm, hp), lambda i, j: (i, 0)),
                pl.BlockSpec((hp, tn), lambda i, j: (0, j)),
                pl.BlockSpec((1, tn), lambda i, j: (0, j)),
            ],
            out_specs=pl.BlockSpec((tm, tn), lambda i, j: (i, j)),
        ),
        compiler_params=pltpu.CompilerParams(
            dimension_semantics=("parallel", "parallel"),
            vmem_limit_bytes=32 * 1024 * 1024),
    )(h_flat, wout, bout)


# -----------------------------------------------------------------------------
# Parameter init (mirrors _init_weights) + packing (pad / transpose / bf16).
# -----------------------------------------------------------------------------
def _xavier_normal(key, shape):
    fan_out, fan_in = shape
    std = math.sqrt(2.0 / (fan_in + fan_out))
    return std * jax.random.normal(key, shape, dtype=jnp.float32)


def _orthogonal(key, shape):
    r, c = shape
    n = max(r, c)
    a = jax.random.normal(key, (n, n), dtype=jnp.float32)
    q, _ = jnp.linalg.qr(a)
    return q[:r, :c].astype(jnp.float32)


def init_params(key, num_items, embedding_dim, hidden_dim):
    """Logical PyTorch-layout parameters."""
    keys = jax.random.split(key, 6)
    E, H, N = embedding_dim, hidden_dim, num_items
    emb = _xavier_normal(keys[0], (N + 1, E)).at[0].set(0.0)   # padding_idx=0 row zeroed
    return {
        "embedding": emb,
        "wih0": _orthogonal(keys[1], (4 * H, E)),
        "whh0": _orthogonal(keys[2], (4 * H, H)),
        "b_ih0": jnp.zeros((4 * H,), jnp.float32),
        "b_hh0": jnp.zeros((4 * H,), jnp.float32),
        "wih1": _orthogonal(keys[3], (4 * H, H)),
        "whh1": _orthogonal(keys[4], (4 * H, H)),
        "b_ih1": jnp.zeros((4 * H,), jnp.float32),
        "b_hh1": jnp.zeros((4 * H,), jnp.float32),
        "wout": _xavier_normal(keys[5], (N, H)),
        "bout": jnp.zeros((N,), jnp.float32),
    }


def _pad_gate_mat(w, h, hp, in_dim, in_pad):
    """(4H, in) PyTorch gate matrix -> (in_pad, 4Hp) kernel layout, padded per gate."""
    w4 = w.reshape(4, h, in_dim)
    w4 = jnp.pad(w4, ((0, 0), (0, hp - h), (0, in_pad - in_dim)))
    return jnp.transpose(w4.reshape(4 * hp, in_pad))


def _pad_gate_bias(b, h, hp):
    b4 = jnp.pad(b.reshape(4, h), ((0, 0), (0, hp - h)))
    return b4.reshape(1, 4 * hp)


def pack_params(params, num_items, embedding_dim, hidden_dim):
    E, H, N = embedding_dim, hidden_dim, num_items
    ep, hp, n_pad = _round_up(E, 128), _round_up(H, 128), _round_up(N, 128)

    emb = jnp.pad(params["embedding"], ((0, 0), (0, ep - E)))                    # (N+1, Ep) f32

    wih0 = _pad_gate_mat(params["wih0"], H, hp, E, ep).astype(jnp.bfloat16)      # (Ep, 4Hp)
    whh0 = _pad_gate_mat(params["whh0"], H, hp, H, hp).astype(jnp.bfloat16)      # (Hp, 4Hp)
    b0 = _pad_gate_bias(params["b_ih0"] + params["b_hh0"], H, hp)                # (1, 4Hp) f32

    wih1 = _pad_gate_mat(params["wih1"], H, hp, H, hp)
    whh1 = _pad_gate_mat(params["whh1"], H, hp, H, hp)
    w1 = jnp.concatenate([wih1, whh1], axis=0).astype(jnp.bfloat16)              # (2Hp, 4Hp)
    b1 = _pad_gate_bias(params["b_ih1"] + params["b_hh1"], H, hp)                # (1, 4Hp) f32

    wout = jnp.pad(jnp.transpose(params["wout"]),
                   ((0, hp - H), (0, n_pad - N))).astype(jnp.bfloat16)           # (Hp, Np)
    bout = jnp.pad(params["bout"], (0, n_pad - N)).reshape(1, n_pad)             # (1, Np) f32

    return {"embedding": emb, "wih0": wih0, "whh0": whh0, "b0": b0,
            "w1": w1, "b1": b1, "wout": wout, "bout": bout}


# -----------------------------------------------------------------------------
# Forward pass (batch-first in / batch-first out, like the PyTorch module).
# -----------------------------------------------------------------------------
def sequential_recommender(sequences, packed, *, num_items):
    """sequences: (B, T) int32 item ids.  Returns logits (B, T, num_items) f32."""
    B, T = sequences.shape
    bp = _round_up(B, 8)
    hp = packed["whh0"].shape[0]
    n_pad = packed["wout"].shape[1]

    # Embedding gather (plain XLA glue).
    # TODO(synk): fuse the gather into the LSTM kernel via PrefetchScalarGridSpec
    #             (scalar-prefetched sequence ids) to avoid materializing (B,T,E) twice.
    x = jnp.take(packed["embedding"], sequences, axis=0)            # (B, T, Ep) f32
    x = jnp.pad(x, ((0, bp - B), (0, 0), (0, 0)))                   # (Bp, T, Ep)
    x = jnp.transpose(x, (1, 0, 2)).reshape(T * bp, -1)             # (T*Bp, Ep) time-major flat
    x = x.astype(jnp.bfloat16)

    tc = _pick_time_chunk(T)
    h = lstm_stack(x, packed["wih0"], packed["whh0"], packed["b0"],
                   packed["w1"], packed["b1"], seq_len=T, bp=bp, tc=tc)   # (Bp, T, Hp) bf16

    # Output Linear (dropout is identity in eval) as a gridded, lane-dense tiled
    # matmul; output is already batch-major so the big tensor is never transposed.
    h_flat = h.reshape(bp * T, hp)
    tm = _pick_tile(bp * T, 256, 8)
    tn = _pick_tile(n_pad, 512, 128)
    logits = tiled_projection(h_flat, packed["wout"], packed["bout"], tm=tm, tn=tn)
    return logits.reshape(bp, T, n_pad)[:B, :, :num_items]


if __name__ == "__main__":
    NUM_ITEMS = 64
    EMBEDDING_DIM = 32
    HIDDEN_DIM = 32
    BATCH = 2
    SEQ_LEN = 8

    key = jax.random.PRNGKey(0)
    k_param, k_seq = jax.random.split(key)

    params = init_params(k_param, NUM_ITEMS, EMBEDDING_DIM, HIDDEN_DIM)
    packed = pack_params(params, NUM_ITEMS, EMBEDDING_DIM, HIDDEN_DIM)
    sequences = jax.random.randint(k_seq, (BATCH, SEQ_LEN), 1, NUM_ITEMS + 1,
                                   dtype=jnp.int32)

    fwd = jax.jit(functools.partial(sequential_recommender, num_items=NUM_ITEMS))
    logits = fwd(sequences, packed)
    jax.block_until_ready(logits)

    assert logits.shape == (BATCH, SEQ_LEN, NUM_ITEMS)
    assert logits.dtype == jnp.float32
    assert bool(jnp.all(jnp.isfinite(logits)))
    print("KERNEL_OK")
</pallas_src>

<mosaic_0001>
module attributes {stable_mosaic.version = 11 : i64} {
  func.func @_projection_kernel(%arg0: i32, %arg1: i32, %arg2: memref<64x128xbf16, #tpu.memory_space<vmem>>, %arg3: memref<128x128xbf16, #tpu.memory_space<vmem>>, %arg4: memref<1x128xf32, #tpu.memory_space<vmem>>, %arg5: memref<64x128xf32, #tpu.memory_space<vmem>>) attributes {dimension_semantics = [#tpu.dimension_semantics<parallel>, #tpu.dimension_semantics<parallel>], iteration_bounds = array<i64: 1, 1>, scalar_prefetch = 0 : i64, scratch_operands = 0 : i64, tpu.core_type = #tpu.core_type<tc>, window_params = [{transform_indices = @transform_0, window_bounds = array<i64: 64, 128>}, {transform_indices = @transform_1, window_bounds = array<i64: 128, 128>}, {transform_indices = @transform_2, window_bounds = array<i64: 1, 128>}, {transform_indices = @transform_3, window_bounds = array<i64: 64, 128>}]} {
    %c0 = arith.constant 0 : index
    %c0_0 = arith.constant 0 : index
    %0 = vector.load %arg2[%c0, %c0_0] : memref<64x128xbf16, #tpu.memory_space<vmem>>, vector<64x128xbf16>
    %c0_1 = arith.constant 0 : index
    %c0_2 = arith.constant 0 : index
    %1 = vector.load %arg3[%c0_1, %c0_2] : memref<128x128xbf16, #tpu.memory_space<vmem>>, vector<128x128xbf16>
    %cst = arith.constant dense<0.000000e+00> : vector<64x128xf32>
    %2 = tpu.matmul %0, %1, %cst {dimension_numbers = #tpu.dot_dimension_numbers<[1], [0], [0], [1], [0, 0, 1, 1], [], []>} : vector<64x128xbf16>, vector<128x128xbf16>, vector<64x128xf32> -> vector<64x128xf32>
    %c0_3 = arith.constant 0 : index
    %c0_4 = arith.constant 0 : index
    %3 = vector.load %arg4[%c0_3, %c0_4] : memref<1x128xf32, #tpu.memory_space<vmem>>, vector<1x128xf32>
    %4 = vector.broadcast %3 : vector<1x128xf32> to vector<64x128xf32>
    %5 = arith.addf %2, %4 : vector<64x128xf32>
    %c0_5 = arith.constant 0 : index
    %c0_6 = arith.constant 0 : index
    %6 = vector.load %arg5[%c0_5, %c0_6] : memref<64x128xf32, #tpu.memory_space<vmem>>, vector<64x128xf32>
    tpu.vector_store %arg5[%c0_5, %c0_6], %5 {strides = array<i32>} : memref<64x128xf32, #tpu.memory_space<vmem>>, vector<64x128xf32>,
    return
  }
  func.func @transform_0(%arg0: i32, %arg1: i32) -> (i32, i32) {
    %c0_i32 = arith.constant 0 : i32
    %c0_i32_0 = arith.constant 0 : i32
    return %arg0, %c0_i32 : i32, i32
  }
  func.func @transform_1(%arg0: i32, %arg1: i32) -> (i32, i32) {
    %c0_i32 = arith.constant 0 : i32
    %c0_i32_0 = arith.constant 0 : i32
    return %c0_i32, %arg1 : i32, i32
  }
  func.func @transform_2(%arg0: i32, %arg1: i32) -> (i32, i32) {
    %c0_i32 = arith.constant 0 : i32
    %c0_i32_0 = arith.constant 0 : i32
    return %c0_i32, %arg1 : i32, i32
  }
  func.func @transform_3(%arg0: i32, %arg1: i32) -> (i32, i32) {
    %c0_i32 = arith.constant 0 : i32
    return %arg0, %arg1 : i32, i32
  }
}

module attributes {stable_mosaic.version = 11 : i64} {
  func.func @_lstm_stack_kernel(%arg0: i32, %arg1: memref<64x128xbf16, #tpu.memory_space<vmem>>, %arg2: memref<128x512xbf16, #tpu.memory_space<vmem>>, %arg3: memref<128x512xbf16, #tpu.memory_space<vmem>>, %arg4: memref<1x512xf32, #tpu.memory_space<vmem>>, %arg5: memref<256x512xbf16, #tpu.memory_space<vmem>>, %arg6: memref<1x512xf32, #tpu.memory_space<vmem>>, %arg7: memref<8x8x128xbf16, #tpu.memory_space<vmem>>, %arg8: memref<64x512xf32, #tpu.memory_space<vmem>>, %arg9: memref<8x8x128xf32, #tpu.memory_space<vmem>>, %arg10: memref<8x128xf32, #tpu.memory_space<vmem>>, %arg11: memref<8x128xf32, #tpu.memory_space<vmem>>, %arg12: memref<8x128xf32, #tpu.memory_space<vmem>>, %arg13: memref<8x128xf32, #tpu.memory_space<vmem>>) attributes {dimension_semantics = [#tpu.dimension_semantics<arbitrary>], iteration_bounds = array<i64: 1>, scalar_prefetch = 0 : i64, scratch_operands = 6 : i64, tpu.core_type = #tpu.core_type<tc>, window_params = [{transform_indices = @transform_0, window_bounds = array<i64: 64, 128>}, {pipeline_mode = #tpu.pipeline_mode<synchronous>, transform_indices = @transform_1, window_bounds = array<i64: 128, 512>}, {pipeline_mode = #tpu.pipeline_mode<synchronous>, transform_indices = @transform_2, window_bounds = array<i64: 128, 512>}, {pipeline_mode = #tpu.pipeline_mode<synchronous>, transform_indices = @transform_3, window_bounds = array<i64: 1, 512>}, {pipeline_mode = #tpu.pipeline_mode<synchronous>, transform_indices = @transform_4, window_bounds = array<i64: 256, 512>}, {pipeline_mode = #tpu.pipeline_mode<synchronous>, transform_indices = @transform_5, window_bounds = array<i64: 1, 512>}, {transform_indices = @transform_6, window_bounds = array<i64: 8, 8, 128>}]} {
    %c0_i32 = arith.constant 0 : i32
    %0 = arith.cmpi eq, %arg0, %c0_i32 : i32
    %1 = arith.extui %0 : i1 to i32
    %c0_i32_0 = arith.constant 0 : i32
    %2 = arith.cmpi ne, %1, %c0_i32_0 : i32
    scf.if %2 {
      %cst_133 = arith.constant 0.000000e+00 : f32
      %544 = vector.broadcast %cst_133 : f32 to vector<8x128xf32>
      %c0_134 = arith.constant 0 : index
      %c0_135 = arith.constant 0 : index
      %545 = vector.load %arg10[%c0_134, %c0_135] : memref<8x128xf32, #tpu.memory_space<vmem>>, vector<8x128xf32>
      tpu.vector_store %arg10[%c0_134, %c0_135], %544 {strides = array<i32>} : memref<8x128xf32, #tpu.memory_space<vmem>>, vector<8x128xf32>,
      %c0_136 = arith.constant 0 : index
      %c0_137 = arith.constant 0 : index
      %546 = vector.load %arg11[%c0_136, %c0_137] : memref<8x128xf32, #tpu.memory_space<vmem>>, vector<8x128xf32>
      tpu.vector_store %arg11[%c0_136, %c0_137], %544 {strides = array<i32>} : memref<8x128xf32, #tpu.memory_space<vmem>>, vector<8x128xf32>,
      %c0_138 = arith.constant 0 : index
      %c0_139 = arith.constant 0 : index
      %547 = vector.load %arg12[%c0_138, %c0_139] : memref<8x128xf32, #tpu.memory_space<vmem>>, vector<8x128xf32>
      tpu.vector_store %arg12[%c0_138, %c0_139], %544 {strides = array<i32>} : memref<8x128xf32, #tpu.memory_space<vmem>>, vector<8x128xf32>,
      %c0_140 = arith.constant 0 : index
      %c0_141 = arith.constant 0 : index
      %548 = vector.load %arg13[%c0_140, %c0_141] : memref<8x128xf32, #tpu.memory_space<vmem>>, vector<8x128xf32>
      tpu.vector_store %arg13[%c0_140, %c0_141], %544 {strides = array<i32>} : memref<8x128xf32, #tpu.memory_space<vmem>>, vector<8x128xf32>,
    } else {
    }
    %c0 = arith.constant 0 : index
    %c0_1 = arith.constant 0 : index
    %3 = vector.load %arg1[%c0, %c0_1] : memref<64x128xbf16, #tpu.memory_space<vmem>>, vector<64x128xbf16>
    %c0_2 = arith.constant 0 : index
    %c0_3 = arith.constant 0 : index
    %4 = vector.load %arg2[%c0_2, %c0_3] : memref<128x512xbf16, #tpu.memory_space<vmem>>, vector<128x512xbf16>
    %cst = arith.constant dense<0.000000e+00> : vector<64x512xf32>
    %5 = tpu.matmul %3, %4, %cst {dimension_numbers = #tpu.dot_dimension_numbers<[1], [0], [0], [1], [0, 0, 1, 1], [], []>} : vector<64x128xbf16>, vector<128x512xbf16>, vector<64x512xf32> -> vector<64x512xf32>
    %c0_4 = arith.constant 0 : index
    %c0_5 = arith.constant 0 : index
    %6 = vector.load %arg4[%c0_4, %c0_5] : memref<1x512xf32, #tpu.memory_space<vmem>>, vector<1x512xf32>
    %7 = vector.broadcast %6 : vector<1x512xf32> to vector<64x512xf32>
    %8 = arith.addf %5, %7 : vector<64x512xf32>
    %c0_6 = arith.constant 0 : index
    %c0_7 = arith.constant 0 : index
    %9 = vector.load %arg8[%c0_6, %c0_7] : memref<64x512xf32, #tpu.memory_space<vmem>>, vector<64x512xf32>
    tpu.vector_store %arg8[%c0_6, %c0_7], %8 {strides = array<i32>} : memref<64x512xf32, #tpu.memory_space<vmem>>, vector<64x512xf32>,
    %c0_8 = arith.constant 0 : index
    %c0_9 = arith.constant 0 : index
    %10 = vector.load %arg3[%c0_8, %c0_9] : memref<128x512xbf16, #tpu.memory_space<vmem>>, vector<128x512xbf16>
    %c0_10 = arith.constant 0 : index
    %c0_11 = arith.constant 0 : index
    %11 = vector.load %arg5[%c0_10, %c0_11] : memref<256x512xbf16, #tpu.memory_space<vmem>>, vector<256x512xbf16>
    %c0_12 = arith.constant 0 : index
    %c0_13 = arith.constant 0 : index
    %12 = vector.load %arg6[%c0_12, %c0_13] : memref<1x512xf32, #tpu.memory_space<vmem>>, vector<1x512xf32>
    %c0_14 = arith.constant 0 : index
    %c0_15 = arith.constant 0 : index
    %13 = vector.load %arg10[%c0_14, %c0_15] : memref<8x128xf32, #tpu.memory_space<vmem>>, vector<8x128xf32>
    %c0_16 = arith.constant 0 : index
    %c0_17 = arith.constant 0 : index
    %14 = vector.load %arg11[%c0_16, %c0_17] : memref<8x128xf32, #tpu.memory_space<vmem>>, vector<8x128xf32>
    %c0_18 = arith.constant 0 : index
    %c0_19 = arith.constant 0 : index
    %15 = vector.load %arg12[%c0_18, %c0_19] : memref<8x128xf32, #tpu.memory_space<vmem>>, vector<8x128xf32>
    %c0_20 = arith.constant 0 : index
    %c0_21 = arith.constant 0 : index
    %16 = vector.load %arg13[%c0_20, %c0_21] : memref<8x128xf32, #tpu.memory_space<vmem>>, vector<8x128xf32>
    %c0_i32_22 = arith.constant 0 : i32
    %c8_i32 = arith.constant 8 : i32
    %17 = arith.muli %c0_i32_22, %c8_i32 : i32
    %18 = tpu.assume_multiple %17, 8 : i32
    %19 = arith.index_cast %18 : i32 to index
    %c0_23 = arith.constant 0 : index
    %20 = vector.load %arg8[%19, %c0_23] : memref<64x512xf32, #tpu.memory_space<vmem>>, vector<8x512xf32>
    %21 = arith.truncf %13 : vector<8x128xf32> to vector<8x128xbf16>
    %cst_24 = arith.constant dense<0.000000e+00> : vector<8x512xf32>
    %22 = tpu.matmul %21, %10, %cst_24 {dimension_numbers = #tpu.dot_dimension_numbers<[1], [0], [0], [1], [0, 0, 1, 1], [], []>} : vector<8x128xbf16>, vector<128x512xbf16>, vector<8x512xf32> -> vector<8x512xf32>
    %23 = arith.addf %20, %22 : vector<8x512xf32>
    %24 = vector.extract_strided_slice %23 {offsets = [0, 0], sizes = [8, 128], strides = [1, 1]} : vector<8x512xf32> to vector<8x128xf32>
    %25 = arith.negf %24 : vector<8x128xf32>
    %26 = math.exp %25 : vector<8x128xf32>
    %cst_25 = arith.constant 1.000000e+00 : f32
    %27 = vector.broadcast %cst_25 : f32 to vector<8x128xf32>
    %28 = arith.addf %27, %26 : vector<8x128xf32>
    %29 = arith.divf %27, %28 : vector<8x128xf32>
    %30 = vector.extract_strided_slice %23 {offsets = [0, 128], sizes = [8, 128], strides = [1, 1]} : vector<8x512xf32> to vector<8x128xf32>
    %31 = arith.negf %30 : vector<8x128xf32>
    %32 = math.exp %31 : vector<8x128xf32>
    %cst_26 = arith.constant 1.000000e+00 : f32
    %33 = vector.broadcast %cst_26 : f32 to vector<8x128xf32>
    %34 = arith.addf %33, %32 : vector<8x128xf32>
    %35 = arith.divf %33, %34 : vector<8x128xf32>
    %36 = vector.extract_strided_slice %23 {offsets = [0, 256], sizes = [8, 128], strides = [1, 1]} : vector<8x512xf32> to vector<8x128xf32>
    %37 = math.tanh %36 : vector<8x128xf32>
    %38 = vector.extract_strided_slice %23 {offsets = [0, 384], sizes = [8, 128], strides = [1, 1]} : vector<8x512xf32> to vector<8x128xf32>
    %39 = arith.negf %38 : vector<8x128xf32>
    %40 = math.exp %39 : vector<8x128xf32>
    %cst_27 = arith.constant 1.000000e+00 : f32
    %41 = vector.broadcast %cst_27 : f32 to vector<8x128xf32>
    %42 = arith.addf %41, %40 : vector<8x128xf32>
    %43 = arith.divf %41, %42 : vector<8x128xf32>
    %44 = arith.mulf %35, %14 : vector<8x128xf32>
    %45 = arith.mulf %29, %37 : vector<8x128xf32>
    %46 = arith.addf %44, %45 : vector<8x128xf32>
    %47 = math.tanh %46 : vector<8x128xf32>
    %48 = arith.mulf %43, %47 : vector<8x128xf32>
    %49 = tpu.concatenate %48, %15 in 1 : vector<8x128xf32>, vector<8x128xf32> -> vector<8x256xf32>
    %50 = arith.truncf %49 : vector<8x256xf32> to vector<8x256xbf16>
    %cst_28 = arith.constant dense<0.000000e+00> : vector<8x512xf32>
    %51 = tpu.matmul %50, %11, %cst_28 {dimension_numbers = #tpu.dot_dimension_numbers<[1], [0], [0], [1], [0, 0, 1, 1], [], []>} : vector<8x256xbf16>, vector<256x512xbf16>, vector<8x512xf32> -> vector<8x512xf32>
    %52 = vector.broadcast %12 : vector<1x512xf32> to vector<8x512xf32>
    %53 = arith.addf %51, %52 : vector<8x512xf32>
    %54 = vector.extract_strided_slice %53 {offsets = [0, 0], sizes = [8, 128], strides = [1, 1]} : vector<8x512xf32> to vector<8x128xf32>
    %55 = arith.negf %54 : vector<8x128xf32>
    %56 = math.exp %55 : vector<8x128xf32>
    %cst_29 = arith.constant 1.000000e+00 : f32
    %57 = vector.broadcast %cst_29 : f32 to vector<8x128xf32>
    %58 = arith.addf %57, %56 : vector<8x128xf32>
    %59 = arith.divf %57, %58 : vector<8x128xf32>
    %60 = vector.extract_strided_slice %53 {offsets = [0, 128], sizes = [8, 128], strides = [1, 1]} : vector<8x512xf32> to vector<8x128xf32>
    %61 = arith.negf %60 : vector<8x128xf32>
    %62 = math.exp %61 : vector<8x128xf32>
    %cst_30 = arith.constant 1.000000e+00 : f32
    %63 = vector.broadcast %cst_30 : f32 to vector<8x128xf32>
    %64 = arith.addf %63, %62 : vector<8x128xf32>
    %65 = arith.divf %63, %64 : vector<8x128xf32>
    %66 = vector.extract_strided_slice %53 {offsets = [0, 256], sizes = [8, 128], strides = [1, 1]} : vector<8x512xf32> to vector<8x128xf32>
    %67 = math.tanh %66 : vector<8x128xf32>
    %68 = vector.extract_strided_slice %53 {offsets = [0, 384], sizes = [8, 128], strides = [1, 1]} : vector<8x512xf32> to vector<8x128xf32>
    %69 = arith.negf %68 : vector<8x128xf32>
    %70 = math.exp %69 : vector<8x128xf32>
    %cst_31 = arith.constant 1.000000e+00 : f32
    %71 = vector.broadcast %cst_31 : f32 to vector<8x128xf32>
    %72 = arith.addf %71, %70 : vector<8x128xf32>
    %73 = arith.divf %71, %72 : vector<8x128xf32>
    %74 = arith.mulf %65, %16 : vector<8x128xf32>
    %75 = arith.mulf %59, %67 : vector<8x128xf32>
    %76 = arith.addf %74, %75 : vector<8x128xf32>
    %77 = math.tanh %76 : vector<8x128xf32>
    %78 = arith.mulf %73, %77 : vector<8x128xf32>
    %79 = vector.shape_cast %78 : vector<8x128xf32> to vector<8x1x128xf32>
    %c0_32 = arith.constant 0 : index
    %80 = arith.index_cast %c0_i32_22 : i32 to index
    %c0_33 = arith.constant 0 : index
    %81 = vector.load %arg9[%c0_32, %80, %c0_33] : memref<8x8x128xf32, #tpu.memory_space<vmem>>, vector<8x1x128xf32>
    tpu.vector_store %arg9[%c0_32, %80, %c0_33], %79 {strides = array<i32>} : memref<8x8x128xf32, #tpu.memory_space<vmem>>, vector<8x1x128xf32>,
    %c1_i32 = arith.constant 1 : i32
    %c8_i32_34 = arith.constant 8 : i32
    %82 = arith.muli %c1_i32, %c8_i32_34 : i32
    %83 = tpu.assume_multiple %82, 8 : i32
    %84 = arith.index_cast %83 : i32 to index
    %c0_35 = arith.constant 0 : index
    %85 = vector.load %arg8[%84, %c0_35] : memref<64x512xf32, #tpu.memory_space<vmem>>, vector<8x512xf32>
    %86 = arith.truncf %48 : vector<8x128xf32> to vector<8x128xbf16>
    %cst_36 = arith.constant dense<0.000000e+00> : vector<8x512xf32>
    %87 = tpu.matmul %86, %10, %cst_36 {dimension_numbers = #tpu.dot_dimension_numbers<[1], [0], [0], [1], [0, 0, 1, 1], [], []>} : vector<8x128xbf16>, vector<128x512xbf16>, vector<8x512xf32> -> vector<8x512xf32>
    %88 = arith.addf %85, %87 : vector<8x512xf32>
    %89 = vector.extract_strided_slice %88 {offsets = [0, 0], sizes = [8, 128], strides = [1, 1]} : vector<8x512xf32> to vector<8x128xf32>
    %90 = arith.negf %89 : vector<8x128xf32>
    %91 = math.exp %90 : vector<8x128xf32>
    %cst_37 = arith.constant 1.000000e+00 : f32
    %92 = vector.broadcast %cst_37 : f32 to vector<8x128xf32>
    %93 = arith.addf %92, %91 : vector<8x128xf32>
    %94 = arith.divf %92, %93 : vector<8x128xf32>
    %95 = vector.extract_strided_slice %88 {offsets = [0, 128], sizes = [8, 128], strides = [1, 1]} : vector<8x512xf32> to vector<8x128xf32>
    %96 = arith.negf %95 : vector<8x128xf32>
    %97 = math.exp %96 : vector<8x128xf32>
    %cst_38 = arith.constant 1.000000e+00 : f32
    %98 = vector.broadcast %cst_38 : f32 to vector<8x128xf32>
    %99 = arith.addf %98, %97 : vector<8x128xf32>
    %100 = arith.divf %98, %99 : vector<8x128xf32>
    %101 = vector.extract_strided_slice %88 {offsets = [0, 256], sizes = [8, 128], strides = [1, 1]} : vector<8x512xf32> to vector<8x128xf32>
    %102 = math.tanh %101 : vector<8x128xf32>
    %103 = vector.extract_strided_slice %88 {offsets = [0, 384], sizes = [8, 128], strides = [1, 1]} : vector<8x512xf32> to vector<8x128xf32>
    %104 = arith.negf %103 : vector<8x128xf32>
    %105 = math.exp %104 : vector<8x128xf32>
    %cst_39 = arith.constant 1.000000e+00 : f32
    %106 = vector.broadcast %cst_39 : f32 to vector<8x128xf32>
    %107 = arith.addf %106, %105 : vector<8x128xf32>
    %108 = arith.divf %106, %107 : vector<8x128xf32>
    %109 = arith.mulf %100, %46 : vector<8x128xf32>
    %110 = arith.mulf %94, %102 : vector<8x128xf32>
    %111 = arith.addf %109, %110 : vector<8x128xf32>
    %112 = math.tanh %111 : vector<8x128xf32>
    %113 = arith.mulf %108, %112 : vector<8x128xf32>
    %114 = tpu.concatenate %113, %78 in 1 : vector<8x128xf32>, vector<8x128xf32> -> vector<8x256xf32>
    %115 = arith.truncf %114 : vector<8x256xf32> to vector<8x256xbf16>
    %cst_40 = arith.constant dense<0.000000e+00> : vector<8x512xf32>
    %116 = tpu.matmul %115, %11, %cst_40 {dimension_numbers = #tpu.dot_dimension_numbers<[1], [0], [0], [1], [0, 0, 1, 1], [], []>} : vector<8x256xbf16>, vector<256x512xbf16>, vector<8x512xf32> -> vector<8x512xf32>
    %117 = vector.broadcast %12 : vector<1x512xf32> to vector<8x512xf32>
    %118 = arith.addf %116, %117 : vector<8x512xf32>
    %119 = vector.extract_strided_slice %118 {offsets = [0, 0], sizes = [8, 128], strides = [1, 1]} : vector<8x512xf32> to vector<8x128xf32>
    %120 = arith.negf %119 : vector<8x128xf32>
    %121 = math.exp %120 : vector<8x128xf32>
    %cst_41 = arith.constant 1.000000e+00 : f32
    %122 = vector.broadcast %cst_41 : f32 to vector<8x128xf32>
    %123 = arith.addf %122, %121 : vector<8x128xf32>
    %124 = arith.divf %122, %123 : vector<8x128xf32>
    %125 = vector.extract_strided_slice %118 {offsets = [0, 128], sizes = [8, 128], strides = [1, 1]} : vector<8x512xf32> to vector<8x128xf32>
    %126 = arith.negf %125 : vector<8x128xf32>
    %127 = math.exp %126 : vector<8x128xf32>
    %cst_42 = arith.constant 1.000000e+00 : f32
    %128 = vector.broadcast %cst_42 : f32 to vector<8x128xf32>
    %129 = arith.addf %128, %127 : vector<8x128xf32>
    %130 = arith.divf %128, %129 : vector<8x128xf32>
    %131 = vector.extract_strided_slice %118 {offsets = [0, 256], sizes = [8, 128], strides = [1, 1]} : vector<8x512xf32> to vector<8x128xf32>
    %132 = math.tanh %131 : vector<8x128xf32>
    %133 = vector.extract_strided_slice %118 {offsets = [0, 384], sizes = [8, 128], strides = [1, 1]} : vector<8x512xf32> to vector<8x128xf32>
    %134 = arith.negf %133 : vector<8x128xf32>
    %135 = math.exp %134 : vector<8x128xf32>
    %cst_43 = arith.constant 1.000000e+00 : f32
    %136 = vector.broadcast %cst_43 : f32 to vector<8x128xf32>
    %137 = arith.addf %136, %135 : vector<8x128xf32>
    %138 = arith.divf %136, %137 : vector<8x128xf32>
    %139 = arith.mulf %130, %76 : vector<8x128xf32>
    %140 = arith.mulf %124, %132 : vector<8x128xf32>
    %141 = arith.addf %139, %140 : vector<8x128xf32>
    %142 = math.tanh %141 : vector<8x128xf32>
    %143 = arith.mulf %138, %142 : vector<8x128xf32>
    %144 = vector.shape_cast %143 : vector<8x128xf32> to vector<8x1x128xf32>
    %c0_44 = arith.constant 0 : index
    %145 = arith.index_cast %c1_i32 : i32 to index
    %c0_45 = arith.constant 0 : index
    %146 = vector.load %arg9[%c0_44, %145, %c0_45] : memref<8x8x128xf32, #tpu.memory_space<vmem>>, vector<8x1x128xf32>
    tpu.vector_store %arg9[%c0_44, %145, %c0_45], %144 {strides = array<i32>} : memref<8x8x128xf32, #tpu.memory_space<vmem>>, vector<8x1x128xf32>,
    %c2_i32 = arith.constant 2 : i32
    %c8_i32_46 = arith.constant 8 : i32
    %147 = arith.muli %c2_i32, %c8_i32_46 : i32
    %148 = tpu.assume_multiple %147, 8 : i32
    %149 = arith.index_cast %148 : i32 to index
    %c0_47 = arith.constant 0 : index
    %150 = vector.load %arg8[%149, %c0_47] : memref<64x512xf32, #tpu.memory_space<vmem>>, vector<8x512xf32>
    %151 = arith.truncf %113 : vector<8x128xf32> to vector<8x128xbf16>
    %cst_48 = arith.constant dense<0.000000e+00> : vector<8x512xf32>
    %152 = tpu.matmul %151, %10, %cst_48 {dimension_numbers = #tpu.dot_dimension_numbers<[1], [0], [0], [1], [0, 0, 1, 1], [], []>} : vector<8x128xbf16>, vector<128x512xbf16>, vector<8x512xf32> -> vector<8x512xf32>
    %153 = arith.addf %150, %152 : vector<8x512xf32>
    %154 = vector.extract_strided_slice %153 {offsets = [0, 0], sizes = [8, 128], strides = [1, 1]} : vector<8x512xf32> to vector<8x128xf32>
    %155 = arith.negf %154 : vector<8x128xf32>
    %156 = math.exp %155 : vector<8x128xf32>
    %cst_49 = arith.constant 1.000000e+00 : f32
    %157 = vector.broadcast %cst_49 : f32 to vector<8x128xf32>
    %158 = arith.addf %157, %156 : vector<8x128xf32>
    %159 = arith.divf %157, %158 : vector<8x128xf32>
    %160 = vector.extract_strided_slice %153 {offsets = [0, 128], sizes = [8, 128], strides = [1, 1]} : vector<8x512xf32> to vector<8x128xf32>
    %161 = arith.negf %160 : vector<8x128xf32>
    %162 = math.exp %161 : vector<8x128xf32>
    %cst_50 = arith.constant 1.000000e+00 : f32
    %163 = vector.broadcast %cst_50 : f32 to vector<8x128xf32>
    %164 = arith.addf %163, %162 : vector<8x128xf32>
    %165 = arith.divf %163, %164 : vector<8x128xf32>
    %166 = vector.extract_strided_slice %153 {offsets = [0, 256], sizes = [8, 128], strides = [1, 1]} : vector<8x512xf32> to vector<8x128xf32>
    %167 = math.tanh %166 : vector<8x128xf32>
    %168 = vector.extract_strided_slice %153 {offsets = [0, 384], sizes = [8, 128], strides = [1, 1]} : vector<8x512xf32> to vector<8x128xf32>
    %169 = arith.negf %168 : vector<8x128xf32>
    %170 = math.exp %169 : vector<8x128xf32>
    %cst_51 = arith.constant 1.000000e+00 : f32
    %171 = vector.broadcast %cst_51 : f32 to vector<8x128xf32>
    %172 = arith.addf %171, %170 : vector<8x128xf32>
    %173 = arith.divf %171, %172 : vector<8x128xf32>
    %174 = arith.mulf %165, %111 : vector<8x128xf32>
    %175 = arith.mulf %159, %167 : vector<8x128xf32>
    %176 = arith.addf %174, %175 : vector<8x128xf32>
    %177 = math.tanh %176 : vector<8x128xf32>
    %178 = arith.mulf %173, %177 : vector<8x128xf32>
    %179 = tpu.concatenate %178, %143 in 1 : vector<8x128xf32>, vector<8x128xf32> -> vector<8x256xf32>
    %180 = arith.truncf %179 : vector<8x256xf32> to vector<8x256xbf16>
    %cst_52 = arith.constant dense<0.000000e+00> : vector<8x512xf32>
    %181 = tpu.matmul %180, %11, %cst_52 {dimension_numbers = #tpu.dot_dimension_numbers<[1], [0], [0], [1], [0, 0, 1, 1], [], []>} : vector<8x256xbf16>, vector<256x512xbf16>, vector<8x512xf32> -> vector<8x512xf32>
    %182 = vector.broadcast %12 : vector<1x512xf32> to vector<8x512xf32>
    %183 = arith.addf %181, %182 : vector<8x512xf32>
    %184 = vector.extract_strided_slice %183 {offsets = [0, 0], sizes = [8, 128], strides = [1, 1]} : vector<8x512xf32> to vector<8x128xf32>
    %185 = arith.negf %184 : vector<8x128xf32>
    %186 = math.exp %185 : vector<8x128xf32>
    %cst_53 = arith.constant 1.000000e+00 : f32
    %187 = vector.broadcast %cst_53 : f32 to vector<8x128xf32>
    %188 = arith.addf %187, %186 : vector<8x128xf32>
    %189 = arith.divf %187, %188 : vector<8x128xf32>
    %190 = vector.extract_strided_slice %183 {offsets = [0, 128], sizes = [8, 128], strides = [1, 1]} : vector<8x512xf32> to vector<8x128xf32>
    %191 = arith.negf %190 : vector<8x128xf32>
    %192 = math.exp %191 : vector<8x128xf32>
    %cst_54 = arith.constant 1.000000e+00 : f32
    %193 = vector.broadcast %cst_54 : f32 to vector<8x128xf32>
    %194 = arith.addf %193, %192 : vector<8x128xf32>
    %195 = arith.divf %193, %194 : vector<8x128xf32>
    %196 = vector.extract_strided_slice %183 {offsets = [0, 256], sizes = [8, 128], strides = [1, 1]} : vector<8x512xf32> to vector<8x128xf32>
    %197 = math.tanh %196 : vector<8x128xf32>
    %198 = vector.extract_strided_slice %183 {offsets = [0, 384], sizes = [8, 128], strides = [1, 1]} : vector<8x512xf32> to vector<8x128xf32>
    %199 = arith.negf %198 : vector<8x128xf32>
    %200 = math.exp %199 : vector<8x128xf32>
    %cst_55 = arith.constant 1.000000e+00 : f32
    %201 = vector.broadcast %cst_55 : f32 to vector<8x128xf32>
    %202 = arith.addf %201, %200 : vector<8x128xf32>
    %203 = arith.divf %201, %202 : vector<8x128xf32>
    %204 = arith.mulf %195, %141 : vector<8x128xf32>
    %205 = arith.mulf %189, %197 : vector<8x128xf32>
    %206 = arith.addf %204, %205 : vector<8x128xf32>
    %207 = math.tanh %206 : vector<8x128xf32>
    %208 = arith.mulf %203, %207 : vector<8x128xf32>
    %209 = vector.shape_cast %208 : vector<8x128xf32> to vector<8x1x128xf32>
    %c0_56 = arith.constant 0 : index
    %210 = arith.index_cast %c2_i32 : i32 to index
    %c0_57 = arith.constant 0 : index
    %211 = vector.load %arg9[%c0_56, %210, %c0_57] : memref<8x8x128xf32, #tpu.memory_space<vmem>>, vector<8x1x128xf32>
    tpu.vector_store %arg9[%c0_56, %210, %c0_57], %209 {strides = array<i32>} : memref<8x8x128xf32, #tpu.memory_space<vmem>>, vector<8x1x128xf32>,
    %c3_i32 = arith.constant 3 : i32
    %c8_i32_58 = arith.constant 8 : i32
    %212 = arith.muli %c3_i32, %c8_i32_58 : i32
    %213 = tpu.assume_multiple %212, 8 : i32
    %214 = arith.index_cast %213 : i32 to index
    %c0_59 = arith.constant 0 : index
    %215 = vector.load %arg8[%214, %c0_59] : memref<64x512xf32, #tpu.memory_space<vmem>>, vector<8x512xf32>
    %216 = arith.truncf %178 : vector<8x128xf32> to vector<8x128xbf16>
    %cst_60 = arith.constant dense<0.000000e+00> : vector<8x512xf32>
    %217 = tpu.matmul %216, %10, %cst_60 {dimension_numbers = #tpu.dot_dimension_numbers<[1], [0], [0], [1], [0, 0, 1, 1], [], []>} : vector<8x128xbf16>, vector<128x512xbf16>, vector<8x512xf32> -> vector<8x512xf32>
    %218 = arith.addf %215, %217 : vector<8x512xf32>
    %219 = vector.extract_strided_slice %218 {offsets = [0, 0], sizes = [8, 128], strides = [1, 1]} : vector<8x512xf32> to vector<8x128xf32>
    %220 = arith.negf %219 : vector<8x128xf32>
    %221 = math.exp %220 : vector<8x128xf32>
    %cst_61 = arith.constant 1.000000e+00 : f32
    %222 = vector.broadcast %cst_61 : f32 to vector<8x128xf32>
    %223 = arith.addf %222, %221 : vector<8x128xf32>
    %224 = arith.divf %222, %223 : vector<8x128xf32>
    %225 = vector.extract_strided_slice %218 {offsets = [0, 128], sizes = [8, 128], strides = [1, 1]} : vector<8x512xf32> to vector<8x128xf32>
    %226 = arith.negf %225 : vector<8x128xf32>
    %227 = math.exp %226 : vector<8x128xf32>
    %cst_62 = arith.constant 1.000000e+00 : f32
    %228 = vector.broadcast %cst_62 : f32 to vector<8x128xf32>
    %229 = arith.addf %228, %227 : vector<8x128xf32>
    %230 = arith.divf %228, %229 : vector<8x128xf32>
    %231 = vector.extract_strided_slice %218 {offsets = [0, 256], sizes = [8, 128], strides = [1, 1]} : vector<8x512xf32> to vector<8x128xf32>
    %232 = math.tanh %231 : vector<8x128xf32>
    %233 = vector.extract_strided_slice %218 {offsets = [0, 384], sizes = [8, 128], strides = [1, 1]} : vector<8x512xf32> to vector<8x128xf32>
    %234 = arith.negf %233 : vector<8x128xf32>
    %235 = math.exp %234 : vector<8x128xf32>
    %cst_63 = arith.constant 1.000000e+00 : f32
    %236 = vector.broadcast %cst_63 : f32 to vector<8x128xf32>
    %237 = arith.addf %236, %235 : vector<8x128xf32>
    %238 = arith.divf %236, %237 : vector<8x128xf32>
    %239 = arith.mulf %230, %176 : vector<8x128xf32>
    %240 = arith.mulf %224, %232 : vector<8x128xf32>
    %241 = arith.addf %239, %240 : vector<8x128xf32>
    %242 = math.tanh %241 : vector<8x128xf32>
    %243 = arith.mulf %238, %242 : vector<8x128xf32>
    %244 = tpu.concatenate %243, %208 in 1 : vector<8x128xf32>, vector<8x128xf32> -> vector<8x256xf32>
    %245 = arith.truncf %244 : vector<8x256xf32> to vector<8x256xbf16>
    %cst_64 = arith.constant dense<0.000000e+00> : vector<8x512xf32>
    %246 = tpu.matmul %245, %11, %cst_64 {dimension_numbers = #tpu.dot_dimension_numbers<[1], [0], [0], [1], [0, 0, 1, 1], [], []>} : vector<8x256xbf16>, vector<256x512xbf16>, vector<8x512xf32> -> vector<8x512xf32>
    %247 = vector.broadcast %12 : vector<1x512xf32> to vector<8x512xf32>
    %248 = arith.addf %246, %247 : vector<8x512xf32>
    %249 = vector.extract_strided_slice %248 {offsets = [0, 0], sizes = [8, 128], strides = [1, 1]} : vector<8x512xf32> to vector<8x128xf32>
    %250 = arith.negf %249 : vector<8x128xf32>
    %251 = math.exp %250 : vector<8x128xf32>
    %cst_65 = arith.constant 1.000000e+00 : f32
    %252 = vector.broadcast %cst_65 : f32 to vector<8x128xf32>
    %253 = arith.addf %252, %251 : vector<8x128xf32>
    %254 = arith.divf %252, %253 : vector<8x128xf32>
    %255 = vector.extract_strided_slice %248 {offsets = [0, 128], sizes = [8, 128], strides = [1, 1]} : vector<8x512xf32> to vector<8x128xf32>
    %256 = arith.negf %255 : vector<8x128xf32>
    %257 = math.exp %256 : vector<8x128xf32>
    %cst_66 = arith.constant 1.000000e+00 : f32
    %258 = vector.broadcast %cst_66 : f32 to vector<8x128xf32>
    %259 = arith.addf %258, %257 : vector<8x128xf32>
    %260 = arith.divf %258, %259 : vector<8x128xf32>
    %261 = vector.extract_strided_slice %248 {offsets = [0, 256], sizes = [8, 128], strides = [1, 1]} : vector<8x512xf32> to vector<8x128xf32>
    %262 = math.tanh %261 : vector<8x128xf32>
    %263 = vector.extract_strided_slice %248 {offsets = [0, 384], sizes = [8, 128], strides = [1, 1]} : vector<8x512xf32> to vector<8x128xf32>
    %264 = arith.negf %263 : vector<8x128xf32>
    %265 = math.exp %264 : vector<8x128xf32>
    %cst_67 = arith.constant 1.000000e+00 : f32
    %266 = vector.broadcast %cst_67 : f32 to vector<8x128xf32>
    %267 = arith.addf %266, %265 : vector<8x128xf32>
    %268 = arith.divf %266, %267 : vector<8x128xf32>
    %269 = arith.mulf %260, %206 : vector<8x128xf32>
    %270 = arith.mulf %254, %262 : vector<8x128xf32>
    %271 = arith.addf %269, %270 : vector<8x128xf32>
    %272 = math.tanh %271 : vector<8x128xf32>
    %273 = arith.mulf %268, %272 : vector<8x128xf32>
    %274 = vector.shape_cast %273 : vector<8x128xf32> to vector<8x1x128xf32>
    %c0_68 = arith.constant 0 : index
    %275 = arith.index_cast %c3_i32 : i32 to index
    %c0_69 = arith.constant 0 : index
    %276 = vector.load %arg9[%c0_68, %275, %c0_69] : memref<8x8x128xf32, #tpu.memory_space<vmem>>, vector<8x1x128xf32>
    tpu.vector_store %arg9[%c0_68, %275, %c0_69], %274 {strides = array<i32>} : memref<8x8x128xf32, #tpu.memory_space<vmem>>, vector<8x1x128xf32>,
    %c4_i32 = arith.constant 4 : i32
    %c8_i32_70 = arith.constant 8 : i32
    %277 = arith.muli %c4_i32, %c8_i32_70 : i32
    %278 = tpu.assume_multiple %277, 8 : i32
    %279 = arith.index_cast %278 : i32 to index
    %c0_71 = arith.constant 0 : index
    %280 = vector.load %arg8[%279, %c0_71] : memref<64x512xf32, #tpu.memory_space<vmem>>, vector<8x512xf32>
    %281 = arith.truncf %243 : vector<8x128xf32> to vector<8x128xbf16>
    %cst_72 = arith.constant dense<0.000000e+00> : vector<8x512xf32>
    %282 = tpu.matmul %281, %10, %cst_72 {dimension_numbers = #tpu.dot_dimension_numbers<[1], [0], [0], [1], [0, 0, 1, 1], [], []>} : vector<8x128xbf16>, vector<128x512xbf16>, vector<8x512xf32> -> vector<8x512xf32>
    %283 = arith.addf %280, %282 : vector<8x512xf32>
    %284 = vector.extract_strided_slice %283 {offsets = [0, 0], sizes = [8, 128], strides = [1, 1]} : vector<8x512xf32> to vector<8x128xf32>
    %285 = arith.negf %284 : vector<8x128xf32>
    %286 = math.exp %285 : vector<8x128xf32>
    %cst_73 = arith.constant 1.000000e+00 : f32
    %287 = vector.broadcast %cst_73 : f32 to vector<8x128xf32>
    %288 = arith.addf %287, %286 : vector<8x128xf32>
    %289 = arith.divf %287, %288 : vector<8x128xf32>
    %290 = vector.extract_strided_slice %283 {offsets = [0, 128], sizes = [8, 128], strides = [1, 1]} : vector<8x512xf32> to vector<8x128xf32>
    %291 = arith.negf %290 : vector<8x128xf32>
    %292 = math.exp %291 : vector<8x128xf32>
    %cst_74 = arith.constant 1.000000e+00 : f32
    %293 = vector.broadcast %cst_74 : f32 to vector<8x128xf32>
    %294 = arith.addf %293, %292 : vector<8x128xf32>
    %295 = arith.divf %293, %294 : vector<8x128xf32>
    %296 = vector.extract_strided_slice %283 {offsets = [0, 256], sizes = [8, 128], strides = [1, 1]} : vector<8x512xf32> to vector<8x128xf32>
    %297 = math.tanh %296 : vector<8x128xf32>
    %298 = vector.extract_strided_slice %283 {offsets = [0, 384], sizes = [8, 128], strides = [1, 1]} : vector<8x512xf32> to vector<8x128xf32>
    %299 = arith.negf %298 : vector<8x128xf32>
    %300 = math.exp %299 : vector<8x128xf32>
    %cst_75 = arith.constant 1.000000e+00 : f32
    %301 = vector.broadcast %cst_75 : f32 to vector<8x128xf32>
    %302 = arith.addf %301, %300 : vector<8x128xf32>
    %303 = arith.divf %301, %302 : vector<8x128xf32>
    %304 = arith.mulf %295, %241 : vector<8x128xf32>
    %305 = arith.mulf %289, %297 : vector<8x128xf32>
    %306 = arith.addf %304, %305 : vector<8x128xf32>
    %307 = math.tanh %306 : vector<8x128xf32>
    %308 = arith.mulf %303, %307 : vector<8x128xf32>
    %309 = tpu.concatenate %308, %273 in 1 : vector<8x128xf32>, vector<8x128xf32> -> vector<8x256xf32>
    %310 = arith.truncf %309 : vector<8x256xf32> to vector<8x256xbf16>
    %cst_76 = arith.constant dense<0.000000e+00> : vector<8x512xf32>
    %311 = tpu.matmul %310, %11, %cst_76 {dimension_numbers = #tpu.dot_dimension_numbers<[1], [0], [0], [1], [0, 0, 1, 1], [], []>} : vector<8x256xbf16>, vector<256x512xbf16>, vector<8x512xf32> -> vector<8x512xf32>
    %312 = vector.broadcast %12 : vector<1x512xf32> to vector<8x512xf32>
    %313 = arith.addf %311, %312 : vector<8x512xf32>
    %314 = vector.extract_strided_slice %313 {offsets = [0, 0], sizes = [8, 128], strides = [1, 1]} : vector<8x512xf32> to vector<8x128xf32>
    %315 = arith.negf %314 : vector<8x128xf32>
    %316 = math.exp %315 : vector<8x128xf32>
    %cst_77 = arith.constant 1.000000e+00 : f32
    %317 = vector.broadcast %cst_77 : f32 to vector<8x128xf32>
    %318 = arith.addf %317, %316 : vector<8x128xf32>
    %319 = arith.divf %317, %318 : vector<8x128xf32>
    %320 = vector.extract_strided_slice %313 {offsets = [0, 128], sizes = [8, 128], strides = [1, 1]} : vector<8x512xf32> to vector<8x128xf32>
    %321 = arith.negf %320 : vector<8x128xf32>
    %322 = math.exp %321 : vector<8x128xf32>
    %cst_78 = arith.constant 1.000000e+00 : f32
    %323 = vector.broadcast %cst_78 : f32 to vector<8x128xf32>
    %324 = arith.addf %323, %322 : vector<8x128xf32>
    %325 = arith.divf %323, %324 : vector<8x128xf32>
    %326 = vector.extract_strided_slice %313 {offsets = [0, 256], sizes = [8, 128], strides = [1, 1]} : vector<8x512xf32> to vector<8x128xf32>
    %327 = math.tanh %326 : vector<8x128xf32>
    %328 = vector.extract_strided_slice %313 {offsets = [0, 384], sizes = [8, 128], strides = [1, 1]} : vector<8x512xf32> to vector<8x128xf32>
    %329 = arith.negf %328 : vector<8x128xf32>
    %330 = math.exp %329 : vector<8x128xf32>
    %cst_79 = arith.constant 1.000000e+00 : f32
    %331 = vector.broadcast %cst_79 : f32 to vector<8x128xf32>
    %332 = arith.addf %331, %330 : vector<8x128xf32>
    %333 = arith.divf %331, %332 : vector<8x128xf32>
    %334 = arith.mulf %325, %271 : vector<8x128xf32>
    %335 = arith.mulf %319, %327 : vector<8x128xf32>
    %336 = arith.addf %334, %335 : vector<8x128xf32>
    %337 = math.tanh %336 : vector<8x128xf32>
    %338 = arith.mulf %333, %337 : vector<8x128xf32>
    %339 = vector.shape_cast %338 : vector<8x128xf32> to vector<8x1x128xf32>
    %c0_80 = arith.constant 0 : index
    %340 = arith.index_cast %c4_i32 : i32 to index
    %c0_81 = arith.constant 0 : index
    %341 = vector.load %arg9[%c0_80, %340, %c0_81] : memref<8x8x128xf32, #tpu.memory_space<vmem>>, vector<8x1x128xf32>
    tpu.vector_store %arg9[%c0_80, %340, %c0_81], %339 {strides = array<i32>} : memref<8x8x128xf32, #tpu.memory_space<vmem>>, vector<8x1x128xf32>,
    %c5_i32 = arith.constant 5 : i32
    %c8_i32_82 = arith.constant 8 : i32
    %342 = arith.muli %c5_i32, %c8_i32_82 : i32
    %343 = tpu.assume_multiple %342, 8 : i32
    %344 = arith.index_cast %343 : i32 to index
    %c0_83 = arith.constant 0 : index
    %345 = vector.load %arg8[%344, %c0_83] : memref<64x512xf32, #tpu.memory_space<vmem>>, vector<8x512xf32>
    %346 = arith.truncf %308 : vector<8x128xf32> to vector<8x128xbf16>
    %cst_84 = arith.constant dense<0.000000e+00> : vector<8x512xf32>
    %347 = tpu.matmul %346, %10, %cst_84 {dimension_numbers = #tpu.dot_dimension_numbers<[1], [0], [0], [1], [0, 0, 1, 1], [], []>} : vector<8x128xbf16>, vector<128x512xbf16>, vector<8x512xf32> -> vector<8x512xf32>
    %348 = arith.addf %345, %347 : vector<8x512xf32>
    %349 = vector.extract_strided_slice %348 {offsets = [0, 0], sizes = [8, 128], strides = [1, 1]} : vector<8x512xf32> to vector<8x128xf32>
    %350 = arith.negf %349 : vector<8x128xf32>
    %351 = math.exp %350 : vector<8x128xf32>
    %cst_85 = arith.constant 1.000000e+00 : f32
    %352 = vector.broadcast %cst_85 : f32 to vector<8x128xf32>
    %353 = arith.addf %352, %351 : vector<8x128xf32>
    %354 = arith.divf %352, %353 : vector<8x128xf32>
    %355 = vector.extract_strided_slice %348 {offsets = [0, 128], sizes = [8, 128], strides = [1, 1]} : vector<8x512xf32> to vector<8x128xf32>
    %356 = arith.negf %355 : vector<8x128xf32>
    %357 = math.exp %356 : vector<8x128xf32>
    %cst_86 = arith.constant 1.000000e+00 : f32
    %358 = vector.broadcast %cst_86 : f32 to vector<8x128xf32>
    %359 = arith.addf %358, %357 : vector<8x128xf32>
    %360 = arith.divf %358, %359 : vector<8x128xf32>
    %361 = vector.extract_strided_slice %348 {offsets = [0, 256], sizes = [8, 128], strides = [1, 1]} : vector<8x512xf32> to vector<8x128xf32>
    %362 = math.tanh %361 : vector<8x128xf32>
    %363 = vector.extract_strided_slice %348 {offsets = [0, 384], sizes = [8, 128], strides = [1, 1]} : vector<8x512xf32> to vector<8x128xf32>
    %364 = arith.negf %363 : vector<8x128xf32>
    %365 = math.exp %364 : vector<8x128xf32>
    %cst_87 = arith.constant 1.000000e+00 : f32
    %366 = vector.broadcast %cst_87 : f32 to vector<8x128xf32>
    %367 = arith.addf %366, %365 : vector<8x128xf32>
    %368 = arith.divf %366, %367 : vector<8x128xf32>
    %369 = arith.mulf %360, %306 : vector<8x128xf32>
    %370 = arith.mulf %354, %362 : vector<8x128xf32>
    %371 = arith.addf %369, %370 : vector<8x128xf32>
    %372 = math.tanh %371 : vector<8x128xf32>
    %373 = arith.mulf %368, %372 : vector<8x128xf32>
    %374 = tpu.concatenate %373, %338 in 1 : vector<8x128xf32>, vector<8x128xf32> -> vector<8x256xf32>
    %375 = arith.truncf %374 : vector<8x256xf32> to vector<8x256xbf16>
    %cst_88 = arith.constant dense<0.000000e+00> : vector<8x512xf32>
    %376 = tpu.matmul %375, %11, %cst_88 {dimension_numbers = #tpu.dot_dimension_numbers<[1], [0], [0], [1], [0, 0, 1, 1], [], []>} : vector<8x256xbf16>, vector<256x512xbf16>, vector<8x512xf32> -> vector<8x512xf32>
    %377 = vector.broadcast %12 : vector<1x512xf32> to vector<8x512xf32>
    %378 = arith.addf %376, %377 : vector<8x512xf32>
    %379 = vector.extract_strided_slice %378 {offsets = [0, 0], sizes = [8, 128], strides = [1, 1]} : vector<8x512xf32> to vector<8x128xf32>
    %380 = arith.negf %379 : vector<8x128xf32>
    %381 = math.exp %380 : vector<8x128xf32>
    %cst_89 = arith.constant 1.000000e+00 : f32
    %382 = vector.broadcast %cst_89 : f32 to vector<8x128xf32>
    %383 = arith.addf %382, %381 : vector<8x128xf32>
    %384 = arith.divf %382, %383 : vector<8x128xf32>
    %385 = vector.extract_strided_slice %378 {offsets = [0, 128], sizes = [8, 128], strides = [1, 1]} : vector<8x512xf32> to vector<8x128xf32>
    %386 = arith.negf %385 : vector<8x128xf32>
    %387 = math.exp %386 : vector<8x128xf32>
    %cst_90 = arith.constant 1.000000e+00 : f32
    %388 = vector.broadcast %cst_90 : f32 to vector<8x128xf32>
    %389 = arith.addf %388, %387 : vector<8x128xf32>
    %390 = arith.divf %388, %389 : vector<8x128xf32>
    %391 = vector.extract_strided_slice %378 {offsets = [0, 256], sizes = [8, 128], strides = [1, 1]} : vector<8x512xf32> to vector<8x128xf32>
    %392 = math.tanh %391 : vector<8x128xf32>
    %393 = vector.extract_strided_slice %378 {offsets = [0, 384], sizes = [8, 128], strides = [1, 1]} : vector<8x512xf32> to vector<8x128xf32>
    %394 = arith.negf %393 : vector<8x128xf32>
    %395 = math.exp %394 : vector<8x128xf32>
    %cst_91 = arith.constant 1.000000e+00 : f32
    %396 = vector.broadcast %cst_91 : f32 to vector<8x128xf32>
    %397 = arith.addf %396, %395 : vector<8x128xf32>
    %398 = arith.divf %396, %397 : vector<8x128xf32>
    %399 = arith.mulf %390, %336 : vector<8x128xf32>
    %400 = arith.mulf %384, %392 : vector<8x128xf32>
    %401 = arith.addf %399, %400 : vector<8x128xf32>
    %402 = math.tanh %401 : vector<8x128xf32>
    %403 = arith.mulf %398, %402 : vector<8x128xf32>
    %404 = vector.shape_cast %403 : vector<8x128xf32> to vector<8x1x128xf32>
    %c0_92 = arith.constant 0 : index
    %405 = arith.index_cast %c5_i32 : i32 to index
    %c0_93 = arith.constant 0 : index
    %406 = vector.load %arg9[%c0_92, %405, %c0_93] : memref<8x8x128xf32, #tpu.memory_space<vmem>>, vector<8x1x128xf32>
    tpu.vector_store %arg9[%c0_92, %405, %c0_93], %404 {strides = array<i32>} : memref<8x8x128xf32, #tpu.memory_space<vmem>>, vector<8x1x128xf32>,
    %c6_i32 = arith.constant 6 : i32
    %c8_i32_94 = arith.constant 8 : i32
    %407 = arith.muli %c6_i32, %c8_i32_94 : i32
    %408 = tpu.assume_multiple %407, 8 : i32
    %409 = arith.index_cast %408 : i32 to index
    %c0_95 = arith.constant 0 : index
    %410 = vector.load %arg8[%409, %c0_95] : memref<64x512xf32, #tpu.memory_space<vmem>>, vector<8x512xf32>
    %411 = arith.truncf %373 : vector<8x128xf32> to vector<8x128xbf16>
    %cst_96 = arith.constant dense<0.000000e+00> : vector<8x512xf32>
    %412 = tpu.matmul %411, %10, %cst_96 {dimension_numbers = #tpu.dot_dimension_numbers<[1], [0], [0], [1], [0, 0, 1, 1], [], []>} : vector<8x128xbf16>, vector<128x512xbf16>, vector<8x512xf32> -> vector<8x512xf32>
    %413 = arith.addf %410, %412 : vector<8x512xf32>
    %414 = vector.extract_strided_slice %413 {offsets = [0, 0], sizes = [8, 128], strides = [1, 1]} : vector<8x512xf32> to vector<8x128xf32>
    %415 = arith.negf %414 : vector<8x128xf32>
    %416 = math.exp %415 : vector<8x128xf32>
    %cst_97 = arith.constant 1.000000e+00 : f32
    %417 = vector.broadcast %cst_97 : f32 to vector<8x128xf32>
    %418 = arith.addf %417, %416 : vector<8x128xf32>
    %419 = arith.divf %417, %418 : vector<8x128xf32>
    %420 = vector.extract_strided_slice %413 {offsets = [0, 128], sizes = [8, 128], strides = [1, 1]} : vector<8x512xf32> to vector<8x128xf32>
    %421 = arith.negf %420 : vector<8x128xf32>
    %422 = math.exp %421 : vector<8x128xf32>
    %cst_98 = arith.constant 1.000000e+00 : f32
    %423 = vector.broadcast %cst_98 : f32 to vector<8x128xf32>
    %424 = arith.addf %423, %422 : vector<8x128xf32>
    %425 = arith.divf %423, %424 : vector<8x128xf32>
    %426 = vector.extract_strided_slice %413 {offsets = [0, 256], sizes = [8, 128], strides = [1, 1]} : vector<8x512xf32> to vector<8x128xf32>
    %427 = math.tanh %426 : vector<8x128xf32>
    %428 = vector.extract_strided_slice %413 {offsets = [0, 384], sizes = [8, 128], strides = [1, 1]} : vector<8x512xf32> to vector<8x128xf32>
    %429 = arith.negf %428 : vector<8x128xf32>
    %430 = math.exp %429 : vector<8x128xf32>
    %cst_99 = arith.constant 1.000000e+00 : f32
    %431 = vector.broadcast %cst_99 : f32 to vector<8x128xf32>
    %432 = arith.addf %431, %430 : vector<8x128xf32>
    %433 = arith.divf %431, %432 : vector<8x128xf32>
    %434 = arith.mulf %425, %371 : vector<8x128xf32>
    %435 = arith.mulf %419, %427 : vector<8x128xf32>
    %436 = arith.addf %434, %435 : vector<8x128xf32>
    %437 = math.tanh %436 : vector<8x128xf32>
    %438 = arith.mulf %433, %437 : vector<8x128xf32>
    %439 = tpu.concatenate %438, %403 in 1 : vector<8x128xf32>, vector<8x128xf32> -> vector<8x256xf32>
    %440 = arith.truncf %439 : vector<8x256xf32> to vector<8x256xbf16>
    %cst_100 = arith.constant dense<0.000000e+00> : vector<8x512xf32>
    %441 = tpu.matmul %440, %11, %cst_100 {dimension_numbers = #tpu.dot_dimension_numbers<[1], [0], [0], [1], [0, 0, 1, 1], [], []>} : vector<8x256xbf16>, vector<256x512xbf16>, vector<8x512xf32> -> vector<8x512xf32>
    %442 = vector.broadcast %12 : vector<1x512xf32> to vector<8x512xf32>
    %443 = arith.addf %441, %442 : vector<8x512xf32>
    %444 = vector.extract_strided_slice %443 {offsets = [0, 0], sizes = [8, 128], strides = [1, 1]} : vector<8x512xf32> to vector<8x128xf32>
    %445 = arith.negf %444 : vector<8x128xf32>
    %446 = math.exp %445 : vector<8x128xf32>
    %cst_101 = arith.constant 1.000000e+00 : f32
    %447 = vector.broadcast %cst_101 : f32 to vector<8x128xf32>
    %448 = arith.addf %447, %446 : vector<8x128xf32>
    %449 = arith.divf %447, %448 : vector<8x128xf32>
    %450 = vector.extract_strided_slice %443 {offsets = [0, 128], sizes = [8, 128], strides = [1, 1]} : vector<8x512xf32> to vector<8x128xf32>
    %451 = arith.negf %450 : vector<8x128xf32>
    %452 = math.exp %451 : vector<8x128xf32>
    %cst_102 = arith.constant 1.000000e+00 : f32
    %453 = vector.broadcast %cst_102 : f32 to vector<8x128xf32>
    %454 = arith.addf %453, %452 : vector<8x128xf32>
    %455 = arith.divf %453, %454 : vector<8x128xf32>
    %456 = vector.extract_strided_slice %443 {offsets = [0, 256], sizes = [8, 128], strides = [1, 1]} : vector<8x512xf32> to vector<8x128xf32>
    %457 = math.tanh %456 : vector<8x128xf32>
    %458 = vector.extract_strided_slice %443 {offsets = [0, 384], sizes = [8, 128], strides = [1, 1]} : vector<8x512xf32> to vector<8x128xf32>
    %459 = arith.negf %458 : vector<8x128xf32>
    %460 = math.exp %459 : vector<8x128xf32>
    %cst_103 = arith.constant 1.000000e+00 : f32
    %461 = vector.broadcast %cst_103 : f32 to vector<8x128xf32>
    %462 = arith.addf %461, %460 : vector<8x128xf32>
    %463 = arith.divf %461, %462 : vector<8x128xf32>
    %464 = arith.mulf %455, %401 : vector<8x128xf32>
    %465 = arith.mulf %449, %457 : vector<8x128xf32>
    %466 = arith.addf %464, %465 : vector<8x128xf32>
    %467 = math.tanh %466 : vector<8x128xf32>
    %468 = arith.mulf %463, %467 : vector<8x128xf32>
    %469 = vector.shape_cast %468 : vector<8x128xf32> to vector<8x1x128xf32>
    %c0_104 = arith.constant 0 : index
    %470 = arith.index_cast %c6_i32 : i32 to index
    %c0_105 = arith.constant 0 : index
    %471 = vector.load %arg9[%c0_104, %470, %c0_105] : memref<8x8x128xf32, #tpu.memory_space<vmem>>, vector<8x1x128xf32>
    tpu.vector_store %arg9[%c0_104, %470, %c0_105], %469 {strides = array<i32>} : memref<8x8x128xf32, #tpu.memory_space<vmem>>, vector<8x1x128xf32>,
    %c7_i32 = arith.constant 7 : i32
    %c8_i32_106 = arith.constant 8 : i32
    %472 = arith.muli %c7_i32, %c8_i32_106 : i32
    %473 = tpu.assume_multiple %472, 8 : i32
    %474 = arith.index_cast %473 : i32 to index
    %c0_107 = arith.constant 0 : index
    %475 = vector.load %arg8[%474, %c0_107] : memref<64x512xf32, #tpu.memory_space<vmem>>, vector<8x512xf32>
    %476 = arith.truncf %438 : vector<8x128xf32> to vector<8x128xbf16>
    %cst_108 = arith.constant dense<0.000000e+00> : vector<8x512xf32>
    %477 = tpu.matmul %476, %10, %cst_108 {dimension_numbers = #tpu.dot_dimension_numbers<[1], [0], [0], [1], [0, 0, 1, 1], [], []>} : vector<8x128xbf16>, vector<128x512xbf16>, vector<8x512xf32> -> vector<8x512xf32>
    %478 = arith.addf %475, %477 : vector<8x512xf32>
    %479 = vector.extract_strided_slice %478 {offsets = [0, 0], sizes = [8, 128], strides = [1, 1]} : vector<8x512xf32> to vector<8x128xf32>
    %480 = arith.negf %479 : vector<8x128xf32>
    %481 = math.exp %480 : vector<8x128xf32>
    %cst_109 = arith.constant 1.000000e+00 : f32
    %482 = vector.broadcast %cst_109 : f32 to vector<8x128xf32>
    %483 = arith.addf %482, %481 : vector<8x128xf32>
    %484 = arith.divf %482, %483 : vector<8x128xf32>
    %485 = vector.extract_strided_slice %478 {offsets = [0, 128], sizes = [8, 128], strides = [1, 1]} : vector<8x512xf32> to vector<8x128xf32>
    %486 = arith.negf %485 : vector<8x128xf32>
    %487 = math.exp %486 : vector<8x128xf32>
    %cst_110 = arith.constant 1.000000e+00 : f32
    %488 = vector.broadcast %cst_110 : f32 to vector<8x128xf32>
    %489 = arith.addf %488, %487 : vector<8x128xf32>
    %490 = arith.divf %488, %489 : vector<8x128xf32>
    %491 = vector.extract_strided_slice %478 {offsets = [0, 256], sizes = [8, 128], strides = [1, 1]} : vector<8x512xf32> to vector<8x128xf32>
    %492 = math.tanh %491 : vector<8x128xf32>
    %493 = vector.extract_strided_slice %478 {offsets = [0, 384], sizes = [8, 128], strides = [1, 1]} : vector<8x512xf32> to vector<8x128xf32>
    %494 = arith.negf %493 : vector<8x128xf32>
    %495 = math.exp %494 : vector<8x128xf32>
    %cst_111 = arith.constant 1.000000e+00 : f32
    %496 = vector.broadcast %cst_111 : f32 to vector<8x128xf32>
    %497 = arith.addf %496, %495 : vector<8x128xf32>
    %498 = arith.divf %496, %497 : vector<8x128xf32>
    %499 = arith.mulf %490, %436 : vector<8x128xf32>
    %500 = arith.mulf %484, %492 : vector<8x128xf32>
    %501 = arith.addf %499, %500 : vector<8x128xf32>
    %502 = math.tanh %501 : vector<8x128xf32>
    %503 = arith.mulf %498, %502 : vector<8x128xf32>
    %504 = tpu.concatenate %503, %468 in 1 : vector<8x128xf32>, vector<8x128xf32> -> vector<8x256xf32>
    %505 = arith.truncf %504 : vector<8x256xf32> to vector<8x256xbf16>
    %cst_112 = arith.constant dense<0.000000e+00> : vector<8x512xf32>
    %506 = tpu.matmul %505, %11, %cst_112 {dimension_numbers = #tpu.dot_dimension_numbers<[1], [0], [0], [1], [0, 0, 1, 1], [], []>} : vector<8x256xbf16>, vector<256x512xbf16>, vector<8x512xf32> -> vector<8x512xf32>
    %507 = vector.broadcast %12 : vector<1x512xf32> to vector<8x512xf32>
    %508 = arith.addf %506, %507 : vector<8x512xf32>
    %509 = vector.extract_strided_slice %508 {offsets = [0, 0], sizes = [8, 128], strides = [1, 1]} : vector<8x512xf32> to vector<8x128xf32>
    %510 = arith.negf %509 : vector<8x128xf32>
    %511 = math.exp %510 : vector<8x128xf32>
    %cst_113 = arith.constant 1.000000e+00 : f32
    %512 = vector.broadcast %cst_113 : f32 to vector<8x128xf32>
    %513 = arith.addf %512, %511 : vector<8x128xf32>
    %514 = arith.divf %512, %513 : vector<8x128xf32>
    %515 = vector.extract_strided_slice %508 {offsets = [0, 128], sizes = [8, 128], strides = [1, 1]} : vector<8x512xf32> to vector<8x128xf32>
    %516 = arith.negf %515 : vector<8x128xf32>
    %517 = math.exp %516 : vector<8x128xf32>
    %cst_114 = arith.constant 1.000000e+00 : f32
    %518 = vector.broadcast %cst_114 : f32 to vector<8x128xf32>
    %519 = arith.addf %518, %517 : vector<8x128xf32>
    %520 = arith.divf %518, %519 : vector<8x128xf32>
    %521 = vector.extract_strided_slice %508 {offsets = [0, 256], sizes = [8, 128], strides = [1, 1]} : vector<8x512xf32> to vector<8x128xf32>
    %522 = math.tanh %521 : vector<8x128xf32>
    %523 = vector.extract_strided_slice %508 {offsets = [0, 384], sizes = [8, 128], strides = [1, 1]} : vector<8x512xf32> to vector<8x128xf32>
    %524 = arith.negf %523 : vector<8x128xf32>
    %525 = math.exp %524 : vector<8x128xf32>
    %cst_115 = arith.constant 1.000000e+00 : f32
    %526 = vector.broadcast %cst_115 : f32 to vector<8x128xf32>
    %527 = arith.addf %526, %525 : vector<8x128xf32>
    %528 = arith.divf %526, %527 : vector<8x128xf32>
    %529 = arith.mulf %520, %466 : vector<8x128xf32>
    %530 = arith.mulf %514, %522 : vector<8x128xf32>
    %531 = arith.addf %529, %530 : vector<8x128xf32>
    %532 = math.tanh %531 : vector<8x128xf32>
    %533 = arith.mulf %528, %532 : vector<8x128xf32>
    %534 = vector.shape_cast %533 : vector<8x128xf32> to vector<8x1x128xf32>
    %c0_116 = arith.constant 0 : index
    %535 = arith.index_cast %c7_i32 : i32 to index
    %c0_117 = arith.constant 0 : index
    %536 = vector.load %arg9[%c0_116, %535, %c0_117] : memref<8x8x128xf32, #tpu.memory_space<vmem>>, vector<8x1x128xf32>
    tpu.vector_store %arg9[%c0_116, %535, %c0_117], %534 {strides = array<i32>} : memref<8x8x128xf32, #tpu.memory_space<vmem>>, vector<8x1x128xf32>,
    %c8_i32_118 = arith.constant 8 : i32
    %c0_119 = arith.constant 0 : index
    %c0_120 = arith.constant 0 : index
    %537 = vector.load %arg10[%c0_119, %c0_120] : memref<8x128xf32, #tpu.memory_space<vmem>>, vector<8x128xf32>
    tpu.vector_store %arg10[%c0_119, %c0_120], %503 {strides = array<i32>} : memref<8x128xf32, #tpu.memory_space<vmem>>, vector<8x128xf32>,
    %c0_121 = arith.constant 0 : index
    %c0_122 = arith.constant 0 : index
    %538 = vector.load %arg11[%c0_121, %c0_122] : memref<8x128xf32, #tpu.memory_space<vmem>>, vector<8x128xf32>
    tpu.vector_store %arg11[%c0_121, %c0_122], %501 {strides = array<i32>} : memref<8x128xf32, #tpu.memory_space<vmem>>, vector<8x128xf32>,
    %c0_123 = arith.constant 0 : index
    %c0_124 = arith.constant 0 : index
    %539 = vector.load %arg12[%c0_123, %c0_124] : memref<8x128xf32, #tpu.memory_space<vmem>>, vector<8x128xf32>
    tpu.vector_store %arg12[%c0_123, %c0_124], %533 {strides = array<i32>} : memref<8x128xf32, #tpu.memory_space<vmem>>, vector<8x128xf32>,
    %c0_125 = arith.constant 0 : index
    %c0_126 = arith.constant 0 : index
    %540 = vector.load %arg13[%c0_125, %c0_126] : memref<8x128xf32, #tpu.memory_space<vmem>>, vector<8x128xf32>
    tpu.vector_store %arg13[%c0_125, %c0_126], %531 {strides = array<i32>} : memref<8x128xf32, #tpu.memory_space<vmem>>, vector<8x128xf32>,
    %c0_127 = arith.constant 0 : index
    %c0_128 = arith.constant 0 : index
    %c0_129 = arith.constant 0 : index
    %541 = vector.load %arg9[%c0_127, %c0_128, %c0_129] : memref<8x8x128xf32, #tpu.memory_space<vmem>>, vector<8x8x128xf32>
    %542 = arith.truncf %541 : vector<8x8x128xf32> to vector<8x8x128xbf16>
    %c0_130 = arith.constant 0 : index
    %c0_131 = arith.constant 0 : index
    %c0_132 = arith.constant 0 : index
    %543 = vector.load %arg7[%c0_130, %c0_131, %c0_132] : memref<8x8x128xbf16, #tpu.memory_space<vmem>>, vector<8x8x128xbf16>
    tpu.vector_store %arg7[%c0_130, %c0_131, %c0_132], %542 {strides = array<i32>} : memref<8x8x128xbf16, #tpu.memory_space<vmem>>, vector<8x8x128xbf16>,
    return
  }
  func.func @transform_0(%arg0: i32) -> (i32, i32) {
    %c0_i32 = arith.constant 0 : i32
    %c0_i32_0 = arith.constant 0 : i32
    return %arg0, %c0_i32 : i32, i32
  }
  func.func @transform_1(%arg0: i32) -> (i32, i32) {
    %c0_i32 = arith.constant 0 : i32
    %c0_i32_0 = arith.constant 0 : i32
    %c0_i32_1 = arith.constant 0 : i32
    return %c0_i32, %c0_i32_0 : i32, i32
  }
  func.func @transform_2(%arg0: i32) -> (i32, i32) {
    %c0_i32 = arith.constant 0 : i32
    %c0_i32_0 = arith.constant 0 : i32
    %c0_i32_1 = arith.constant 0 : i32
    return %c0_i32, %c0_i32_0 : i32, i32
  }
  func.func @transform_3(%arg0: i32) -> (i32, i32) {
    %c0_i32 = arith.constant 0 : i32
    %c0_i32_0 = arith.constant 0 : i32
    %c0_i32_1 = arith.constant 0 : i32
    return %c0_i32, %c0_i32_0 : i32, i32
  }
  func.func @transform_4(%arg0: i32) -> (i32, i32) {
    %c0_i32 = arith.constant 0 : i32
    %c0_i32_0 = arith.constant 0 : i32
    %c0_i32_1 = arith.constant 0 : i32
    return %c0_i32, %c0_i32_0 : i32, i32
  }
  func.func @transform_5(%arg0: i32) -> (i32, i32) {
    %c0_i32 = arith.constant 0 : i32
    %c0_i32_0 = arith.constant 0 : i32
    %c0_i32_1 = arith.constant 0 : i32
    return %c0_i32, %c0_i32_0 : i32, i32
  }
  func.func @transform_6(%arg0: i32) -> (i32, i32, i32) {
    %c0_i32 = arith.constant 0 : i32
    %c0_i32_0 = arith.constant 0 : i32
    %c0_i32_1 = arith.constant 0 : i32
    return %c0_i32, %arg0, %c0_i32_0 : i32, i32, i32
  }
}

</mosaic_0001>

<bundles_post_ra>
// kernel: sequential_recommender.3
= control target key start
LH: loop header
LB: loop body
LE: loop exit
PB: predicated region body
PF: predicated region fallthrough
CT: control target
= control target key end

     0   :  { %s355_s1 = inlined_call_operand.vmem [shape: bf16[128,128], index: 1, kind: input, shape index: {}]   ;;  %s356_s0 = inlined_call_operand.vmem [shape: bf16[64,128], index: 0, kind: input, shape index: {}]   ;;  %s357_s2 = inlined_call_operand.vmem [shape: f32[1,128], index: 2, kind: input, shape index: {}]   ;;  %s358_s3 = inlined_call_operand.vmem [shape: f32[64,128], index: 3, kind: output, shape index: {}]  }
   0x1   :  { %v260_v0 = vld [vmem:[%s355_s1] sm:$0xff]   ;;  %v261_v1 = vld [vmem:[%s355_s1 + $0x8] sm:$0xff]   ;;  %v262_v2 = vld [vmem:[%s355_s1 + $0x10] sm:$0xff]  }
   0x2   :  { %220 = vmatprep.subr.bf16.mxu0 %v260_v0  ;;  %244 = vmatprep.subr.bf16.mxu1 %v260_v0  ;;  %v263_v3 = vld [vmem:[%s355_s1 + $0x18] sm:$0xff]   ;;  %v268_v4 = vld [vmem:[%s356_s0] sm:$0xff]   ;;  %v269_v5 = vld [vmem:[%s356_s0 + $0x10] sm:$0xff]  }
   0x3   :  { %221 = vmatpush3.bf16.msra.mxu0 %v260_v0  ;;  %252 = vmatpush3.bf16.msra.mxu1 %v260_v0  ;;  %v264_v6 = vld [vmem:[%s355_s1 + $0x20] sm:$0xff]   ;;  %v265_v7 = vld [vmem:[%s355_s1 + $0x28] sm:$0xff]   ;;  %v266_v8 = vld [vmem:[%s355_s1 + $0x30] sm:$0xff]  }
   0x4   :  { %222 = vmatprep.subr.bf16.mxu0 %v261_v1  ;;  %245 = vmatprep.subr.bf16.mxu1 %v261_v1  ;;  %v267_v9 = vld [vmem:[%s355_s1 + $0x38] sm:$0xff]   ;;  %v270_v10 = vld [vmem:[%s356_s0 + $0x8] sm:$0xff]   ;;  %v195_v12 = vld [vmem:[%s357_s2] ss:$0 sm:$0xff] }
   0x5   :  { %236 = vmatprep.mubr.bf16.mxu0 %v268_v4  ;;  %240 = vmatprep.mubr.bf16.mxu1 %v269_v5  ;;  %v271_v11 = vld [vmem:[%s356_s0 + $0x18] sm:$0xff]  }
   0x7   :  { %223 = vmatpush3.bf16.msra.mxu0 %v261_v1  ;;  %253 = vmatpush3.bf16.msra.mxu1 %v261_v1 }
   0x8   :  { %224 = vmatprep.subr.bf16.mxu0 %v262_v2  ;;  %246 = vmatprep.subr.bf16.mxu1 %v262_v2 }
   0xb   :  { %225 = vmatpush3.bf16.msra.mxu0 %v262_v2  ;;  %254 = vmatpush3.bf16.msra.mxu1 %v262_v2 }
   0xc   :  { %226 = vmatprep.subr.bf16.mxu0 %v263_v3  ;;  %247 = vmatprep.subr.bf16.mxu1 %v263_v3 }
   0xf   :  { %227 = vmatpush3.bf16.msra.mxu0 %v263_v3  ;;  %255 = vmatpush3.bf16.msra.mxu1 %v263_v3 }
  0x10   :  { %228 = vmatprep.subr.bf16.mxu0 %v264_v6  ;;  %248 = vmatprep.subr.bf16.mxu1 %v264_v6 }
  0x13   :  { %229 = vmatpush3.bf16.msra.mxu0 %v264_v6  ;;  %256 = vmatpush3.bf16.msra.mxu1 %v264_v6 }
  0x14   :  { %230 = vmatprep.subr.bf16.mxu0 %v265_v7  ;;  %249 = vmatprep.subr.bf16.mxu1 %v265_v7 }
  0x17   :  { %231 = vmatpush3.bf16.msra.mxu0 %v265_v7  ;;  %257 = vmatpush3.bf16.msra.mxu1 %v265_v7 }
  0x18   :  { %232 = vmatprep.subr.bf16.mxu0 %v266_v8  ;;  %250 = vmatprep.subr.bf16.mxu1 %v266_v8 }
  0x1b   :  { %233 = vmatpush3.bf16.msra.mxu0 %v266_v8  ;;  %258 = vmatpush3.bf16.msra.mxu1 %v266_v8 }
  0x1c   :  { %234 = vmatprep.subr.bf16.mxu0 %v267_v9  ;;  %251 = vmatprep.subr.bf16.mxu1 %v267_v9 }
  0x1f   :  { %235 = vmatpush3.bf16.msra.mxu0 %v267_v9  ;;  %259 = vmatpush3.bf16.msra.mxu1 %v267_v9 }
  0x22   :  { %237 = vmatmul.mubr.bf16.vlgmr.msra.gmra.mrb[0].mxu0 %v270_v10  ;;  %241 = vmatmul.mubr.bf16.vlgmr.msra.gmra.mrb[0].mxu1 %v271_v11 }
  0xf5   :  { %v238_v13 = vpop.f32.mrb[0].mxu0  ;;  %v242_v14 = vpop.f32.mrb[0].mxu1 }
  0xf6   :  { %v161_v15 = vadd.f32 %v238_v13, %v195_v12  ;;  %v177_v16 = vadd.f32 %v242_v14, %v195_v12  ;;  %v152_v17 = vpop.f32.mrb[1].mxu0  ;;  %v168_v18 = vpop.f32.mrb[1].mxu1 }
  0xf7   :  { %v153_v19 = vadd.f32 %v195_v12, %v152_v17  ;;  %v169_v20 = vadd.f32 %v195_v12, %v168_v18  ;;  %v239_v21 = vpop.f32.mrb[2].mxu0  ;;  %v243_v22 = vpop.f32.mrb[2].mxu1 }
  0xf8   :  { %185 = vst [vmem:[%s358_s3 + $0x10] sm:$0xff] %v161_v15  ;;  %189 = vst [vmem:[%s358_s3 + $0x30] sm:$0xff] %v177_v16  ;;  %v164_v23 = vadd.f32 %v239_v21, %v195_v12  ;;  %v180_v24 = vadd.f32 %v243_v22, %v195_v12  ;;  %v155_v25 = vpop.f32.mrb[3].mxu0  ;;  %v171_v26 = vpop.f32.mrb[3].mxu1 }
  0xf9   :  { %183 = vst [vmem:[%s358_s3] sm:$0xff] %v153_v19  ;;  %187 = vst [vmem:[%s358_s3 + $0x20] sm:$0xff] %v169_v20  ;;  %v156_v27 = vadd.f32 %v195_v12, %v155_v25  ;;  %v172_v28 = vadd.f32 %v195_v12, %v171_v26 }
  0xfa   :  { %186 = vst [vmem:[%s358_s3 + $0x18] sm:$0xff] %v164_v23  ;;  %190 = vst [vmem:[%s358_s3 + $0x38] sm:$0xff] %v180_v24 }
  0xfb   :  { %184 = vst [vmem:[%s358_s3 + $0x8] sm:$0xff] %v156_v27  ;;  %188 = vst [vmem:[%s358_s3 + $0x28] sm:$0xff] %v172_v28 }

// kernel: sequential_recommender.2
= control target key start
LH: loop header
LB: loop body
LE: loop exit
PB: predicated region body
PF: predicated region fallthrough
CT: control target
= control target key end

     0   :  { %11 = vsyncpa [#allocation9], 0  ;;  %s6210_s0 = inlined_call_operand.vmem [shape: bf16[64,128], index: 0, kind: input, shape index: {}]   ;;  %s6211_s1 = inlined_call_operand.hbm [shape: bf16[128,512], index: 1, kind: input, shape index: {}]   ;;  %s6212_s2 = inlined_call_operand.hbm [shape: bf16[128,512], index: 2, kind: input, shape index: {}]   ;;  %s6213_s3 = inlined_call_operand.vmem [shape: f32[1,512], index: 3, kind: input, shape index: {}]   ;;  %s6214_s4 = inlined_call_operand.hbm [shape: bf16[256,512], index: 4, kind: input, shape index: {}]   ;;  %s6215_s5 = inlined_call_operand.vmem [shape: f32[1,512], index: 5, kind: input, shape index: {}]   ;;  %s6216_s6 = inlined_call_operand.vmem [shape: bf16[8,8,128], index: 6, kind: output, shape index: {}]  }
   0x1   :  { %12 = vsyncpa [#allocation11], 0  ;;  %s4426_s21 = smov [#allocation10]   ;;  %s4427_s23 = smov [#allocation8]  }
   0x2   :  { %s32_s22 = sshll.u32 %s4426_s21, 4  ;;  %s20_s24 = sshll.u32 %s4427_s23, 4  ;;  %s33_s22 = int_to_ptr.vmem [resolvable:$true] %s32_s22  ;;  %s4469_s24 = int_to_ptr.vmem [resolvable:$true] %s20_s24 }
   0x3   :  { %s4356_s27 = scalar_lea.hbm %s6212_s2, 4096 }
   0x4   :  { %p4357_p0 = scmp.ne.s32.totalorder %s6212_s2, %s4356_s27  ;;  %p4360_p1 = scmp.lt.u32.totalorder %s4356_s27, %s6212_s2 }
   0x6   :  { %p4362_p2 = pnand %p4360_p1, %p4357_p0 }
   0x8   :  { %4365 = shalt.err (!%p4362_p2)
}
   0x9   :  { %s4366_s8 = scalar_lea.vmem %s33_s22, 4096  ;;  %p4371_p4 = scmp.lt.s32.totalorder %s33_s22, %s33_s22 }
   0xa   :  { %p4367_p3 = scmp.ne.s32.totalorder %s33_s22, %s4366_s8  ;;  %p4372_p5 = scmp.lt.s32.totalorder %s4366_s8, %s4366_s8 }
   0xc   :  { %p4373_p6 = por %p4372_p5, %p4371_p4 }
   0xe   :  { %p4374_p7 = pnand %p4373_p6, %p4367_p3 }
  0x10   :  { %4377 = shalt.err (!%p4374_p7)
}
  0x11   :  { %s4428_s9 = smov 256   ;;  %s4429_s10 = smov 16  }
  0x12   :  { %38 = dma.hbm_to_vmem [thread:$0]  %s6212_s2, 4096, %s33_s22, [#allocation11], %s4428_s9, %s4428_s9, %s4429_s10  }
  0x13   :  { %s4378_s15 = scalar_lea.hbm %s6211_s1, 4096 }
  0x14   :  { %p4379_p8 = scmp.ne.s32.totalorder %s6211_s1, %s4378_s15  ;;  %p4382_p9 = scmp.lt.u32.totalorder %s4378_s15, %s6211_s1 }
  0x16   :  { %p4384_p10 = pnand %p4382_p9, %p4379_p8 }
  0x18   :  { %4387 = shalt.err (!%p4384_p10)
}
  0x19   :  { %s4388_s20 = scalar_lea.vmem %s4469_s24, 4096  ;;  %p4393_p12 = scmp.lt.s32.totalorder %s4469_s24, %s4469_s24 }
  0x1a   :  { %p4389_p11 = scmp.ne.s32.totalorder %s4469_s24, %s4388_s20  ;;  %p4394_p13 = scmp.lt.s32.totalorder %s4388_s20, %s4388_s20 }
  0x1c   :  { %p4395_p0 = por %p4394_p13, %p4393_p12 }
  0x1e   :  { %p4396_p1 = pnand %p4395_p0, %p4389_p11 }
  0x20   :  { %4399 = shalt.err (!%p4396_p1)
}
  0x21   :  { %26 = dma.hbm_to_vmem [thread:$0]  %s6211_s1, 4096, %s4469_s24, [#allocation9], %s4428_s9, %s4428_s9, %s4429_s10  }
  0x22   :  { %s4430_s22 = smov [#allocation12]   ;;  %s4400_s27 = scalar_lea.hbm %s6214_s4, 8192 }
  0x23   :  { %s46_s23 = sshll.u32 %s4430_s22, 4  ;;  %p4401_p2 = scmp.ne.s32.totalorder %s6214_s4, %s4400_s27  ;;  %s47_s23 = int_to_ptr.vmem [resolvable:$true] %s46_s23 }
  0x24   :  { %p4404_p3 = scmp.lt.u32.totalorder %s4400_s27, %s6214_s4 }
  0x26   :  { %p4406_p4 = pnand %p4404_p3, %p4401_p2 }
  0x28   :  { %4409 = shalt.err (!%p4406_p4)
}
  0x29   :  { %s4410_s8 = scalar_lea.vmem %s47_s23, 8192  ;;  %p4415_p6 = scmp.lt.s32.totalorder %s47_s23, %s47_s23 }
  0x2a   :  { %p4411_p5 = scmp.ne.s32.totalorder %s47_s23, %s4410_s8  ;;  %p4416_p7 = scmp.lt.s32.totalorder %s4410_s8, %s4410_s8 }
  0x2c   :  { %p4417_p8 = por %p4416_p7, %p4415_p6 }
  0x2e   :  { %p4418_p9 = pnand %p4417_p8, %p4411_p5 }
  0x30   :  { %4421 = shalt.err (!%p4418_p9)
}
  0x31   :  { %52 = dma.hbm_to_vmem [thread:$0]  %s6214_s4, 8192, %s47_s23, [#allocation11], %s4428_s9, %s4428_s9, %s4429_s10  }
  0x32   :  { %4422 = dma.done.wait [#allocation9], 4096  }
  0x33   :  { %4423 = vsyncadd [#allocation9], 4294963200 }
  0x34   :  { %4424 = dma.done.wait [#allocation11], 12288  }
  0x35   :  { %4425 = vsyncadd [#allocation11], 4294955008  ;;  %v6217_v0 = vmov 0   ;;  %v3712_v1 = vld [vmem:[#allocation8 + $0x4] ss:$16 sps:$4 sm:$0xff]   ;;  %v3773_v44 = vld [vmem:[%s6210_s0 + $0x8] sm:$0xff]  }
  0x36   :  { %351 = vmatprep.mubr.bf16.mxu0 %v6217_v0  ;;  %424 = vmatprep.mubr.bf16.mxu1 %v6217_v0  ;;  %v3714_v2 = vld [vmem:[#allocation8 + $0xc] ss:$16 sps:$4 sm:$0xff]   ;;  %v3716_v3 = vld [vmem:[#allocation8] ss:$16 sps:$4 sm:$0xff]   ;;  %v3717_v4 = vld [vmem:[#allocation8 + $0x8] ss:$16 sps:$4 sm:$0xff]  }
  0x37   :  { %319 = vmatprep.subr.bf16.mxu0 %v3712_v1  ;;  %392 = vmatprep.subr.bf16.mxu1 %v3714_v2  ;;  %v3718_v5 = vld [vmem:[#allocation8 + $0x24] ss:$16 sps:$4 sm:$0xff]   ;;  %v3720_v6 = vld [vmem:[#allocation8 + $0x2c] ss:$16 sps:$4 sm:$0xff]   ;;  %v3722_v7 = vld [vmem:[#allocation8 + $0x20] ss:$16 sps:$4 sm:$0xff]  }
  0x38   :  { %320 = vmatpush1.bf16.msra.mxu0 %v3716_v3  ;;  %393 = vmatpush1.bf16.msra.mxu1 %v3717_v4  ;;  %v3723_v8 = vld [vmem:[#allocation8 + $0x28] ss:$16 sps:$4 sm:$0xff]   ;;  %v3724_v9 = vld [vmem:[#allocation8 + $0x44] ss:$16 sps:$4 sm:$0xff]   ;;  %v3726_v10 = vld [vmem:[#allocation8 + $0x4c] ss:$16 sps:$4 sm:$0xff]  }
  0x39   :  { %321 = vmatprep.subr.bf16.mxu0 %v3718_v5  ;;  %394 = vmatprep.subr.bf16.mxu1 %v3720_v6  ;;  %v3728_v11 = vld [vmem:[#allocation8 + $0x40] ss:$16 sps:$4 sm:$0xff]   ;;  %v3729_v12 = vld [vmem:[#allocation8 + $0x48] ss:$16 sps:$4 sm:$0xff]   ;;  %v3730_v13 = vld [vmem:[#allocation8 + $0x64] ss:$16 sps:$4 sm:$0xff]  }
  0x3a   :  { %v3732_v14 = vld [vmem:[#allocation8 + $0x6c] ss:$16 sps:$4 sm:$0xff]   ;;  %v3734_v15 = vld [vmem:[#allocation8 + $0x60] ss:$16 sps:$4 sm:$0xff]   ;;  %v3735_v16 = vld [vmem:[#allocation8 + $0x68] ss:$16 sps:$4 sm:$0xff]  }
  0x3b   :  { %v3736_v17 = vld [vmem:[#allocation8 + $0x84] ss:$16 sps:$4 sm:$0xff]   ;;  %v3738_v18 = vld [vmem:[#allocation8 + $0x8c] ss:$16 sps:$4 sm:$0xff]   ;;  %v3740_v19 = vld [vmem:[#allocation8 + $0x80] ss:$16 sps:$4 sm:$0xff]  }
  0x3c   :  { %322 = vmatpush1.bf16.msra.mxu0 %v3722_v7  ;;  %395 = vmatpush1.bf16.msra.mxu1 %v3723_v8  ;;  %v3741_v20 = vld [vmem:[#allocation8 + $0x88] ss:$16 sps:$4 sm:$0xff]   ;;  %v3742_v21 = vld [vmem:[#allocation8 + $0xa4] ss:$16 sps:$4 sm:$0xff]   ;;  %v3744_v22 = vld [vmem:[#allocation8 + $0xac] ss:$16 sps:$4 sm:$0xff]  }
  0x3d   :  { %323 = vmatprep.subr.bf16.mxu0 %v3724_v9  ;;  %396 = vmatprep.subr.bf16.mxu1 %v3726_v10  ;;  %v3746_v23 = vld [vmem:[#allocation8 + $0xa0] ss:$16 sps:$4 sm:$0xff]   ;;  %v3747_v24 = vld [vmem:[#allocation8 + $0xa8] ss:$16 sps:$4 sm:$0xff]   ;;  %v3748_v25 = vld [vmem:[#allocation8 + $0xc4] ss:$16 sps:$4 sm:$0xff]  }
  0x3e   :  { %v3750_v26 = vld [vmem:[#allocation8 + $0xcc] ss:$16 sps:$4 sm:$0xff]   ;;  %v3752_v27 = vld [vmem:[#allocation8 + $0xc0] ss:$16 sps:$4 sm:$0xff]   ;;  %v3753_v28 = vld [vmem:[#allocation8 + $0xc8] ss:$16 sps:$4 sm:$0xff]  }
  0x3f   :  { %v3754_v29 = vld [vmem:[#allocation8 + $0xe4] ss:$16 sps:$4 sm:$0xff]   ;;  %v3756_v30 = vld [vmem:[#allocation8 + $0xec] ss:$16 sps:$4 sm:$0xff]   ;;  %v3758_v31 = vld [vmem:[#allocation8 + $0xe0] ss:$16 sps:$4 sm:$0xff]  }
  0x40   :  { %324 = vmatpush1.bf16.msra.mxu0 %v3728_v11  ;;  %397 = vmatpush1.bf16.msra.mxu1 %v3729_v12  ;;  %v3759_v32 = vld [vmem:[#allocation8 + $0xe8] ss:$16 sps:$4 sm:$0xff]   ;;  %v4523_v33 = vld [vmem:[#allocation10 + $0x4] ss:$16 sps:$4 sm:$0xff]   ;;  %v4525_v34 = vld [vmem:[#allocation10 + $0xc] ss:$16 sps:$4 sm:$0xff]  }
  0x41   :  { %325 = vmatprep.subr.bf16.mxu0 %v3730_v13  ;;  %398 = vmatprep.subr.bf16.mxu1 %v3732_v14  ;;  %v3760_v35 = vld [vmem:[%s6210_s0] sm:$0xff]   ;;  %v4532_v37 = vld [vmem:[#allocation10 + $0x8] ss:$16 sps:$4 sm:$0xff]   ;;  %v4538_v39 = vld [vmem:[#allocation10 + $0x2c] ss:$16 sps:$4 sm:$0xff]   ;;  %v4432_v6 = vmov 0.0|0.0  }
  0x42   :  { %v4530_v36 = vld [vmem:[#allocation10] ss:$16 sps:$4 sm:$0xff]   ;;  %v4536_v38 = vld [vmem:[#allocation10 + $0x24] ss:$16 sps:$4 sm:$0xff]   ;;  %v4544_v41 = vld [vmem:[#allocation10 + $0x28] ss:$16 sps:$4 sm:$0xff]  }
  0x43   :  { %v4540_v40 = vld [vmem:[#allocation10 + $0x20] ss:$16 sps:$4 sm:$0xff]   ;;  %v4548_v42 = vld [vmem:[#allocation10 + $0x44] ss:$16 sps:$4 sm:$0xff]   ;;  %v4550_v43 = vld [vmem:[#allocation10 + $0x4c] ss:$16 sps:$4 sm:$0xff]  }
  0x44   :  { %326 = vmatpush1.bf16.msra.mxu0 %v3734_v15  ;;  %399 = vmatpush1.bf16.msra.mxu1 %v3735_v16  ;;  %v4557_v45 = vld [vmem:[#allocation10 + $0x40] ss:$16 sps:$4 sm:$0xff]   ;;  %v4559_v46 = vld [vmem:[#allocation10 + $0x48] ss:$16 sps:$4 sm:$0xff]   ;;  %v4563_v47 = vld [vmem:[#allocation10 + $0x64] ss:$16 sps:$4 sm:$0xff]  }
  0x45   :  { %327 = vmatprep.subr.bf16.mxu0 %v3736_v17  ;;  %400 = vmatprep.subr.bf16.mxu1 %v3738_v18  ;;  %v4567_v48 = vld [vmem:[#allocation10 + $0x6c] ss:$16 sps:$4 sm:$0xff]   ;;  %v4569_v49 = vld [vmem:[#allocation10 + $0x60] ss:$16 sps:$4 sm:$0xff]   ;;  %v4571_v50 = vld [vmem:[#allocation10 + $0x68] ss:$16 sps:$4 sm:$0xff]  }
  0x46   :  { %v4575_v51 = vld [vmem:[#allocation10 + $0x84] ss:$16 sps:$4 sm:$0xff]   ;;  %v4579_v52 = vld [vmem:[#allocation10 + $0x8c] ss:$16 sps:$4 sm:$0xff]   ;;  %v4586_v54 = vld [vmem:[#allocation10 + $0x80] ss:$16 sps:$4 sm:$0xff]  }
  0x47   :  { %v3786_v53 = vld [vmem:[%s6210_s0 + $0x10] sm:$0xff]   ;;  %v4588_v55 = vld [vmem:[#allocation10 + $0x88] ss:$16 sps:$4 sm:$0xff]   ;;  %v4592_v57 = vld [vmem:[#allocation10 + $0xac] ss:$16 sps:$4 sm:$0xff]  }
  0x48   :  { %328 = vmatpush1.bf16.msra.mxu0 %v3740_v19  ;;  %401 = vmatpush1.bf16.msra.mxu1 %v3741_v20  ;;  %v4590_v56 = vld [vmem:[#allocation10 + $0xa4] ss:$16 sps:$4 sm:$0xff]   ;;  %v4598_v58 = vld [vmem:[#allocation10 + $0xa0] ss:$16 sps:$4 sm:$0xff]   ;;  %v4600_v59 = vld [vmem:[#allocation10 + $0xa8] ss:$16 sps:$4 sm:$0xff]  }
  0x49   :  { %329 = vmatprep.subr.bf16.mxu0 %v3742_v21  ;;  %402 = vmatprep.subr.bf16.mxu1 %v3744_v22  ;;  %v4602_v60 = vld [vmem:[#allocation10 + $0xc4] ss:$16 sps:$4 sm:$0xff]   ;;  %v4604_v61 = vld [vmem:[#allocation10 + $0xcc] ss:$16 sps:$4 sm:$0xff]   ;;  %v4615_v63 = vld [vmem:[#allocation10 + $0xc0] ss:$16 sps:$4 sm:$0xff]  }
  0x4a   :  { %v3799_v62 = vld [vmem:[%s6210_s0 + $0x18] sm:$0xff]   ;;  %v4619_v2 = vld [vmem:[#allocation10 + $0xe4] ss:$16 sps:$4 sm:$0xff]   ;;  %v4627_v4 = vld [vmem:[#allocation10 + $0xe0] ss:$16 sps:$4 sm:$0xff]  }
  0x4b   :  { %v4617_v1 = vld [vmem:[#allocation10 + $0xc8] ss:$16 sps:$4 sm:$0xff]   ;;  %v4621_v3 = vld [vmem:[#allocation10 + $0xec] ss:$16 sps:$4 sm:$0xff]   ;;  %v4639_v7 = vld [vmem:[#allocation12 + $0x4] ss:$16 sps:$4 sm:$0xff]  }
  0x4c   :  { %330 = vmatpush1.bf16.msra.mxu0 %v3746_v23  ;;  %403 = vmatpush1.bf16.msra.mxu1 %v3747_v24  ;;  %v4629_v5 = vld [vmem:[#allocation10 + $0xe8] ss:$16 sps:$4 sm:$0xff]   ;;  %v4641_v8 = vld [vmem:[#allocation12 + $0xc] ss:$16 sps:$4 sm:$0xff]   ;;  %v4643_v9 = vld [vmem:[#allocation12] ss:$16 sps:$4 sm:$0xff]  }
  0x4d   :  { %331 = vmatprep.subr.bf16.mxu0 %v3748_v25  ;;  %404 = vmatprep.subr.bf16.mxu1 %v3750_v26  ;;  %v4645_v10 = vld [vmem:[#allocation12 + $0x8] ss:$16 sps:$4 sm:$0xff]   ;;  %v4651_v11 = vld [vmem:[#allocation12 + $0x24] ss:$16 sps:$4 sm:$0xff]   ;;  %v4653_v12 = vld [vmem:[#allocation12 + $0x2c] ss:$16 sps:$4 sm:$0xff]  }
  0x4e   :  { %v4655_v13 = vld [vmem:[#allocation12 + $0x20] ss:$16 sps:$4 sm:$0xff]   ;;  %v4657_v14 = vld [vmem:[#allocation12 + $0x28] ss:$16 sps:$4 sm:$0xff]   ;;  %v4663_v15 = vld [vmem:[#allocation12 + $0x44] ss:$16 sps:$4 sm:$0xff]  }
  0x4f   :  { %v4665_v16 = vld [vmem:[#allocation12 + $0x4c] ss:$16 sps:$4 sm:$0xff]   ;;  %v4667_v17 = vld [vmem:[#allocation12 + $0x40] ss:$16 sps:$4 sm:$0xff]   ;;  %v4669_v18 = vld [vmem:[#allocation12 + $0x48] ss:$16 sps:$4 sm:$0xff]  }
  0x50   :  { %332 = vmatpush1.bf16.msra.mxu0 %v3752_v27  ;;  %405 = vmatpush1.bf16.msra.mxu1 %v3753_v28  ;;  %6565 = vst [vmem:[#allocation15_spill] sm:$0xff] %v4665_v16  ;;  %6566 = vst [vmem:[#allocation16_spill] sm:$0xff] %v4667_v17  ;;  %v4675_v19 = vld [vmem:[#allocation12 + $0x64] ss:$16 sps:$4 sm:$0xff]   ;;  %v4677_v20 = vld [vmem:[#allocation12 + $0x6c] ss:$16 sps:$4 sm:$0xff]  }
  0x51   :  { %333 = vmatprep.subr.bf16.mxu0 %v3754_v29  ;;  %406 = vmatprep.subr.bf16.mxu1 %v3756_v30  ;;  %6567 = vst [vmem:[#allocation17_spill] sm:$0xff] %v4669_v18  ;;  %6568 = vst [vmem:[#allocation18_spill] sm:$0xff] %v4675_v19  ;;  %v4679_v21 = vld [vmem:[#allocation12 + $0x60] ss:$16 sps:$4 sm:$0xff]   ;;  %v4681_v22 = vld [vmem:[#allocation12 + $0x68] ss:$16 sps:$4 sm:$0xff]  }
  0x52   :  { %6569 = vst [vmem:[#allocation19_spill] sm:$0xff] %v4677_v20  ;;  %6570 = vst [vmem:[#allocation20_spill] sm:$0xff] %v4679_v21  ;;  %v4687_v23 = vld [vmem:[#allocation12 + $0x84] ss:$16 sps:$4 sm:$0xff]   ;;  %v4689_v24 = vld [vmem:[#allocation12 + $0x8c] ss:$16 sps:$4 sm:$0xff]  }
  0x53   :  { %6571 = vst [vmem:[#allocation21_spill] sm:$0xff] %v4681_v22  ;;  %6572 = vst [vmem:[#allocation22_spill] sm:$0xff] %v4687_v23  ;;  %v4693_v25 = vld [vmem:[#allocation12 + $0x80] ss:$16 sps:$4 sm:$0xff]   ;;  %v4695_v26 = vld [vmem:[#allocation12 + $0x88] ss:$16 sps:$4 sm:$0xff]  }
  0x54   :  { %334 = vmatpush1.bf16.msra.mxu0 %v3758_v31  ;;  %407 = vmatpush1.bf16.msra.mxu1 %v3759_v32  ;;  %6573 = vst [vmem:[#allocation23_spill] sm:$0xff] %v4689_v24  ;;  %6574 = vst [vmem:[#allocation24_spill] sm:$0xff] %v4693_v25  ;;  %v4699_v27 = vld [vmem:[#allocation12 + $0xa4] ss:$16 sps:$4 sm:$0xff]   ;;  %v4701_v28 = vld [vmem:[#allocation12 + $0xac] ss:$16 sps:$4 sm:$0xff]  }
  0x55   :  { %766 = vmatprep.subr.bf16.mxu0 %v4523_v33  ;;  %807 = vmatprep.subr.bf16.mxu1 %v4525_v34  ;;  %6575 = vst [vmem:[#allocation25_spill] sm:$0xff] %v4695_v26  ;;  %6576 = vst [vmem:[#allocation26_spill] sm:$0xff] %v4699_v27  ;;  %v4703_v29 = vld [vmem:[#allocation12 + $0xa0] ss:$16 sps:$4 sm:$0xff]   ;;  %v4705_v30 = vld [vmem:[#allocation12 + $0xa8] ss:$16 sps:$4 sm:$0xff]  }
  0x56   :  { %6577 = vst [vmem:[#allocation27_spill] sm:$0xff] %v4701_v28  ;;  %6578 = vst [vmem:[#allocation28_spill] sm:$0xff] %v4703_v29  ;;  %v4711_v31 = vld [vmem:[#allocation12 + $0xc4] ss:$16 sps:$4 sm:$0xff]   ;;  %v4713_v32 = vld [vmem:[#allocation12 + $0xcc] ss:$16 sps:$4 sm:$0xff]  }
  0x57   :  { %352 = vmatmul.mubr.bf16.vlgmr.msra.gmra.mrb[0].mxu0 %v3760_v35  ;;  %425 = vmatmul.mubr.bf16.vlgmr.msra.gmra.mrb[0].mxu1 %v3760_v35  ;;  %6579 = vst [vmem:[#allocation29_spill] sm:$0xff] %v4705_v30  ;;  %6580 = vst [vmem:[#allocation30_spill] sm:$0xff] %v4711_v31  ;;  %v4715_v35 = vld [vmem:[#allocation12 + $0xc0] ss:$16 sps:$4 sm:$0xff]  }
  0x58   :  { %767 = vmatpush1.bf16.msra.mxu0 %v4530_v36  ;;  %808 = vmatpush1.bf16.msra.mxu1 %v4532_v37  ;;  %6581 = vst [vmem:[#allocation31_spill] sm:$0xff] %v4713_v32  ;;  %6582 = vst [vmem:[#allocation32_spill] sm:$0xff] %v4715_v35 }
  0x59   :  { %768 = vmatprep.subr.bf16.mxu0 %v4536_v38  ;;  %809 = vmatprep.subr.bf16.mxu1 %v4538_v39 }
  0x5a   :  { %361 = vmatprep.mubr.bf16.mxu0 %v6217_v0  ;;  %434 = vmatprep.mubr.bf16.mxu1 %v6217_v0 }
  0x5c   :  { %769 = vmatpush1.bf16.msra.mxu0 %v4540_v40  ;;  %810 = vmatpush1.bf16.msra.mxu1 %v4544_v41 }
  0x5d   :  { %770 = vmatprep.subr.bf16.mxu0 %v4548_v42  ;;  %811 = vmatprep.subr.bf16.mxu1 %v4550_v43 }
  0x5f   :  { %362 = vmatmul.mubr.bf16.gmra.mrb[4].mxu0 %v3773_v44  ;;  %435 = vmatmul.mubr.bf16.gmra.mrb[4].mxu1 %v3773_v44  ;;  %v4717_v44 = vld [vmem:[#allocation12 + $0xc8] ss:$16 sps:$4 sm:$0xff]  }
  0x60   :  { %771 = vmatpush1.bf16.msra.mxu0 %v4557_v45  ;;  %812 = vmatpush1.bf16.msra.mxu1 %v4559_v46  ;;  %6583 = vst [vmem:[#allocation33_spill] sm:$0xff] %v4717_v44 }
  0x61   :  { %772 = vmatprep.subr.bf16.mxu0 %v4563_v47  ;;  %813 = vmatprep.subr.bf16.mxu1 %v4567_v48 }
  0x62   :  { %371 = vmatprep.mubr.bf16.mxu0 %v6217_v0  ;;  %444 = vmatprep.mubr.bf16.mxu1 %v6217_v0 }
  0x64   :  { %773 = vmatpush1.bf16.msra.mxu0 %v4569_v49  ;;  %814 = vmatpush1.bf16.msra.mxu1 %v4571_v50 }
  0x65   :  { %774 = vmatprep.subr.bf16.mxu0 %v4575_v51  ;;  %815 = vmatprep.subr.bf16.mxu1 %v4579_v52 }
  0x67   :  { %372 = vmatmul.mubr.bf16.gmra.mrb[8].mxu0 %v3786_v53  ;;  %445 = vmatmul.mubr.bf16.gmra.mrb[8].mxu1 %v3786_v53  ;;  %v4723_v53 = vld [vmem:[#allocation12 + $0xe4] ss:$16 sps:$4 sm:$0xff]  }
  0x68   :  { %775 = vmatpush1.bf16.msra.mxu0 %v4586_v54  ;;  %816 = vmatpush1.bf16.msra.mxu1 %v4588_v55  ;;  %6584 = vst [vmem:[#allocation34_spill] sm:$0xff] %v4723_v53 }
  0x69   :  { %776 = vmatprep.subr.bf16.mxu0 %v4590_v56  ;;  %817 = vmatprep.subr.bf16.mxu1 %v4592_v57 }
  0x6a   :  { %381 = vmatprep.mubr.bf16.mxu0 %v6217_v0  ;;  %454 = vmatprep.mubr.bf16.mxu1 %v6217_v0 }
  0x6c   :  { %777 = vmatpush1.bf16.msra.mxu0 %v4598_v58  ;;  %818 = vmatpush1.bf16.msra.mxu1 %v4600_v59 }
  0x6d   :  { %778 = vmatprep.subr.bf16.mxu0 %v4602_v60  ;;  %819 = vmatprep.subr.bf16.mxu1 %v4604_v61 }
  0x6f   :  { %382 = vmatmul.mubr.bf16.gmra.mrb[12].mxu0 %v3799_v62  ;;  %455 = vmatmul.mubr.bf16.gmra.mrb[12].mxu1 %v3799_v62  ;;  %v4725_v62 = vld [vmem:[#allocation12 + $0xec] ss:$16 sps:$4 sm:$0xff]  }
  0x70   :  { %779 = vmatpush1.bf16.msra.mxu0 %v4615_v63  ;;  %820 = vmatpush1.bf16.msra.mxu1 %v4617_v1  ;;  %6585 = vst [vmem:[#allocation35_spill] sm:$0xff] %v4725_v62 }
  0x71   :  { %780 = vmatprep.subr.bf16.mxu0 %v4619_v2  ;;  %821 = vmatprep.subr.bf16.mxu1 %v4621_v3 }
  0x72   :  { %798 = vmatprep.mubr.bf16.mxu0 %v6217_v0  ;;  %839 = vmatprep.mubr.bf16.mxu1 %v6217_v0  ;;  %v4729_v0 = vld [vmem:[#allocation12 + $0xe8] ss:$16 sps:$4 sm:$0xff]  }
  0x73   :  { %6587 = vst [vmem:[#allocation37_spill] sm:$0xff] %v4729_v0 }
  0x74   :  { %781 = vmatpush1.bf16.msra.mxu0 %v4627_v4  ;;  %822 = vmatpush1.bf16.msra.mxu1 %v4629_v5 }
  0x75   :  { %1219 = vmatprep.subr.bf16.mxu0 %v4639_v7  ;;  %1260 = vmatprep.subr.bf16.mxu1 %v4641_v8 }
  0x77   :  { %799 = vmatmul.mubr.bf16.vlgmr.msra.gmra.mrb[16].mxu0 %v4432_v6  ;;  %840 = vmatmul.mubr.bf16.vlgmr.msra.gmra.mrb[16].mxu1 %v4432_v6 }
  0x78   :  { %1251 = vmatprep.mubr.bf16.mxu0 %v4432_v6  ;;  %1292 = vmatprep.mubr.bf16.mxu1 %v4432_v6  ;;  %v4727_v6 = vld [vmem:[#allocation12 + $0xe0] ss:$16 sps:$4 sm:$0xff]  }
  0x79   :  { %1220 = vmatpush1.bf16.msra.mxu0 %v4643_v9  ;;  %1261 = vmatpush1.bf16.msra.mxu1 %v4645_v10  ;;  %6586 = vst [vmem:[#allocation36_spill] sm:$0xff] %v4727_v6 }
  0x7a   :  { %1221 = vmatprep.subr.bf16.mxu0 %v4651_v11  ;;  %1262 = vmatprep.subr.bf16.mxu1 %v4653_v12 }
  0x7d   :  { %1222 = vmatpush1.bf16.msra.mxu0 %v4655_v13  ;;  %1263 = vmatpush1.bf16.msra.mxu1 %v4657_v14 }
  0x7e   :  { %1223 = vmatprep.subr.bf16.mxu0 %v4663_v15  ;;  %1264 = vmatprep.subr.bf16.mxu1 %v4665_v16 }
  0x81   :  { %1224 = vmatpush1.bf16.msra.mxu0 %v4667_v17  ;;  %1265 = vmatpush1.bf16.msra.mxu1 %v4669_v18 }
  0x82   :  { %1225 = vmatprep.subr.bf16.mxu0 %v4675_v19  ;;  %1266 = vmatprep.subr.bf16.mxu1 %v4677_v20 }
  0x85   :  { %1226 = vmatpush1.bf16.msra.mxu0 %v4679_v21  ;;  %1267 = vmatpush1.bf16.msra.mxu1 %v4681_v22 }
  0x86   :  { %1227 = vmatprep.subr.bf16.mxu0 %v4687_v23  ;;  %1268 = vmatprep.subr.bf16.mxu1 %v4689_v24 }
  0x89   :  { %1228 = vmatpush1.bf16.msra.mxu0 %v4693_v25  ;;  %1269 = vmatpush1.bf16.msra.mxu1 %v4695_v26 }
  0x8a   :  { %1229 = vmatprep.subr.bf16.mxu0 %v4699_v27  ;;  %1270 = vmatprep.subr.bf16.mxu1 %v4701_v28 }
  0x8d   :  { %1230 = vmatpush1.bf16.msra.mxu0 %v4703_v29  ;;  %1271 = vmatpush1.bf16.msra.mxu1 %v4705_v30  ;;  %v4803_v30 = vld [vmem:[#allocation12 + $0x1c4] ss:$16 sps:$4 sm:$0xff]   ;;  %v4805_v29 = vld [vmem:[#allocation12 + $0x1cc] ss:$16 sps:$4 sm:$0xff]  }
  0x8e   :  { %1231 = vmatprep.subr.bf16.mxu0 %v4711_v31  ;;  %1272 = vmatprep.subr.bf16.mxu1 %v4713_v32  ;;  %v4735_v32 = vld [vmem:[#allocation12 + $0x104] ss:$16 sps:$4 sm:$0xff]   ;;  %v4741_v31 = vld [vmem:[#allocation12 + $0x108] ss:$16 sps:$4 sm:$0xff]   ;;  %6612 = vst [vmem:[#allocation62_spill] sm:$0xff] %v4803_v30  ;;  %6613 = vst [vmem:[#allocation63_spill] sm:$0xff] %v4805_v29 }
  0x8f   :  { %6588 = vst [vmem:[#allocation38_spill] sm:$0xff] %v4735_v32  ;;  %6591 = vst [vmem:[#allocation41_spill] sm:$0xff] %v4741_v31 }
  0x91   :  { %1232 = vmatpush1.bf16.msra.mxu0 %v4715_v35  ;;  %1273 = vmatpush1.bf16.msra.mxu1 %v4717_v44  ;;  %v4737_v35 = vld [vmem:[#allocation12 + $0x10c] ss:$16 sps:$4 sm:$0xff]   ;;  %v4739_v44 = vld [vmem:[#allocation12 + $0x100] ss:$16 sps:$4 sm:$0xff]  }
  0x92   :  { %1233 = vmatprep.subr.bf16.mxu0 %v4723_v53  ;;  %1274 = vmatprep.subr.bf16.mxu1 %v4725_v62  ;;  %6589 = vst [vmem:[#allocation39_spill] sm:$0xff] %v4737_v35  ;;  %6590 = vst [vmem:[#allocation40_spill] sm:$0xff] %v4739_v44  ;;  %v4747_v62 = vld [vmem:[#allocation12 + $0x124] ss:$16 sps:$4 sm:$0xff]   ;;  %v4753_v53 = vld [vmem:[#allocation12 + $0x128] ss:$16 sps:$4 sm:$0xff]  }
  0x93   :  { %6592 = vst [vmem:[#allocation42_spill] sm:$0xff] %v4747_v62  ;;  %6595 = vst [vmem:[#allocation45_spill] sm:$0xff] %v4753_v53 }
  0x95   :  { %1234 = vmatpush1.bf16.msra.mxu0 %v4727_v6  ;;  %1275 = vmatpush1.bf16.msra.mxu1 %v4729_v0  ;;  %v4749_v6 = vld [vmem:[#allocation12 + $0x12c] ss:$16 sps:$4 sm:$0xff]   ;;  %v4751_v0 = vld [vmem:[#allocation12 + $0x120] ss:$16 sps:$4 sm:$0xff]  }
  0x96   :  { %1235 = vmatprep.subr.bf16.mxu0 %v4735_v32  ;;  %1276 = vmatprep.subr.bf16.mxu1 %v4737_v35  ;;  %6593 = vst [vmem:[#allocation43_spill] sm:$0xff] %v4749_v6  ;;  %6594 = vst [vmem:[#allocation44_spill] sm:$0xff] %v4751_v0  ;;  %v4759_v35 = vld [vmem:[#allocation12 + $0x144] ss:$16 sps:$4 sm:$0xff]   ;;  %v4765_v32 = vld [vmem:[#allocation12 + $0x148] ss:$16 sps:$4 sm:$0xff]  }
  0x97   :  { %6596 = vst [vmem:[#allocation46_spill] sm:$0xff] %v4759_v35  ;;  %6599 = vst [vmem:[#allocation49_spill] sm:$0xff] %v4765_v32 }
  0x99   :  { %1236 = vmatpush1.bf16.msra.mxu0 %v4739_v44  ;;  %1277 = vmatpush1.bf16.msra.mxu1 %v4741_v31  ;;  %v4761_v44 = vld [vmem:[#allocation12 + $0x14c] ss:$16 sps:$4 sm:$0xff]   ;;  %v4763_v31 = vld [vmem:[#allocation12 + $0x140] ss:$16 sps:$4 sm:$0xff]  }
  0x9a   :  { %1237 = vmatprep.subr.bf16.mxu0 %v4747_v62  ;;  %1278 = vmatprep.subr.bf16.mxu1 %v4749_v6  ;;  %6597 = vst [vmem:[#allocation47_spill] sm:$0xff] %v4761_v44  ;;  %6598 = vst [vmem:[#allocation48_spill] sm:$0xff] %v4763_v31  ;;  %v4771_v6 = vld [vmem:[#allocation12 + $0x164] ss:$16 sps:$4 sm:$0xff]   ;;  %v4777_v62 = vld [vmem:[#allocation12 + $0x168] ss:$16 sps:$4 sm:$0xff]  }
  0x9b   :  { %6600 = vst [vmem:[#allocation50_spill] sm:$0xff] %v4771_v6  ;;  %6603 = vst [vmem:[#allocation53_spill] sm:$0xff] %v4777_v62 }
  0x9d   :  { %1238 = vmatpush1.bf16.msra.mxu0 %v4751_v0  ;;  %1279 = vmatpush1.bf16.msra.mxu1 %v4753_v53  ;;  %v4773_v0 = vld [vmem:[#allocation12 + $0x16c] ss:$16 sps:$4 sm:$0xff]   ;;  %v4775_v53 = vld [vmem:[#allocation12 + $0x160] ss:$16 sps:$4 sm:$0xff]  }
  0x9e   :  { %1239 = vmatprep.subr.bf16.mxu0 %v4759_v35  ;;  %1280 = vmatprep.subr.bf16.mxu1 %v4761_v44  ;;  %6601 = vst [vmem:[#allocation51_spill] sm:$0xff] %v4773_v0  ;;  %6602 = vst [vmem:[#allocation52_spill] sm:$0xff] %v4775_v53  ;;  %v4783_v44 = vld [vmem:[#allocation12 + $0x184] ss:$16 sps:$4 sm:$0xff]   ;;  %v4789_v35 = vld [vmem:[#allocation12 + $0x188] ss:$16 sps:$4 sm:$0xff]  }
  0x9f   :  { %6604 = vst [vmem:[#allocation54_spill] sm:$0xff] %v4783_v44  ;;  %6607 = vst [vmem:[#allocation57_spill] sm:$0xff] %v4789_v35 }
  0xa1   :  { %1240 = vmatpush1.bf16.msra.mxu0 %v4763_v31  ;;  %1281 = vmatpush1.bf16.msra.mxu1 %v4765_v32  ;;  %v4785_v31 = vld [vmem:[#allocation12 + $0x18c] ss:$16 sps:$4 sm:$0xff]   ;;  %v4787_v32 = vld [vmem:[#allocation12 + $0x180] ss:$16 sps:$4 sm:$0xff]  }
  0xa2   :  { %1241 = vmatprep.subr.bf16.mxu0 %v4771_v6  ;;  %1282 = vmatprep.subr.bf16.mxu1 %v4773_v0  ;;  %6605 = vst [vmem:[#allocation55_spill] sm:$0xff] %v4785_v31  ;;  %6606 = vst [vmem:[#allocation56_spill] sm:$0xff] %v4787_v32  ;;  %v4795_v0 = vld [vmem:[#allocation12 + $0x1a4] ss:$16 sps:$4 sm:$0xff]   ;;  %v4801_v6 = vld [vmem:[#allocation12 + $0x1a8] ss:$16 sps:$4 sm:$0xff]  }
  0xa3   :  { %6608 = vst [vmem:[#allocation58_spill] sm:$0xff] %v4795_v0  ;;  %6611 = vst [vmem:[#allocation61_spill] sm:$0xff] %v4801_v6 }
  0xa5   :  { %1242 = vmatpush1.bf16.msra.mxu0 %v4775_v53  ;;  %1283 = vmatpush1.bf16.msra.mxu1 %v4777_v62  ;;  %v4797_v53 = vld [vmem:[#allocation12 + $0x1ac] ss:$16 sps:$4 sm:$0xff]   ;;  %v4799_v62 = vld [vmem:[#allocation12 + $0x1a0] ss:$16 sps:$4 sm:$0xff]  }
  0xa6   :  { %1243 = vmatprep.subr.bf16.mxu0 %v4783_v44  ;;  %1284 = vmatprep.subr.bf16.mxu1 %v4785_v31  ;;  %6609 = vst [vmem:[#allocation59_spill] sm:$0xff] %v4797_v53  ;;  %6610 = vst [vmem:[#allocation60_spill] sm:$0xff] %v4799_v62  ;;  %v4817_v31 = vld [vmem:[#allocation12 + $0x1e4] ss:$16 sps:$4 sm:$0xff]   ;;  %v4819_v44 = vld [vmem:[#allocation12 + $0x1ec] ss:$16 sps:$4 sm:$0xff]  }
  0xa7   :  { %6616 = vst [vmem:[#allocation66_spill] sm:$0xff] %v4817_v31  ;;  %6617 = vst [vmem:[#allocation67_spill] sm:$0xff] %v4819_v44 }
  0xa9   :  { %1244 = vmatpush1.bf16.msra.mxu0 %v4787_v32  ;;  %1285 = vmatpush1.bf16.msra.mxu1 %v4789_v35  ;;  %v4811_v35 = vld [vmem:[#allocation12 + $0x1c0] ss:$16 sps:$4 sm:$0xff]   ;;  %v4813_v32 = vld [vmem:[#allocation12 + $0x1c8] ss:$16 sps:$4 sm:$0xff]  }
  0xaa   :  { %1245 = vmatprep.subr.bf16.mxu0 %v4795_v0  ;;  %1286 = vmatprep.subr.bf16.mxu1 %v4797_v53  ;;  %6614 = vst [vmem:[#allocation64_spill] sm:$0xff] %v4811_v35  ;;  %6615 = vst [vmem:[#allocation65_spill] sm:$0xff] %v4813_v32  ;;  %v4823_v53 = vld [vmem:[#allocation12 + $0x1e0] ss:$16 sps:$4 sm:$0xff]  }
  0xab   :  { %6618 = vst [vmem:[#allocation68_spill] sm:$0xff] %v4823_v53 }
  0xad   :  { %1246 = vmatpush1.bf16.msra.mxu0 %v4799_v62  ;;  %1287 = vmatpush1.bf16.msra.mxu1 %v4801_v6  ;;  %v4825_v62 = vld [vmem:[#allocation12 + $0x1e8] ss:$16 sps:$4 sm:$0xff]  }
  0xae   :  { %1247 = vmatprep.subr.bf16.mxu0 %v4803_v30  ;;  %1288 = vmatprep.subr.bf16.mxu1 %v4805_v29  ;;  %6619 = vst [vmem:[#allocation69_spill] sm:$0xff] %v4825_v62  ;;  %v115_v29 = vlaneseq }
  0xb1   :  { %1248 = vmatpush1.bf16.msra.mxu0 %v4811_v35  ;;  %1289 = vmatpush1.bf16.msra.mxu1 %v4813_v32  ;;  %v4833_v35 = vshrl.u32 %v115_v29, 7 }
  0xb2   :  { %1249 = vmatprep.subr.bf16.mxu0 %v4817_v31  ;;  %1290 = vmatprep.subr.bf16.mxu1 %v4819_v44  ;;  %v113_v44 = vld [vmem:[%s6213_s3] sm:$0xf] }
  0xb3   :  { %6620 = vst [vmem:[#allocation70_spill] sm:$0xff] %v4833_v35  ;;  %v6311_v32 = vsub.s32 2, %v4833_v35  ;;  %v6320_v30 = vsub.s32 3, %v4833_v35  ;;  %v6321_v6 = vsub.s32 0, %v4833_v35 }
  0xb5   :  { %1250 = vmatpush1.bf16.msra.mxu0 %v4823_v53  ;;  %1291 = vmatpush1.bf16.msra.mxu1 %v4825_v62  ;;  %v6328_v53 = vsub.s32 1, %v4833_v35  ;;  %v4852_v62 = vrot.slane %v113_v44, %v6320_v30  ;;  %v118_v31 = vrot.slane %v113_v44, %v6321_v6 }
  0xb6   :  { %1398 = vmatprep.subr.bf16.mxu0 %v4523_v33  ;;  %1439 = vmatprep.subr.bf16.mxu1 %v4525_v34  ;;  %v4844_v33 = vrot.slane %v113_v44, %v6311_v32 }
  0xb7   :  { %v122_v27 = vrot.slane %v113_v44, %v6328_v53 }
 0x12a   :  { %v4846_v34 = vpop.f32.mrb[0].mxu0  ;;  %v4848_v29 = vpop.f32.mrb[0].mxu1 }
 0x12b   :  { %v355_v0 = vpop.f32.mrb[1].mxu0  ;;  %v428_v28 = vpop.f32.mrb[1].mxu1 }
 0x12c   :  { %v357_v26 = vpop.f32.mrb[2].mxu0  ;;  %v430_v25 = vpop.f32.mrb[2].mxu1 }
 0x12d   :  { %v4858_v32 = vadd.f32 %v357_v26, %v118_v31  ;;  %v359_v24 = vpop.f32.mrb[3].mxu0  ;;  %v4861_v23 = vadd.f32 %v430_v25, %v4844_v33  ;;  %v432_v22 = vpop.f32.mrb[3].mxu1 }
 0x12e   :  { %v4863_v21 = vadd.f32 %v359_v24, %v122_v27  ;;  %v4866_v30 = vadd.f32 %v432_v22, %v4852_v62 }
 0x12f   :  { %6621 = vst [vmem:[#allocation71_spill] sm:$0xff] %v4858_v32  ;;  %6622 = vst [vmem:[#allocation72_spill] sm:$0xff] %v4861_v23 }
 0x130   :  { %6623 = vst [vmem:[#allocation73_spill] sm:$0xff] %v4863_v21  ;;  %6624 = vst [vmem:[#allocation74_spill] sm:$0xff] %v4866_v30 }
 0x132   :  { %v363_v6 = vpop.f32.mrb[4].mxu0  ;;  %v436_v20 = vpop.f32.mrb[4].mxu1 }
 0x133   :  { %v4868_v19 = vadd.f32 %v363_v6, %v118_v31  ;;  %v365_v35 = vpop.f32.mrb[5].mxu0  ;;  %v4871_v44 = vadd.f32 %v436_v20, %v4844_v33  ;;  %v438_v26 = vpop.f32.mrb[5].mxu1 }
 0x134   :  { %v4873_v53 = vadd.f32 %v365_v35, %v122_v27  ;;  %v367_v32 = vpop.f32.mrb[6].mxu0  ;;  %v4876_v25 = vadd.f32 %v438_v26, %v4852_v62  ;;  %v440_v24 = vpop.f32.mrb[6].mxu1 }
 0x135   :  { %6625 = vst [vmem:[#allocation75_spill] sm:$0xff] %v4868_v19  ;;  %6626 = vst [vmem:[#allocation76_spill] sm:$0xff] %v4871_v44  ;;  %v4878_v21 = vadd.f32 %v367_v32, %v118_v31  ;;  %v369_v22 = vpop.f32.mrb[7].mxu0  ;;  %v4881_v30 = vadd.f32 %v440_v24, %v4844_v33  ;;  %v442_v6 = vpop.f32.mrb[7].mxu1 }
 0x136   :  { %6627 = vst [vmem:[#allocation77_spill] sm:$0xff] %v4873_v53  ;;  %6628 = vst [vmem:[#allocation78_spill] sm:$0xff] %v4876_v25  ;;  %v4883_v19 = vadd.f32 %v369_v22, %v122_v27  ;;  %v4886_v20 = vadd.f32 %v442_v6, %v4852_v62 }
 0x137   :  { %6629 = vst [vmem:[#allocation79_spill] sm:$0xff] %v4878_v21  ;;  %6630 = vst [vmem:[#allocation80_spill] sm:$0xff] %v4881_v30 }
 0x138   :  { %6631 = vst [vmem:[#allocation81_spill] sm:$0xff] %v4883_v19  ;;  %6632 = vst [vmem:[#allocation82_spill] sm:$0xff] %v4886_v20 }
 0x13a   :  { %v373_v44 = vpop.f32.mrb[8].mxu0  ;;  %v446_v35 = vpop.f32.mrb[8].mxu1 }
 0x13b   :  { %v4888_v53 = vadd.f32 %v373_v44, %v118_v31  ;;  %v375_v23 = vpop.f32.mrb[9].mxu0  ;;  %v4891_v26 = vadd.f32 %v446_v35, %v4844_v33  ;;  %v448_v32 = vpop.f32.mrb[9].mxu1 }
 0x13c   :  { %v4893_v21 = vadd.f32 %v375_v23, %v122_v27  ;;  %v377_v25 = vpop.f32.mrb[10].mxu0  ;;  %v4896_v24 = vadd.f32 %v448_v32, %v4852_v62  ;;  %v450_v22 = vpop.f32.mrb[10].mxu1 }
 0x13d   :  { %6633 = vst [vmem:[#allocation83_spill] sm:$0xff] %v4888_v53  ;;  %6634 = vst [vmem:[#allocation84_spill] sm:$0xff] %v4891_v26  ;;  %v4898_v19 = vadd.f32 %v377_v25, %v118_v31  ;;  %v379_v6 = vpop.f32.mrb[11].mxu0  ;;  %v4901_v20 = vadd.f32 %v450_v22, %v4844_v33  ;;  %v452_v44 = vpop.f32.mrb[11].mxu1 }
 0x13e   :  { %6635 = vst [vmem:[#allocation85_spill] sm:$0xff] %v4893_v21  ;;  %6636 = vst [vmem:[#allocation86_spill] sm:$0xff] %v4896_v24  ;;  %v4903_v53 = vadd.f32 %v379_v6, %v122_v27  ;;  %v4906_v35 = vadd.f32 %v452_v44, %v4852_v62 }
 0x13f   :  { %6637 = vst [vmem:[#allocation87_spill] sm:$0xff] %v4898_v19  ;;  %6638 = vst [vmem:[#allocation88_spill] sm:$0xff] %v4901_v20 }
 0x140   :  { %6639 = vst [vmem:[#allocation89_spill] sm:$0xff] %v4903_v53  ;;  %6640 = vst [vmem:[#allocation90_spill] sm:$0xff] %v4906_v35 }
 0x142   :  { %v383_v26 = vpop.f32.mrb[12].mxu0  ;;  %v456_v23 = vpop.f32.mrb[12].mxu1 }
 0x143   :  { %v4908_v21 = vadd.f32 %v383_v26, %v118_v31  ;;  %v385_v30 = vpop.f32.mrb[13].mxu0  ;;  %v4911_v32 = vadd.f32 %v456_v23, %v4844_v33  ;;  %v458_v25 = vpop.f32.mrb[13].mxu1 }
 0x144   :  { %v4913_v19 = vadd.f32 %v385_v30, %v122_v27  ;;  %v387_v24 = vpop.f32.mrb[14].mxu0  ;;  %v4916_v22 = vadd.f32 %v458_v25, %v4852_v62  ;;  %v460_v6 = vpop.f32.mrb[14].mxu1  ;;  %v354_v30 = vadd.f32 %v4846_v34, %v118_v31  ;;  %v356_v25 = vadd.f32 %v355_v0, %v122_v27 }
 0x145   :  { %6641 = vst [vmem:[#allocation91_spill] sm:$0xff] %v4908_v21  ;;  %6642 = vst [vmem:[#allocation92_spill] sm:$0xff] %v4911_v32  ;;  %v4918_v53 = vadd.f32 %v387_v24, %v118_v31  ;;  %v389_v44 = vpop.f32.mrb[15].mxu0  ;;  %v4921_v35 = vadd.f32 %v460_v6, %v4844_v33  ;;  %v462_v26 = vpop.f32.mrb[15].mxu1 }
 0x146   :  { %6643 = vst [vmem:[#allocation93_spill] sm:$0xff] %v4913_v19  ;;  %6644 = vst [vmem:[#allocation94_spill] sm:$0xff] %v4916_v22  ;;  %v4923_v21 = vadd.f32 %v389_v44, %v122_v27  ;;  %v4926_v23 = vadd.f32 %v462_v26, %v4852_v62  ;;  %v427_v19 = vadd.f32 %v4848_v29, %v4844_v33 }
 0x147   :  { %6645 = vst [vmem:[#allocation95_spill] sm:$0xff] %v4918_v53  ;;  %6646 = vst [vmem:[#allocation96_spill] sm:$0xff] %v4921_v35  ;;  %v429_v22 = vadd.f32 %v428_v28, %v4852_v62 }
 0x148   :  { %6647 = vst [vmem:[#allocation97_spill] sm:$0xff] %v4923_v21  ;;  %6648 = vst [vmem:[#allocation98_spill] sm:$0xff] %v4926_v23 }
 0x14a   :  { %v800_v24 = vpop.f32.mrb[16].mxu0  ;;  %v841_v53 = vpop.f32.mrb[16].mxu1 }
 0x14b   :  { %v848_v32 = vadd.f32 %v800_v24, %v354_v30  ;;  %v850_v20 = vadd.f32 %v841_v53, %v427_v19  ;;  %v802_v6 = vpop.f32.mrb[17].mxu0  ;;  %v843_v35 = vpop.f32.mrb[17].mxu1  ;;  %v6680_v30 = vld [vmem:[#allocation45_spill] sm:$0xff]  ;;  %v6682_v24 = vld [vmem:[#allocation47_spill] sm:$0xff] }
 0x14c   :  { %v849_v18 = vadd.f32 %v802_v6, %v356_v25  ;;  %v851_v44 = vadd.f32 %v843_v35, %v429_v22  ;;  %v804_v21 = vpop.f32.mrb[18].mxu0  ;;  %v845_v17 = vpop.f32.mrb[18].mxu1  ;;  %v6681_v25 = vld [vmem:[#allocation46_spill] sm:$0xff]  ;;  %v6683_v6 = vld [vmem:[#allocation48_spill] sm:$0xff] }
 0x14d   :  { %v3537_v26 = vmul.f32 -1.442695, %v848_v32  ;;  %v805_v23 = vpop.f32.mrb[19].mxu0  ;;  %v846_v16 = vpop.f32.mrb[19].mxu1 }
 0x14e   :  { %v3538_v31 = vmul.f32 -1.442695, %v849_v18  ;;  %v3539_v33 = vmul.f32 -1.442695, %v851_v44  ;;  %v6684_v44 = vld [vmem:[#allocation49_spill] sm:$0xff] }
 0x14f   :  { %3908 = vpow2.f32 %v3537_v26  ;;  %v6685_v26 = vld [vmem:[#allocation50_spill] sm:$0xff] }
 0x150   :  { %3910 = vpow2.f32 %v3538_v31  ;;  %v6686_v31 = vld [vmem:[#allocation51_spill] sm:$0xff] }
 0x151   :  { %3912 = vpow2.f32 %v3539_v33  ;;  %v6687_v33 = vld [vmem:[#allocation52_spill] sm:$0xff] }
 0x152   :  { %3914 = vtanh.f32 %v850_v20  ;;  %v6649_v20 = vmov 0  }
 0x159   :  { %v3909_v0 = vpop.eup %3908 }
 0x15a   :  { %v3911_v27 = vpop.eup %3910  ;;  %v855_v28 = vadd.f32 1.0, %v3909_v0  ;;  %v6688_v0 = vld [vmem:[#allocation53_spill] sm:$0xff] }
 0x15b   :  { %v861_v62 = vadd.f32 1.0, %v3911_v27  ;;  %v3913_v19 = vpop.eup %3912  ;;  %v6689_v27 = vld [vmem:[#allocation54_spill] sm:$0xff] }
 0x15c   :  { %3916 = vrcp.f32 %v855_v28  ;;  %v3915_v53 = vpop.eup %3914  ;;  %v868_v29 = vadd.f32 1.0, %v3913_v19  ;;  %v6690_v28 = vld [vmem:[#allocation55_spill] sm:$0xff]  ;;  %v6692_v19 = vld [vmem:[#allocation57_spill] sm:$0xff] }
 0x15d   :  { %3918 = vrcp.f32 %v861_v62  ;;  %v6691_v62 = vld [vmem:[#allocation56_spill] sm:$0xff] }
 0x15e   :  { %3920 = vrcp.f32 %v868_v29  ;;  %v6697_v29 = vld [vmem:[#allocation62_spill] sm:$0xff] }
 0x166   :  { %v3917_v34 = vpop.eup %3916 }
 0x167   :  { %v3919_v21 = vpop.eup %3918  ;;  %v872_v17 = vmul.f32 %v3917_v34, %v3915_v53  ;;  %v6693_v53 = vld [vmem:[#allocation58_spill] sm:$0xff]  ;;  %v6694_v34 = vld [vmem:[#allocation59_spill] sm:$0xff] }
 0x168   :  { %v871_v35 = vmul.f32 0.0, %v3919_v21  ;;  %v3921_v18 = vpop.eup %3920  ;;  %v6695_v21 = vld [vmem:[#allocation60_spill] sm:$0xff] }
 0x16a   :  { %v4932_v16 = vadd.f32 %v872_v17, %v871_v35  ;;  %v6696_v17 = vld [vmem:[#allocation61_spill] sm:$0xff]  ;;  %v6698_v35 = vld [vmem:[#allocation63_spill] sm:$0xff] }
 0x16c   :  { %3922 = vtanh.f32 %v4932_v16 }
 0x176   :  { %v3923_v32 = vpop.eup %3922 }
 0x177   :  { %v875_v22 = vmul.f32 %v3923_v32, %v3921_v18  ;;  %v6699_v18 = vld [vmem:[#allocation64_spill] sm:$0xff]  ;;  %v6700_v32 = vld [vmem:[#allocation65_spill] sm:$0xff] }
 0x179   :  { %v876_v23 = vpack.c.bf16 %v875_v22, %v875_v22  ;;  %v6701_v22 = vld [vmem:[#allocation66_spill] sm:$0xff] }
 0x17b   :  { %1252 = vmatmul.mubr.bf16.vlgmr.msra.gmra.mrb[20].mxu0 %v876_v23  ;;  %1293 = vmatmul.mubr.bf16.vlgmr.msra.gmra.mrb[20].mxu1 %v876_v23 }
 0x17c   :  { %1399 = vmatpush1.bf16.msra.mxu0 %v4530_v36  ;;  %1440 = vmatpush1.bf16.msra.mxu1 %v4532_v37  ;;  %v6650_v36 = vld [vmem:[#allocation15_spill] sm:$0xff]  ;;  %v6651_v37 = vld [vmem:[#allocation16_spill] sm:$0xff] }
 0x17d   :  { %1400 = vmatprep.subr.bf16.mxu0 %v4536_v38  ;;  %1441 = vmatprep.subr.bf16.mxu1 %v4538_v39  ;;  %v6652_v38 = vld [vmem:[#allocation17_spill] sm:$0xff]  ;;  %v6653_v39 = vld [vmem:[#allocation18_spill] sm:$0xff] }
 0x17e   :  { %1430 = vmatprep.mubr.bf16.mxu0 %v6649_v20  ;;  %1471 = vmatprep.mubr.bf16.mxu1 %v6649_v20 }
 0x180   :  { %1401 = vmatpush1.bf16.msra.mxu0 %v4540_v40  ;;  %1442 = vmatpush1.bf16.msra.mxu1 %v4544_v41  ;;  %v6654_v40 = vld [vmem:[#allocation19_spill] sm:$0xff]  ;;  %v6655_v41 = vld [vmem:[#allocation20_spill] sm:$0xff] }
 0x181   :  { %1402 = vmatprep.subr.bf16.mxu0 %v4548_v42  ;;  %1443 = vmatprep.subr.bf16.mxu1 %v4550_v43  ;;  %v6656_v42 = vld [vmem:[#allocation21_spill] sm:$0xff]  ;;  %v6657_v43 = vld [vmem:[#allocation22_spill] sm:$0xff] }
 0x184   :  { %1403 = vmatpush1.bf16.msra.mxu0 %v4557_v45  ;;  %1444 = vmatpush1.bf16.msra.mxu1 %v4559_v46  ;;  %v6658_v45 = vld [vmem:[#allocation23_spill] sm:$0xff]  ;;  %v6659_v46 = vld [vmem:[#allocation24_spill] sm:$0xff] }
 0x185   :  { %1404 = vmatprep.subr.bf16.mxu0 %v4563_v47  ;;  %1445 = vmatprep.subr.bf16.mxu1 %v4567_v48  ;;  %v6660_v47 = vld [vmem:[#allocation25_spill] sm:$0xff]  ;;  %v6661_v48 = vld [vmem:[#allocation26_spill] sm:$0xff] }
 0x188   :  { %1405 = vmatpush1.bf16.msra.mxu0 %v4569_v49  ;;  %1446 = vmatpush1.bf16.msra.mxu1 %v4571_v50  ;;  %v6662_v49 = vld [vmem:[#allocation27_spill] sm:$0xff]  ;;  %v6663_v50 = vld [vmem:[#allocation28_spill] sm:$0xff] }
 0x189   :  { %1406 = vmatprep.subr.bf16.mxu0 %v4575_v51  ;;  %1447 = vmatprep.subr.bf16.mxu1 %v4579_v52  ;;  %v6664_v51 = vld [vmem:[#allocation29_spill] sm:$0xff]  ;;  %v6665_v52 = vld [vmem:[#allocation30_spill] sm:$0xff] }
 0x18c   :  { %1407 = vmatpush1.bf16.msra.mxu0 %v4586_v54  ;;  %1448 = vmatpush1.bf16.msra.mxu1 %v4588_v55  ;;  %v6666_v54 = vld [vmem:[#allocation31_spill] sm:$0xff]  ;;  %v6667_v55 = vld [vmem:[#allocation32_spill] sm:$0xff] }
 0x18d   :  { %1408 = vmatprep.subr.bf16.mxu0 %v4590_v56  ;;  %1449 = vmatprep.subr.bf16.mxu1 %v4592_v57  ;;  %v6668_v56 = vld [vmem:[#allocation33_spill] sm:$0xff]  ;;  %v6669_v57 = vld [vmem:[#allocation34_spill] sm:$0xff] }
 0x190   :  { %1409 = vmatpush1.bf16.msra.mxu0 %v4598_v58  ;;  %1450 = vmatpush1.bf16.msra.mxu1 %v4600_v59  ;;  %v6670_v58 = vld [vmem:[#allocation35_spill] sm:$0xff]  ;;  %v6671_v59 = vld [vmem:[#allocation36_spill] sm:$0xff] }
 0x191   :  { %1410 = vmatprep.subr.bf16.mxu0 %v4602_v60  ;;  %1451 = vmatprep.subr.bf16.mxu1 %v4604_v61  ;;  %v6672_v60 = vld [vmem:[#allocation37_spill] sm:$0xff]  ;;  %v6673_v61 = vld [vmem:[#allocation38_spill] sm:$0xff] }
 0x194   :  { %1411 = vmatpush1.bf16.msra.mxu0 %v4615_v63  ;;  %1452 = vmatpush1.bf16.msra.mxu1 %v4617_v1  ;;  %v6674_v63 = vld [vmem:[#allocation39_spill] sm:$0xff]  ;;  %v6675_v1 = vld [vmem:[#allocation40_spill] sm:$0xff] }
 0x195   :  { %1412 = vmatprep.subr.bf16.mxu0 %v4619_v2  ;;  %1453 = vmatprep.subr.bf16.mxu1 %v4621_v3  ;;  %v6676_v2 = vld [vmem:[#allocation41_spill] sm:$0xff]  ;;  %v6677_v3 = vld [vmem:[#allocation42_spill] sm:$0xff] }
 0x198   :  { %1413 = vmatpush1.bf16.msra.mxu0 %v4627_v4  ;;  %1454 = vmatpush1.bf16.msra.mxu1 %v4629_v5  ;;  %v6678_v4 = vld [vmem:[#allocation43_spill] sm:$0xff]  ;;  %v6679_v5 = vld [vmem:[#allocation44_spill] sm:$0xff] }
 0x199   :  { %1510 = vmatprep.subr.bf16.mxu0 %v4639_v7  ;;  %1551 = vmatprep.subr.bf16.mxu1 %v4641_v8 }
 0x19b   :  { %1431 = vmatmul.mubr.bf16.vlgmr.msra.gmra.mrb[24].mxu0 %v876_v23  ;;  %1472 = vmatmul.mubr.bf16.vlgmr.msra.gmra.mrb[24].mxu1 %v876_v23  ;;  %v6702_v23 = vld [vmem:[#allocation67_spill] sm:$0xff] }
 0x19c   :  { %1511 = vmatpush1.bf16.msra.mxu0 %v4643_v9  ;;  %1552 = vmatpush1.bf16.msra.mxu1 %v4645_v10 }
 0x19d   :  { %1512 = vmatprep.subr.bf16.mxu0 %v4651_v11  ;;  %1553 = vmatprep.subr.bf16.mxu1 %v4653_v12 }
 0x1a0   :  { %1513 = vmatpush1.bf16.msra.mxu0 %v4655_v13  ;;  %1554 = vmatpush1.bf16.msra.mxu1 %v4657_v14 }
 0x1a1   :  { %1514 = vmatprep.subr.bf16.mxu0 %v4663_v15  ;;  %1555 = vmatprep.subr.bf16.mxu1 %v6650_v36 }
 0x1a4   :  { %1515 = vmatpush1.bf16.msra.mxu0 %v6651_v37  ;;  %1556 = vmatpush1.bf16.msra.mxu1 %v6652_v38 }
 0x1a5   :  { %1516 = vmatprep.subr.bf16.mxu0 %v6653_v39  ;;  %1557 = vmatprep.subr.bf16.mxu1 %v6654_v40 }
 0x1a8   :  { %1517 = vmatpush1.bf16.msra.mxu0 %v6655_v41  ;;  %1558 = vmatpush1.bf16.msra.mxu1 %v6656_v42 }
 0x1a9   :  { %1518 = vmatprep.subr.bf16.mxu0 %v6657_v43  ;;  %1559 = vmatprep.subr.bf16.mxu1 %v6658_v45 }
 0x1ac   :  { %1519 = vmatpush1.bf16.msra.mxu0 %v6659_v46  ;;  %1560 = vmatpush1.bf16.msra.mxu1 %v6660_v47 }
 0x1ad   :  { %1520 = vmatprep.subr.bf16.mxu0 %v6661_v48  ;;  %1561 = vmatprep.subr.bf16.mxu1 %v6662_v49 }
 0x1b0   :  { %1521 = vmatpush1.bf16.msra.mxu0 %v6663_v50  ;;  %1562 = vmatpush1.bf16.msra.mxu1 %v6664_v51 }
 0x1b1   :  { %1522 = vmatprep.subr.bf16.mxu0 %v6665_v52  ;;  %1563 = vmatprep.subr.bf16.mxu1 %v6666_v54 }
 0x1b4   :  { %1523 = vmatpush1.bf16.msra.mxu0 %v6667_v55  ;;  %1564 = vmatpush1.bf16.msra.mxu1 %v6668_v56 }
 0x1b5   :  { %1524 = vmatprep.subr.bf16.mxu0 %v6669_v57  ;;  %1565 = vmatprep.subr.bf16.mxu1 %v6670_v58 }
 0x1b8   :  { %1525 = vmatpush1.bf16.msra.mxu0 %v6671_v59  ;;  %1566 = vmatpush1.bf16.msra.mxu1 %v6672_v60 }
 0x1b9   :  { %1526 = vmatprep.subr.bf16.mxu0 %v6673_v61  ;;  %1567 = vmatprep.subr.bf16.mxu1 %v6674_v63 }
 0x1bc   :  { %1527 = vmatpush1.bf16.msra.mxu0 %v6675_v1  ;;  %1568 = vmatpush1.bf16.msra.mxu1 %v6676_v2 }
 0x1bd   :  { %1528 = vmatprep.subr.bf16.mxu0 %v6677_v3  ;;  %1569 = vmatprep.subr.bf16.mxu1 %v6678_v4 }
 0x1c0   :  { %1529 = vmatpush1.bf16.msra.mxu0 %v6679_v5  ;;  %1570 = vmatpush1.bf16.msra.mxu1 %v6680_v30 }
 0x1c1   :  { %1530 = vmatprep.subr.bf16.mxu0 %v6681_v25  ;;  %1571 = vmatprep.subr.bf16.mxu1 %v6682_v24 }
 0x1c4   :  { %1531 = vmatpush1.bf16.msra.mxu0 %v6683_v6  ;;  %1572 = vmatpush1.bf16.msra.mxu1 %v6684_v44 }
 0x1c5   :  { %1532 = vmatprep.subr.bf16.mxu0 %v6685_v26  ;;  %1573 = vmatprep.subr.bf16.mxu1 %v6686_v31 }
 0x1c8   :  { %1533 = vmatpush1.bf16.msra.mxu0 %v6687_v33  ;;  %1574 = vmatpush1.bf16.msra.mxu1 %v6688_v0 }
 0x1c9   :  { %1534 = vmatprep.subr.bf16.mxu0 %v6689_v27  ;;  %1575 = vmatprep.subr.bf16.mxu1 %v6690_v28 }
 0x1cc   :  { %1535 = vmatpush1.bf16.msra.mxu0 %v6691_v62  ;;  %1576 = vmatpush1.bf16.msra.mxu1 %v6692_v19  ;;  %v6703_v19 = vld [vmem:[#allocation68_spill] sm:$0xff] }
 0x1cd   :  { %1536 = vmatprep.subr.bf16.mxu0 %v6693_v53  ;;  %1577 = vmatprep.subr.bf16.mxu1 %v6694_v34  ;;  %v6704_v53 = vld [vmem:[#allocation69_spill] sm:$0xff] }
 0x1ce   :  { %v5031_v34 = vld [vmem:[#allocation10 + $0x4] ss:$16 sps:$4 sm:$0xff]  }
 0x1cf   :  { %6705 = vst [vmem:[#allocation15_spill] sm:$0xff] %v5031_v34 }
 0x1d0   :  { %1537 = vmatpush1.bf16.msra.mxu0 %v6695_v21  ;;  %1578 = vmatpush1.bf16.msra.mxu1 %v6696_v17  ;;  %v5034_v17 = vld [vmem:[#allocation10 + $0xc] ss:$16 sps:$4 sm:$0xff]  }
 0x1d1   :  { %1538 = vmatprep.subr.bf16.mxu0 %v6697_v29  ;;  %1579 = vmatprep.subr.bf16.mxu1 %v6698_v35  ;;  %6706 = vst [vmem:[#allocation16_spill] sm:$0xff] %v5034_v17 }
 0x1d4   :  { %1539 = vmatpush1.bf16.msra.mxu0 %v6699_v18  ;;  %1580 = vmatpush1.bf16.msra.mxu1 %v6700_v32  ;;  %v593_v32 = vld [vmem:[%s6215_s5] sm:$0xf]  ;;  %v6707_v18 = vld [vmem:[#allocation70_spill] sm:$0xff] }
 0x1d5   :  { %1540 = vmatprep.subr.bf16.mxu0 %v6701_v22  ;;  %1581 = vmatprep.subr.bf16.mxu1 %v6702_v23  ;;  %v6708_v22 = vsub.s32 0, %v6707_v18 }
 0x1d7   :  { %v5042_v35 = vrot.slane %v593_v32, %v6708_v22  ;;  %v6712_v22 = vsub.s32 3, %v6707_v18 }
 0x1d8   :  { %1541 = vmatpush1.bf16.msra.mxu0 %v6703_v19  ;;  %1582 = vmatpush1.bf16.msra.mxu1 %v6704_v53  ;;  %v6710_v19 = vsub.s32 1, %v6707_v18 }
 0x1d9   :  { %1689 = vmatprep.subr.bf16.mxu0 %v5031_v34  ;;  %1730 = vmatprep.subr.bf16.mxu1 %v5034_v17  ;;  %6709 = vst [vmem:[#allocation17_spill] sm:$0xff] %v5042_v35  ;;  %v5052_v44 = vrot.slane %v593_v32, %v6712_v22 }
 0x1da   :  { %v5046_v23 = vrot.slane %v593_v32, %v6710_v19 }
 0x1db   :  { %6713 = vst [vmem:[#allocation19_spill] sm:$0xff] %v5052_v44 }
 0x1dc   :  { %6711 = vst [vmem:[#allocation18_spill] sm:$0xff] %v5046_v23 }
 0x24e   :  { %v1253_v53 = vpop.f32.mrb[20].mxu0  ;;  %v1294_v29 = vpop.f32.mrb[20].mxu1 }
 0x24f   :  { %v1254_v34 = vadd.f32 %v1253_v53, %v5042_v35  ;;  %v1255_v21 = vpop.f32.mrb[21].mxu0  ;;  %v1296_v62 = vpop.f32.mrb[21].mxu1  ;;  %v6714_v53 = vsub.s32 2, %v6707_v18 }
 0x250   :  { %v1256_v17 = vadd.f32 %v1255_v21, %v5046_v23  ;;  %v1257_v28 = vpop.f32.mrb[22].mxu0  ;;  %v1298_v27 = vpop.f32.mrb[22].mxu1  ;;  %v1297_v19 = vadd.f32 %v1296_v62, %v5052_v44  ;;  %v6720_v23 = vld [vmem:[#allocation74_spill] sm:$0xff] }
 0x251   :  { %v3604_v0 = vmul.f32 -1.442695, %v1254_v34  ;;  %v1258_v33 = vpop.f32.mrb[23].mxu0  ;;  %v1299_v31 = vpop.f32.mrb[23].mxu1  ;;  %v5057_v35 = vrot.slane %v593_v32, %v6714_v53 }
 0x252   :  { %v3605_v26 = vmul.f32 -1.442695, %v1256_v17  ;;  %v3606_v6 = vmul.f32 -1.442695, %v1297_v19 }
 0x253   :  { %3924 = vpow2.f32 %v3604_v0  ;;  %6715 = vst [vmem:[#allocation20_spill] sm:$0xff] %v5057_v35  ;;  %v1295_v28 = vadd.f32 %v1294_v29, %v5057_v35  ;;  %v6717_v29 = vld [vmem:[#allocation71_spill] sm:$0xff] }
 0x254   :  { %3926 = vpow2.f32 %v3605_v26 }
 0x255   :  { %3928 = vpow2.f32 %v3606_v6 }
 0x256   :  { %3930 = vtanh.f32 %v1295_v28 }
 0x25d   :  { %v3925_v27 = vpop.eup %3924 }
 0x25e   :  { %v3927_v34 = vpop.eup %3926  ;;  %v1304_v33 = vadd.f32 1.0, %v3925_v27  ;;  %v6718_v27 = vld [vmem:[#allocation72_spill] sm:$0xff] }
 0x25f   :  { %v1310_v31 = vadd.f32 1.0, %v3927_v34  ;;  %v3929_v21 = vpop.eup %3928 }
 0x260   :  { %3932 = vrcp.f32 %v1304_v33  ;;  %v3931_v0 = vpop.eup %3930  ;;  %v1317_v22 = vadd.f32 1.0, %v3929_v21  ;;  %v6719_v33 = vld [vmem:[#allocation73_spill] sm:$0xff] }
 0x261   :  { %3934 = vrcp.f32 %v1310_v31 }
 0x262   :  { %3936 = vrcp.f32 %v1317_v22 }
 0x26a   :  { %v3933_v26 = vpop.eup %3932 }
 0x26b   :  { %v3935_v17 = vpop.eup %3934  ;;  %v1321_v62 = vmul.f32 %v3933_v26, %v3931_v0 }
 0x26c   :  { %v1320_v44 = vmul.f32 0.0, %v3935_v17 }
 0x26e   :  { %v5060_v32 = vadd.f32 %v1321_v62, %v1320_v44  ;;  %v1432_v19 = vpop.f32.mrb[24].mxu0  ;;  %v1473_v53 = vpop.f32.mrb[24].mxu1  ;;  %v4433_v62 = vmov 1966171168  }
 0x26f   :  { %v1480_v35 = vadd.f32 %v1432_v19, %v6717_v29  ;;  %v1482_v6 = vadd.f32 %v1473_v53, %v6718_v27  ;;  %v1434_v28 = vpop.f32.mrb[25].mxu0  ;;  %v1475_v34 = vpop.f32.mrb[25].mxu1  ;;  %v1328_v25 = vunpack.c.l.s4 %v4433_v62 }
 0x270   :  { %6716 = vst [vmem:[#allocation21_spill] sm:$0xff] %v5060_v32  ;;  %3938 = vtanh.f32 %v5060_v32  ;;  %v1481_v31 = vadd.f32 %v1434_v28, %v6719_v33  ;;  %v1483_v24 = vadd.f32 %v1475_v34, %v6720_v23  ;;  %v1436_v0 = vpop.f32.mrb[26].mxu0  ;;  %v1477_v21 = vpop.f32.mrb[26].mxu1 }
 0x271   :  { %v3611_v26 = vmul.f32 -1.442695, %v1480_v35  ;;  %v1437_v44 = vpop.f32.mrb[27].mxu0  ;;  %v1478_v17 = vpop.f32.mrb[27].mxu1  ;;  %v1329_v19 = vunpack.c.0.s8 %v1328_v25 }
 0x272   :  { %v3612_v22 = vmul.f32 -1.442695, %v1481_v31  ;;  %v3937_v53 = vpop.eup %3936  ;;  %v3613_v32 = vmul.f32 -1.442695, %v1483_v24 }
 0x273   :  { %3940 = vpow2.f32 %v3611_v26  ;;  %v5068_v29 = vsub.s32 %v1329_v19, %v6707_v18 }
 0x274   :  { %3942 = vpow2.f32 %v3612_v22 }
 0x275   :  { %3944 = vtanh.f32 %v1482_v6 }
 0x276   :  { %3946 = vpow2.f32 %v3613_v32 }
 0x27a   :  { %v3939_v27 = vpop.eup %3938 }
 0x27b   :  { %v1324_v28 = vmul.f32 %v3939_v27, %v3937_v53 }
 0x27d   :  { %v3941_v33 = vpop.eup %3940  ;;  %v1326_v23 = vcombine.high %v1324_v28, %v1324_v28  ;;  %v1333_v35 = vrot.slane %v1324_v28, %v5068_v29  ;;  %v1509_v34 = vpack.c.bf16 %v1324_v28, %v1324_v28 }
 0x27e   :  { %v3943_v0 = vpop.eup %3942  ;;  %v1487_v21 = vadd.f32 1.0, %v3941_v33 }
 0x27f   :  { %v1493_v31 = vadd.f32 1.0, %v3943_v0  ;;  %v1340_v26 = vrot.slane %v1326_v23, %v5068_v29  ;;  %v1341_v25 = vcombine.high %v1333_v35, %v1333_v35  ;;  %v1349_v44 = vrot.slane %v1333_v35, %v5068_v29  ;;  %3607 = vst.sshfl [vmem:[#allocation3] sm:$0x1 pattern:$0x73625140] %v1333_v35  ;;  %1542 = vmatprep.mubr.bf16.mxu0 %v1509_v34  ;;  %v3945_v53 = vpop.eup %3944 }
 0x280   :  { %1583 = vmatprep.mubr.bf16.mxu1 %v1509_v34  ;;  %3948 = vrcp.f32 %v1487_v21  ;;  %v3947_v27 = vpop.eup %3946 }
 0x281   :  { %3950 = vrcp.f32 %v1493_v31  ;;  %v1342_v24 = vcombine.high %v1340_v26, %v1340_v26  ;;  %v1356_v18 = vrot.slane %v1340_v26, %v5068_v29  ;;  %v1363_v6 = vrot.slane %v1341_v25, %v5068_v29  ;;  %3608 = vst.sshfl [vmem:[#allocation3 + $0x8] sm:$0x1 pattern:$0x73625140] %v1341_v25 }
 0x282   :  { %3609 = vst.sshfl [vmem:[#allocation3 + $0x20] sm:$0x1 pattern:$0x73625140] %v1340_v26  ;;  %v1371_v17 = vcombine.high %v1349_v44, %v1349_v44  ;;  %v1500_v35 = vadd.f32 1.0, %v3947_v27 }
 0x283   :  { %v1370_v32 = vrot.slane %v1342_v24, %v5068_v29  ;;  %v1372_v62 = vcombine.high %v1356_v18, %v1356_v18  ;;  %v1373_v22 = vcombine.high %v1363_v6, %v1363_v6  ;;  %3610 = vst.sshfl [vmem:[#allocation3 + $0x28] sm:$0x1 pattern:$0x73625140] %v1342_v24  ;;  %v5084_v44 = vld [vmem:[#allocation10] ss:$16 sps:$4 sm:$0xff]  }
 0x284   :  { %1385 = vst [vmem:[#allocation3 + $0x10] sm:$0x1] %v1371_v17  ;;  %3952 = vrcp.f32 %v1500_v35  ;;  %v5087_v24 = vld [vmem:[#allocation10 + $0x8] ss:$16 sps:$4 sm:$0xff]   ;;  %v5093_v18 = vld [vmem:[#allocation10 + $0x2c] ss:$16 sps:$4 sm:$0xff]  }
 0x285   :  { %v1374_v19 = vcombine.high %v1370_v32, %v1370_v32  ;;  %1386 = vst [vmem:[#allocation3 + $0x18] sm:$0x1] %v1373_v22  ;;  %1389 = vst [vmem:[#allocation3 + $0x30] sm:$0x1] %v1372_v62  ;;  %v5098_v6 = vld [vmem:[#allocation10 + $0x20] ss:$16 sps:$4 sm:$0xff]  }
 0x286   :  { %v5101_v17 = vld [vmem:[#allocation10 + $0x28] ss:$16 sps:$4 sm:$0xff]   ;;  %v5104_v32 = vld [vmem:[#allocation10 + $0x44] ss:$16 sps:$4 sm:$0xff]   ;;  %v5107_v62 = vld [vmem:[#allocation10 + $0x4c] ss:$16 sps:$4 sm:$0xff]  }
 0x287   :  { %1390 = vst [vmem:[#allocation3 + $0x38] sm:$0x1] %v1374_v19  ;;  %v5110_v22 = vld [vmem:[#allocation10 + $0x40] ss:$16 sps:$4 sm:$0xff]   ;;  %v5113_v19 = vld [vmem:[#allocation10 + $0x48] ss:$16 sps:$4 sm:$0xff]  }
 0x288   :  { %v5119_v27 = vld [vmem:[#allocation10 + $0x6c] ss:$16 sps:$4 sm:$0xff]  }
 0x289   :  { %v5131_v35 = vld [vmem:[#allocation10 + $0x8c] ss:$16 sps:$4 sm:$0xff]  }
 0x28a   :  { %v3949_v28 = vpop.eup %3948  ;;  %6722 = vst [vmem:[#allocation23_spill] sm:$0xff] %v5131_v35 }
 0x28b   :  { %v3951_v33 = vpop.eup %3950  ;;  %v1504_v23 = vmul.f32 %v3949_v28, %v3945_v53  ;;  %v5116_v53 = vld [vmem:[#allocation10 + $0x64] ss:$16 sps:$4 sm:$0xff]   ;;  %v5122_v28 = vld [vmem:[#allocation10 + $0x60] ss:$16 sps:$4 sm:$0xff]  }
 0x28c   :  { %v1503_v34 = vmul.f32 %v3951_v33, %v4932_v16  ;;  %v5090_v16 = vld [vmem:[#allocation10 + $0x24] ss:$16 sps:$4 sm:$0xff]   ;;  %v5125_v33 = vld [vmem:[#allocation10 + $0x68] ss:$16 sps:$4 sm:$0xff]  }
 0x28e   :  { %v5077_v0 = vadd.f32 %v1504_v23, %v1503_v34  ;;  %v3953_v21 = vpop.eup %3952  ;;  %v5128_v23 = vld [vmem:[#allocation10 + $0x84] ss:$16 sps:$4 sm:$0xff]   ;;  %v5134_v34 = vld [vmem:[#allocation10 + $0x80] ss:$16 sps:$4 sm:$0xff]  }
 0x28f   :  { %6721 = vst [vmem:[#allocation22_spill] sm:$0xff] %v5128_v23  ;;  %6723 = vst [vmem:[#allocation24_spill] sm:$0xff] %v5134_v34 }
 0x290   :  { %3954 = vtanh.f32 %v5077_v0 }
 0x29a   :  { %v3955_v31 = vpop.eup %3954 }
 0x29b   :  { %v1507_v26 = vmul.f32 %v3955_v31, %v3953_v21  ;;  %v5137_v21 = vld [vmem:[#allocation10 + $0x88] ss:$16 sps:$4 sm:$0xff]   ;;  %v5140_v31 = vld [vmem:[#allocation10 + $0xa4] ss:$16 sps:$4 sm:$0xff]  }
 0x29c   :  { %6724 = vst [vmem:[#allocation25_spill] sm:$0xff] %v5137_v21  ;;  %6725 = vst [vmem:[#allocation26_spill] sm:$0xff] %v5140_v31 }
 0x29d   :  { %v5080_v25 = vpack.c.bf16 %v1507_v26, %v1507_v26  ;;  %v5143_v26 = vld [vmem:[#allocation10 + $0xac] ss:$16 sps:$4 sm:$0xff]  }
 0x29e   :  { %6726 = vst [vmem:[#allocation27_spill] sm:$0xff] %v5143_v26 }
 0x29f   :  { %1543 = vmatmul.mubr.bf16.vlgmr.msra.gmra.mrb[28].mxu0 %v5080_v25  ;;  %1584 = vmatmul.mubr.bf16.vlgmr.msra.gmra.mrb[28].mxu1 %v5080_v25 }
 0x2a0   :  { %1690 = vmatpush1.bf16.msra.mxu0 %v5084_v44  ;;  %1731 = vmatpush1.bf16.msra.mxu1 %v5087_v24 }
 0x2a1   :  { %1691 = vmatprep.subr.bf16.mxu0 %v5090_v16  ;;  %1732 = vmatprep.subr.bf16.mxu1 %v5093_v18 }
 0x2a2   :  { %1721 = vmatprep.mubr.bf16.mxu0 %v6649_v20  ;;  %1762 = vmatprep.mubr.bf16.mxu1 %v6649_v20 }
 0x2a4   :  { %1692 = vmatpush1.bf16.msra.mxu0 %v5098_v6  ;;  %1733 = vmatpush1.bf16.msra.mxu1 %v5101_v17 }
 0x2a5   :  { %1693 = vmatprep.subr.bf16.mxu0 %v5104_v32  ;;  %1734 = vmatprep.subr.bf16.mxu1 %v5107_v62 }
 0x2a8   :  { %1694 = vmatpush1.bf16.msra.mxu0 %v5110_v22  ;;  %1735 = vmatpush1.bf16.msra.mxu1 %v5113_v19 }
 0x2a9   :  { %1695 = vmatprep.subr.bf16.mxu0 %v5116_v53  ;;  %1736 = vmatprep.subr.bf16.mxu1 %v5119_v27 }
 0x2ac   :  { %1696 = vmatpush1.bf16.msra.mxu0 %v5122_v28  ;;  %1737 = vmatpush1.bf16.msra.mxu1 %v5125_v33 }
 0x2ad   :  { %1697 = vmatprep.subr.bf16.mxu0 %v5128_v23  ;;  %1738 = vmatprep.subr.bf16.mxu1 %v5131_v35  ;;  %v5146_v23 = vld [vmem:[#allocation10 + $0xa0] ss:$16 sps:$4 sm:$0xff]   ;;  %v5149_v35 = vld [vmem:[#allocation10 + $0xa8] ss:$16 sps:$4 sm:$0xff]  }
 0x2ae   :  { %6727 = vst [vmem:[#allocation28_spill] sm:$0xff] %v5146_v23  ;;  %6728 = vst [vmem:[#allocation29_spill] sm:$0xff] %v5149_v35 }
 0x2b0   :  { %1698 = vmatpush1.bf16.msra.mxu0 %v5134_v34  ;;  %1739 = vmatpush1.bf16.msra.mxu1 %v5137_v21  ;;  %v5152_v34 = vld [vmem:[#allocation10 + $0xc4] ss:$16 sps:$4 sm:$0xff]   ;;  %v5155_v21 = vld [vmem:[#allocation10 + $0xcc] ss:$16 sps:$4 sm:$0xff]  }
 0x2b1   :  { %1699 = vmatprep.subr.bf16.mxu0 %v5140_v31  ;;  %1740 = vmatprep.subr.bf16.mxu1 %v5143_v26  ;;  %6729 = vst [vmem:[#allocation30_spill] sm:$0xff] %v5152_v34  ;;  %6730 = vst [vmem:[#allocation31_spill] sm:$0xff] %v5155_v21  ;;  %v5158_v31 = vld [vmem:[#allocation10 + $0xc0] ss:$16 sps:$4 sm:$0xff]   ;;  %v5161_v26 = vld [vmem:[#allocation10 + $0xc8] ss:$16 sps:$4 sm:$0xff]  }
 0x2b4   :  { %1700 = vmatpush1.bf16.msra.mxu0 %v5146_v23  ;;  %1741 = vmatpush1.bf16.msra.mxu1 %v5149_v35  ;;  %v5164_v23 = vld [vmem:[#allocation10 + $0xe4] ss:$16 sps:$4 sm:$0xff]   ;;  %v5167_v35 = vld [vmem:[#allocation10 + $0xec] ss:$16 sps:$4 sm:$0xff]  }
 0x2b5   :  { %1701 = vmatprep.subr.bf16.mxu0 %v5152_v34  ;;  %1742 = vmatprep.subr.bf16.mxu1 %v5155_v21  ;;  %v5170_v34 = vld [vmem:[#allocation10 + $0xe0] ss:$16 sps:$4 sm:$0xff]   ;;  %v5173_v21 = vld [vmem:[#allocation10 + $0xe8] ss:$16 sps:$4 sm:$0xff]  }
 0x2b8   :  { %1702 = vmatpush1.bf16.msra.mxu0 %v5158_v31  ;;  %1743 = vmatpush1.bf16.msra.mxu1 %v5161_v26 }
 0x2b9   :  { %1703 = vmatprep.subr.bf16.mxu0 %v5164_v23  ;;  %1744 = vmatprep.subr.bf16.mxu1 %v5167_v35 }
 0x2bc   :  { %1704 = vmatpush1.bf16.msra.mxu0 %v5170_v34  ;;  %1745 = vmatpush1.bf16.msra.mxu1 %v5173_v21 }
 0x2bd   :  { %1801 = vmatprep.subr.bf16.mxu0 %v4639_v7  ;;  %1842 = vmatprep.subr.bf16.mxu1 %v4641_v8  ;;  %v6731_v7 = vld [vmem:[#allocation46_spill] sm:$0xff]  ;;  %v6732_v8 = vld [vmem:[#allocation47_spill] sm:$0xff] }
 0x2bf   :  { %1722 = vmatmul.mubr.bf16.vlgmr.msra.gmra.mrb[32].mxu0 %v5080_v25  ;;  %1763 = vmatmul.mubr.bf16.vlgmr.msra.gmra.mrb[32].mxu1 %v5080_v25  ;;  %v6759_v25 = vld [vmem:[#allocation19_spill] sm:$0xff] }
 0x2c0   :  { %1802 = vmatpush1.bf16.msra.mxu0 %v4643_v9  ;;  %1843 = vmatpush1.bf16.msra.mxu1 %v4645_v10  ;;  %v6733_v9 = vld [vmem:[#allocation48_spill] sm:$0xff]  ;;  %v6734_v10 = vld [vmem:[#allocation49_spill] sm:$0xff] }
 0x2c1   :  { %1803 = vmatprep.subr.bf16.mxu0 %v4651_v11  ;;  %1844 = vmatprep.subr.bf16.mxu1 %v4653_v12  ;;  %v6735_v11 = vld [vmem:[#allocation50_spill] sm:$0xff]  ;;  %v6736_v12 = vld [vmem:[#allocation51_spill] sm:$0xff] }
 0x2c4   :  { %1804 = vmatpush1.bf16.msra.mxu0 %v4655_v13  ;;  %1845 = vmatpush1.bf16.msra.mxu1 %v4657_v14  ;;  %v6737_v13 = vld [vmem:[#allocation52_spill] sm:$0xff]  ;;  %v6738_v14 = vld [vmem:[#allocation53_spill] sm:$0xff] }
 0x2c5   :  { %1805 = vmatprep.subr.bf16.mxu0 %v4663_v15  ;;  %1846 = vmatprep.subr.bf16.mxu1 %v6650_v36  ;;  %v6739_v15 = vld [vmem:[#allocation54_spill] sm:$0xff]  ;;  %v6740_v36 = vld [vmem:[#allocation55_spill] sm:$0xff] }
 0x2c8   :  { %1806 = vmatpush1.bf16.msra.mxu0 %v6651_v37  ;;  %1847 = vmatpush1.bf16.msra.mxu1 %v6652_v38  ;;  %v6741_v37 = vld [vmem:[#allocation56_spill] sm:$0xff]  ;;  %v6742_v38 = vld [vmem:[#allocation57_spill] sm:$0xff] }
 0x2c9   :  { %1807 = vmatprep.subr.bf16.mxu0 %v6653_v39  ;;  %1848 = vmatprep.subr.bf16.mxu1 %v6654_v40  ;;  %v6743_v39 = vld [vmem:[#allocation58_spill] sm:$0xff]  ;;  %v6744_v40 = vld [vmem:[#allocation59_spill] sm:$0xff] }
 0x2cc   :  { %1808 = vmatpush1.bf16.msra.mxu0 %v6655_v41  ;;  %1849 = vmatpush1.bf16.msra.mxu1 %v6656_v42  ;;  %v6745_v41 = vld [vmem:[#allocation60_spill] sm:$0xff]  ;;  %v6746_v42 = vld [vmem:[#allocation61_spill] sm:$0xff] }
 0x2cd   :  { %1809 = vmatprep.subr.bf16.mxu0 %v6657_v43  ;;  %1850 = vmatprep.subr.bf16.mxu1 %v6658_v45  ;;  %v6747_v43 = vld [vmem:[#allocation62_spill] sm:$0xff]  ;;  %v6748_v45 = vld [vmem:[#allocation63_spill] sm:$0xff] }
 0x2d0   :  { %1810 = vmatpush1.bf16.msra.mxu0 %v6659_v46  ;;  %1851 = vmatpush1.bf16.msra.mxu1 %v6660_v47  ;;  %v6749_v46 = vld [vmem:[#allocation64_spill] sm:$0xff]  ;;  %v6750_v47 = vld [vmem:[#allocation65_spill] sm:$0xff] }
 0x2d1   :  { %1811 = vmatprep.subr.bf16.mxu0 %v6661_v48  ;;  %1852 = vmatprep.subr.bf16.mxu1 %v6662_v49  ;;  %v6751_v48 = vld [vmem:[#allocation66_spill] sm:$0xff]  ;;  %v6752_v49 = vld [vmem:[#allocation67_spill] sm:$0xff] }
 0x2d4   :  { %1812 = vmatpush1.bf16.msra.mxu0 %v6663_v50  ;;  %1853 = vmatpush1.bf16.msra.mxu1 %v6664_v51  ;;  %v6753_v50 = vld [vmem:[#allocation68_spill] sm:$0xff]  ;;  %v6754_v51 = vld [vmem:[#allocation69_spill] sm:$0xff] }
 0x2d5   :  { %1813 = vmatprep.subr.bf16.mxu0 %v6665_v52  ;;  %1854 = vmatprep.subr.bf16.mxu1 %v6666_v54  ;;  %v6755_v52 = vld [vmem:[#allocation15_spill] sm:$0xff]  ;;  %v6756_v54 = vld [vmem:[#allocation16_spill] sm:$0xff] }
 0x2d8   :  { %1814 = vmatpush1.bf16.msra.mxu0 %v6667_v55  ;;  %1855 = vmatpush1.bf16.msra.mxu1 %v6668_v56 }
 0x2d9   :  { %1815 = vmatprep.subr.bf16.mxu0 %v6669_v57  ;;  %1856 = vmatprep.subr.bf16.mxu1 %v6670_v58  ;;  %v6757_v57 = vld [vmem:[#allocation17_spill] sm:$0xff] }
 0x2dc   :  { %1816 = vmatpush1.bf16.msra.mxu0 %v6671_v59  ;;  %1857 = vmatpush1.bf16.msra.mxu1 %v6672_v60 }
 0x2dd   :  { %1817 = vmatprep.subr.bf16.mxu0 %v6673_v61  ;;  %1858 = vmatprep.subr.bf16.mxu1 %v6674_v63  ;;  %v6758_v61 = vld [vmem:[#allocation18_spill] sm:$0xff] }
 0x2e0   :  { %1818 = vmatpush1.bf16.msra.mxu0 %v6675_v1  ;;  %1859 = vmatpush1.bf16.msra.mxu1 %v6676_v2 }
 0x2e1   :  { %1819 = vmatprep.subr.bf16.mxu0 %v6677_v3  ;;  %1860 = vmatprep.subr.bf16.mxu1 %v6678_v4 }
 0x2e4   :  { %1820 = vmatpush1.bf16.msra.mxu0 %v6679_v5  ;;  %1861 = vmatpush1.bf16.msra.mxu1 %v6680_v30 }
 0x2e5   :  { %1821 = vmatprep.subr.bf16.mxu0 %v6731_v7  ;;  %1862 = vmatprep.subr.bf16.mxu1 %v6732_v8 }
 0x2e8   :  { %1822 = vmatpush1.bf16.msra.mxu0 %v6733_v9  ;;  %1863 = vmatpush1.bf16.msra.mxu1 %v6734_v10  ;;  %v6760_v9 = vld [vmem:[#allocation20_spill] sm:$0xff] }
 0x2e9   :  { %1823 = vmatprep.subr.bf16.mxu0 %v6735_v11  ;;  %1864 = vmatprep.subr.bf16.mxu1 %v6736_v12 }
 0x2ec   :  { %1824 = vmatpush1.bf16.msra.mxu0 %v6737_v13  ;;  %1865 = vmatpush1.bf16.msra.mxu1 %v6738_v14 }
 0x2ed   :  { %1825 = vmatprep.subr.bf16.mxu0 %v6739_v15  ;;  %1866 = vmatprep.subr.bf16.mxu1 %v6740_v36 }
 0x2f0   :  { %1826 = vmatpush1.bf16.msra.mxu0 %v6741_v37  ;;  %1867 = vmatpush1.bf16.msra.mxu1 %v6742_v38 }
 0x2f1   :  { %1827 = vmatprep.subr.bf16.mxu0 %v6743_v39  ;;  %1868 = vmatprep.subr.bf16.mxu1 %v6744_v40 }
 0x2f4   :  { %1828 = vmatpush1.bf16.msra.mxu0 %v6745_v41  ;;  %1869 = vmatpush1.bf16.msra.mxu1 %v6746_v42  ;;  %v6761_v41 = vld [vmem:[#allocation21_spill] sm:$0xff] }
 0x2f5   :  { %1829 = vmatprep.subr.bf16.mxu0 %v6747_v43  ;;  %1870 = vmatprep.subr.bf16.mxu1 %v6748_v45 }
 0x2f8   :  { %1830 = vmatpush1.bf16.msra.mxu0 %v6749_v46  ;;  %1871 = vmatpush1.bf16.msra.mxu1 %v6750_v47  ;;  %v6762_v47 = vld [vmem:[#allocation75_spill] sm:$0xff] }
 0x2f9   :  { %1831 = vmatprep.subr.bf16.mxu0 %v6751_v48  ;;  %1872 = vmatprep.subr.bf16.mxu1 %v6752_v49  ;;  %v6763_v49 = vld [vmem:[#allocation76_spill] sm:$0xff] }
 0x2fc   :  { %1832 = vmatpush1.bf16.msra.mxu0 %v6753_v50  ;;  %1873 = vmatpush1.bf16.msra.mxu1 %v6754_v51 }
 0x2fd   :  { %1980 = vmatprep.subr.bf16.mxu0 %v6755_v52  ;;  %2021 = vmatprep.subr.bf16.mxu1 %v6756_v54 }
 0x372   :  { %v1544_v55 = vpop.f32.mrb[28].mxu0  ;;  %v1585_v56 = vpop.f32.mrb[28].mxu1 }
 0x373   :  { %v1545_v58 = vadd.f32 %v1544_v55, %v6757_v57  ;;  %v1546_v59 = vpop.f32.mrb[29].mxu0  ;;  %v1587_v60 = vpop.f32.mrb[29].mxu1  ;;  %v1586_v10 = vadd.f32 %v1585_v56, %v6760_v9  ;;  %v6764_v56 = vld [vmem:[#allocation77_spill] sm:$0xff] }
 0x374   :  { %v1547_v63 = vadd.f32 %v1546_v59, %v6758_v61  ;;  %v1548_v1 = vpop.f32.mrb[30].mxu0  ;;  %v1589_v2 = vpop.f32.mrb[30].mxu1  ;;  %v1588_v7 = vadd.f32 %v1587_v60, %v6759_v25  ;;  %v6765_v59 = vld [vmem:[#allocation78_spill] sm:$0xff] }
 0x375   :  { %v3614_v3 = vmul.f32 -1.442695, %v1545_v58  ;;  %v1549_v4 = vpop.f32.mrb[31].mxu0  ;;  %v1590_v5 = vpop.f32.mrb[31].mxu1 }
 0x376   :  { %v3615_v30 = vmul.f32 -1.442695, %v1547_v63  ;;  %v3616_v8 = vmul.f32 -1.442695, %v1588_v7 }
 0x377   :  { %3956 = vpow2.f32 %v3614_v3 }
 0x378   :  { %3958 = vpow2.f32 %v3615_v30 }
 0x379   :  { %3960 = vpow2.f32 %v3616_v8 }
 0x37a   :  { %3962 = vtanh.f32 %v1586_v10 }
 0x381   :  { %v3957_v11 = vpop.eup %3956 }
 0x382   :  { %v3959_v12 = vpop.eup %3958  ;;  %v1595_v13 = vadd.f32 1.0, %v3957_v11 }
 0x383   :  { %v1601_v14 = vadd.f32 1.0, %v3959_v12  ;;  %v3961_v15 = vpop.eup %3960 }
 0x384   :  { %3964 = vrcp.f32 %v1595_v13  ;;  %v3963_v36 = vpop.eup %3962  ;;  %v1608_v40 = vadd.f32 1.0, %v3961_v15 }
 0x385   :  { %3966 = vrcp.f32 %v1601_v14 }
 0x386   :  { %3968 = vrcp.f32 %v1608_v40 }
 0x38e   :  { %v3965_v37 = vpop.eup %3964 }
 0x38f   :  { %v3967_v38 = vpop.eup %3966  ;;  %v1612_v39 = vmul.f32 %v3965_v37, %v3963_v36 }
 0x390   :  { %v1611_v42 = vmul.f32 %v3967_v38, %v6761_v41  ;;  %v3969_v30 = vpop.eup %3968 }
 0x392   :  { %v5249_v43 = vadd.f32 %v1612_v39, %v1611_v42  ;;  %v1723_v45 = vpop.f32.mrb[32].mxu0  ;;  %v1764_v46 = vpop.f32.mrb[32].mxu1 }
 0x393   :  { %v1771_v48 = vadd.f32 %v1723_v45, %v6762_v47  ;;  %v1773_v50 = vadd.f32 %v1764_v46, %v6763_v49  ;;  %v1725_v51 = vpop.f32.mrb[33].mxu0  ;;  %v1766_v55 = vpop.f32.mrb[33].mxu1 }
 0x394   :  { %v1772_v58 = vadd.f32 %v1725_v51, %v6764_v56  ;;  %v1774_v60 = vadd.f32 %v1766_v55, %v6765_v59  ;;  %v1727_v63 = vpop.f32.mrb[34].mxu0  ;;  %v1768_v1 = vpop.f32.mrb[34].mxu1  ;;  %3970 = vtanh.f32 %v5249_v43 }
 0x395   :  { %v3621_v2 = vmul.f32 -1.442695, %v1771_v48  ;;  %v1728_v3 = vpop.f32.mrb[35].mxu0  ;;  %v1769_v4 = vpop.f32.mrb[35].mxu1 }
 0x396   :  { %v3622_v5 = vmul.f32 -1.442695, %v1772_v58  ;;  %v3623_v8 = vmul.f32 -1.442695, %v1774_v60 }
 0x397   :  { %3972 = vpow2.f32 %v3621_v2 }
 0x398   :  { %3974 = vpow2.f32 %v3622_v5 }
 0x399   :  { %3976 = vtanh.f32 %v1773_v50 }
 0x39a   :  { %3978 = vpow2.f32 %v3623_v8  ;;  %v6769_v8 = vld [vmem:[#allocation25_spill] sm:$0xff] }
 0x39e   :  { %v3971_v7 = vpop.eup %3970 }
 0x39f   :  { %v1615_v10 = vmul.f32 %v3971_v7, %v3969_v30  ;;  %v6767_v30 = vld [vmem:[#allocation23_spill] sm:$0xff]  ;;  %v6768_v7 = vld [vmem:[#allocation24_spill] sm:$0xff] }
 0x3a1   :  { %v3973_v11 = vpop.eup %3972  ;;  %v1617_v12 = vcombine.high %v1615_v10, %v1615_v10  ;;  %v1624_v13 = vrot.slane %v1615_v10, %v5068_v29  ;;  %v1800_v14 = vpack.c.bf16 %v1615_v10, %v1615_v10  ;;  %v6770_v10 = vld [vmem:[#allocation26_spill] sm:$0xff] }
 0x3a2   :  { %v3975_v15 = vpop.eup %3974  ;;  %v1778_v36 = vadd.f32 1.0, %v3973_v11  ;;  %v6771_v11 = vld [vmem:[#allocation27_spill] sm:$0xff] }
 0x3a3   :  { %v1784_v37 = vadd.f32 1.0, %v3975_v15  ;;  %v1631_v38 = vrot.slane %v1617_v12, %v5068_v29  ;;  %v1632_v39 = vcombine.high %v1624_v13, %v1624_v13  ;;  %v1640_v40 = vrot.slane %v1624_v13, %v5068_v29  ;;  %3617 = vst.sshfl [vmem:[#allocation3 + $0x1] sm:$0x1 pattern:$0x73625140] %v1624_v13  ;;  %1833 = vmatprep.mubr.bf16.mxu0 %v1800_v14  ;;  %v3977_v51 = vpop.eup %3976  ;;  %v6772_v12 = vld [vmem:[#allocation28_spill] sm:$0xff] }
 0x3a4   :  { %1874 = vmatprep.mubr.bf16.mxu1 %v1800_v14  ;;  %3980 = vrcp.f32 %v1778_v36  ;;  %v3979_v55 = vpop.eup %3978  ;;  %v6773_v13 = vld [vmem:[#allocation29_spill] sm:$0xff]  ;;  %v6774_v14 = vld [vmem:[#allocation30_spill] sm:$0xff]  ;;  %v6775_v15 = vld [vmem:[#allocation31_spill] sm:$0xff] }
 0x3a5   :  { %3982 = vrcp.f32 %v1784_v37  ;;  %v1633_v41 = vcombine.high %v1631_v38, %v1631_v38  ;;  %v1647_v42 = vrot.slane %v1631_v38, %v5068_v29  ;;  %v1654_v45 = vrot.slane %v1632_v39, %v5068_v29  ;;  %3618 = vst.sshfl [vmem:[#allocation3 + $0x9] sm:$0x1 pattern:$0x73625140] %v1632_v39  ;;  %v5298_v36 = vld [vmem:[#allocation12 + $0x4] ss:$16 sps:$4 sm:$0xff]  }
 0x3a6   :  { %3619 = vst.sshfl [vmem:[#allocation3 + $0x21] sm:$0x1 pattern:$0x73625140] %v1631_v38  ;;  %v1662_v46 = vcombine.high %v1640_v40, %v1640_v40  ;;  %v1791_v60 = vadd.f32 1.0, %v3979_v55 }
 0x3a7   :  { %v1661_v47 = vrot.slane %v1633_v41, %v5068_v29  ;;  %v1663_v48 = vcombine.high %v1647_v42, %v1647_v42  ;;  %v1664_v49 = vcombine.high %v1654_v45, %v1654_v45  ;;  %3620 = vst.sshfl [vmem:[#allocation3 + $0x29] sm:$0x1 pattern:$0x73625140] %v1633_v41  ;;  %v5301_v37 = vld [vmem:[#allocation12 + $0xc] ss:$16 sps:$4 sm:$0xff]  }
 0x3a8   :  { %1676 = vst [vmem:[#allocation3 + $0x11] sm:$0x1] %v1662_v46  ;;  %3984 = vrcp.f32 %v1791_v60  ;;  %v5304_v38 = vld [vmem:[#allocation12] ss:$16 sps:$4 sm:$0xff]   ;;  %v5307_v39 = vld [vmem:[#allocation12 + $0x8] ss:$16 sps:$4 sm:$0xff]  }
 0x3a9   :  { %v1665_v50 = vcombine.high %v1661_v47, %v1661_v47  ;;  %1677 = vst [vmem:[#allocation3 + $0x19] sm:$0x1] %v1664_v49  ;;  %1680 = vst [vmem:[#allocation3 + $0x31] sm:$0x1] %v1663_v48  ;;  %v5310_v40 = vld [vmem:[#allocation12 + $0x24] ss:$16 sps:$4 sm:$0xff]  }
 0x3aa   :  { %v5313_v41 = vld [vmem:[#allocation12 + $0x2c] ss:$16 sps:$4 sm:$0xff]   ;;  %v5316_v42 = vld [vmem:[#allocation12 + $0x20] ss:$16 sps:$4 sm:$0xff]   ;;  %v5319_v45 = vld [vmem:[#allocation12 + $0x28] ss:$16 sps:$4 sm:$0xff]  }
 0x3ab   :  { %1681 = vst [vmem:[#allocation3 + $0x39] sm:$0x1] %v1665_v50  ;;  %v5322_v46 = vld [vmem:[#allocation12 + $0x44] ss:$16 sps:$4 sm:$0xff]   ;;  %v5325_v47 = vld [vmem:[#allocation12 + $0x4c] ss:$16 sps:$4 sm:$0xff]  }
 0x3ac   :  { %6776 = vst [vmem:[#allocation32_spill] sm:$0xff] %v5325_v47  ;;  %v5328_v48 = vld [vmem:[#allocation12 + $0x40] ss:$16 sps:$4 sm:$0xff]   ;;  %v5331_v49 = vld [vmem:[#allocation12 + $0x48] ss:$16 sps:$4 sm:$0xff]  }
 0x3ad   :  { %6777 = vst [vmem:[#allocation33_spill] sm:$0xff] %v5328_v48  ;;  %6778 = vst [vmem:[#allocation34_spill] sm:$0xff] %v5331_v49  ;;  %v5334_v50 = vld [vmem:[#allocation12 + $0x64] ss:$16 sps:$4 sm:$0xff]   ;;  %v5340_v55 = vld [vmem:[#allocation12 + $0x60] ss:$16 sps:$4 sm:$0xff]  }
 0x3ae   :  { %v3981_v56 = vpop.eup %3980  ;;  %6779 = vst [vmem:[#allocation35_spill] sm:$0xff] %v5334_v50  ;;  %6781 = vst [vmem:[#allocation37_spill] sm:$0xff] %v5340_v55  ;;  %v5352_v60 = vld [vmem:[#allocation12 + $0x80] ss:$16 sps:$4 sm:$0xff]  }
 0x3af   :  { %v3983_v58 = vpop.eup %3982  ;;  %v1795_v59 = vmul.f32 %v3981_v56, %v3977_v51  ;;  %v5337_v51 = vld [vmem:[#allocation12 + $0x6c] ss:$16 sps:$4 sm:$0xff]   ;;  %v5343_v56 = vld [vmem:[#allocation12 + $0x68] ss:$16 sps:$4 sm:$0xff]   ;;  %6785 = vst [vmem:[#allocation41_spill] sm:$0xff] %v5352_v60 }
 0x3b0   :  { %v1794_v63 = vmul.f32 %v3983_v58, %v5077_v0  ;;  %v6766_v0 = vld [vmem:[#allocation22_spill] sm:$0xff]  ;;  %6780 = vst [vmem:[#allocation36_spill] sm:$0xff] %v5337_v51  ;;  %6782 = vst [vmem:[#allocation38_spill] sm:$0xff] %v5343_v56  ;;  %v5346_v58 = vld [vmem:[#allocation12 + $0x84] ss:$16 sps:$4 sm:$0xff]  }
 0x3b1   :  { %6783 = vst [vmem:[#allocation39_spill] sm:$0xff] %v5346_v58 }
 0x3b2   :  { %v5263_v1 = vadd.f32 %v1795_v59, %v1794_v63  ;;  %v3985_v2 = vpop.eup %3984  ;;  %v5349_v59 = vld [vmem:[#allocation12 + $0x8c] ss:$16 sps:$4 sm:$0xff]   ;;  %v5355_v63 = vld [vmem:[#allocation12 + $0x88] ss:$16 sps:$4 sm:$0xff]  }
 0x3b3   :  { %6784 = vst [vmem:[#allocation40_spill] sm:$0xff] %v5349_v59  ;;  %6786 = vst [vmem:[#allocation42_spill] sm:$0xff] %v5355_v63 }
 0x3b4   :  { %3986 = vtanh.f32 %v5263_v1 }
 0x3be   :  { %v3987_v3 = vpop.eup %3986 }
 0x3bf   :  { %v1798_v4 = vmul.f32 %v3987_v3, %v3985_v2  ;;  %v5358_v2 = vld [vmem:[#allocation12 + $0xa4] ss:$16 sps:$4 sm:$0xff]   ;;  %v5361_v3 = vld [vmem:[#allocation12 + $0xac] ss:$16 sps:$4 sm:$0xff]  }
 0x3c0   :  { %6787 = vst [vmem:[#allocation43_spill] sm:$0xff] %v5358_v2  ;;  %6788 = vst [vmem:[#allocation44_spill] sm:$0xff] %v5361_v3 }
 0x3c1   :  { %v1799_v5 = vpack.c.bf16 %v1798_v4, %v1798_v4  ;;  %v5364_v4 = vld [vmem:[#allocation12 + $0xa0] ss:$16 sps:$4 sm:$0xff]  }
 0x3c2   :  { %6789 = vst [vmem:[#allocation45_spill] sm:$0xff] %v5364_v4 }
 0x3c3   :  { %1834 = vmatmul.mubr.bf16.vlgmr.msra.gmra.mrb[36].mxu0 %v1799_v5  ;;  %1875 = vmatmul.mubr.bf16.vlgmr.msra.gmra.mrb[36].mxu1 %v1799_v5 }
 0x3c4   :  { %1981 = vmatpush1.bf16.msra.mxu0 %v5084_v44  ;;  %2022 = vmatpush1.bf16.msra.mxu1 %v5087_v24 }
 0x3c5   :  { %1982 = vmatprep.subr.bf16.mxu0 %v5090_v16  ;;  %2023 = vmatprep.subr.bf16.mxu1 %v5093_v18 }
 0x3c6   :  { %2012 = vmatprep.mubr.bf16.mxu0 %v6649_v20  ;;  %2053 = vmatprep.mubr.bf16.mxu1 %v6649_v20 }
 0x3c8   :  { %1983 = vmatpush1.bf16.msra.mxu0 %v5098_v6  ;;  %2024 = vmatpush1.bf16.msra.mxu1 %v5101_v17 }
 0x3c9   :  { %1984 = vmatprep.subr.bf16.mxu0 %v5104_v32  ;;  %2025 = vmatprep.subr.bf16.mxu1 %v5107_v62 }
 0x3cc   :  { %1985 = vmatpush1.bf16.msra.mxu0 %v5110_v22  ;;  %2026 = vmatpush1.bf16.msra.mxu1 %v5113_v19 }
 0x3cd   :  { %1986 = vmatprep.subr.bf16.mxu0 %v5116_v53  ;;  %2027 = vmatprep.subr.bf16.mxu1 %v5119_v27 }
 0x3d0   :  { %1987 = vmatpush1.bf16.msra.mxu0 %v5122_v28  ;;  %2028 = vmatpush1.bf16.msra.mxu1 %v5125_v33 }
 0x3d1   :  { %1988 = vmatprep.subr.bf16.mxu0 %v6766_v0  ;;  %2029 = vmatprep.subr.bf16.mxu1 %v6767_v30 }
 0x3d4   :  { %1989 = vmatpush1.bf16.msra.mxu0 %v6768_v7  ;;  %2030 = vmatpush1.bf16.msra.mxu1 %v6769_v8 }
 0x3d5   :  { %1990 = vmatprep.subr.bf16.mxu0 %v6770_v10  ;;  %2031 = vmatprep.subr.bf16.mxu1 %v6771_v11 }
 0x3d8   :  { %1991 = vmatpush1.bf16.msra.mxu0 %v6772_v12  ;;  %2032 = vmatpush1.bf16.msra.mxu1 %v6773_v13 }
 0x3d9   :  { %1992 = vmatprep.subr.bf16.mxu0 %v6774_v14  ;;  %2033 = vmatprep.subr.bf16.mxu1 %v6775_v15 }
 0x3dc   :  { %1993 = vmatpush1.bf16.msra.mxu0 %v5158_v31  ;;  %2034 = vmatpush1.bf16.msra.mxu1 %v5161_v26 }
 0x3dd   :  { %1994 = vmatprep.subr.bf16.mxu0 %v5164_v23  ;;  %2035 = vmatprep.subr.bf16.mxu1 %v5167_v35 }
 0x3e0   :  { %1995 = vmatpush1.bf16.msra.mxu0 %v5170_v34  ;;  %2036 = vmatpush1.bf16.msra.mxu1 %v5173_v21 }
 0x3e1   :  { %2092 = vmatprep.subr.bf16.mxu0 %v5298_v36  ;;  %2133 = vmatprep.subr.bf16.mxu1 %v5301_v37 }
 0x3e3   :  { %2013 = vmatmul.mubr.bf16.vlgmr.msra.gmra.mrb[40].mxu0 %v1799_v5  ;;  %2054 = vmatmul.mubr.bf16.vlgmr.msra.gmra.mrb[40].mxu1 %v1799_v5  ;;  %v5367_v5 = vld [vmem:[#allocation12 + $0xa8] ss:$16 sps:$4 sm:$0xff]  }
 0x3e4   :  { %2093 = vmatpush1.bf16.msra.mxu0 %v5304_v38  ;;  %2134 = vmatpush1.bf16.msra.mxu1 %v5307_v39  ;;  %6790 = vst [vmem:[#allocation70_spill] sm:$0xff] %v5367_v5 }
 0x3e5   :  { %2094 = vmatprep.subr.bf16.mxu0 %v5310_v40  ;;  %2135 = vmatprep.subr.bf16.mxu1 %v5313_v41 }
 0x3e8   :  { %2095 = vmatpush1.bf16.msra.mxu0 %v5316_v42  ;;  %2136 = vmatpush1.bf16.msra.mxu1 %v5319_v45 }
 0x3e9   :  { %2096 = vmatprep.subr.bf16.mxu0 %v5322_v46  ;;  %2137 = vmatprep.subr.bf16.mxu1 %v5325_v47 }
 0x3ec   :  { %2097 = vmatpush1.bf16.msra.mxu0 %v5328_v48  ;;  %2138 = vmatpush1.bf16.msra.mxu1 %v5331_v49 }
 0x3ed   :  { %2098 = vmatprep.subr.bf16.mxu0 %v5334_v50  ;;  %2139 = vmatprep.subr.bf16.mxu1 %v5337_v51 }
 0x3f0   :  { %2099 = vmatpush1.bf16.msra.mxu0 %v5340_v55  ;;  %2140 = vmatpush1.bf16.msra.mxu1 %v5343_v56 }
 0x3f1   :  { %2100 = vmatprep.subr.bf16.mxu0 %v5346_v58  ;;  %2141 = vmatprep.subr.bf16.mxu1 %v5349_v59 }
 0x3f4   :  { %2101 = vmatpush1.bf16.msra.mxu0 %v5352_v60  ;;  %2142 = vmatpush1.bf16.msra.mxu1 %v5355_v63  ;;  %v5370_v60 = vld [vmem:[#allocation12 + $0xc4] ss:$16 sps:$4 sm:$0xff]   ;;  %v5373_v63 = vld [vmem:[#allocation12 + $0xcc] ss:$16 sps:$4 sm:$0xff]  }
 0x3f5   :  { %2102 = vmatprep.subr.bf16.mxu0 %v5358_v2  ;;  %2143 = vmatprep.subr.bf16.mxu1 %v5361_v3  ;;  %6791 = vst [vmem:[#allocation71_spill] sm:$0xff] %v5370_v60  ;;  %6792 = vst [vmem:[#allocation72_spill] sm:$0xff] %v5373_v63  ;;  %v5376_v2 = vld [vmem:[#allocation12 + $0xc0] ss:$16 sps:$4 sm:$0xff]   ;;  %v5379_v3 = vld [vmem:[#allocation12 + $0xc8] ss:$16 sps:$4 sm:$0xff]  }
 0x3f6   :  { %6793 = vst [vmem:[#allocation73_spill] sm:$0xff] %v5376_v2  ;;  %6794 = vst [vmem:[#allocation74_spill] sm:$0xff] %v5379_v3 }
 0x3f8   :  { %2103 = vmatpush1.bf16.msra.mxu0 %v5364_v4  ;;  %2144 = vmatpush1.bf16.msra.mxu1 %v5367_v5  ;;  %v5382_v4 = vld [vmem:[#allocation12 + $0xe4] ss:$16 sps:$4 sm:$0xff]   ;;  %v5385_v5 = vld [vmem:[#allocation12 + $0xec] ss:$16 sps:$4 sm:$0xff]  }
 0x3f9   :  { %2104 = vmatprep.subr.bf16.mxu0 %v5370_v60  ;;  %2145 = vmatprep.subr.bf16.mxu1 %v5373_v63  ;;  %6795 = vst [vmem:[#allocation46_spill] sm:$0xff] %v5382_v4  ;;  %6796 = vst [vmem:[#allocation47_spill] sm:$0xff] %v5385_v5  ;;  %v5388_v60 = vld [vmem:[#allocation12 + $0xe0] ss:$16 sps:$4 sm:$0xff]   ;;  %v5391_v63 = vld [vmem:[#allocation12 + $0xe8] ss:$16 sps:$4 sm:$0xff]  }
 0x3fa   :  { %6797 = vst [vmem:[#allocation48_spill] sm:$0xff] %v5388_v60  ;;  %6798 = vst [vmem:[#allocation49_spill] sm:$0xff] %v5391_v63 }
 0x3fc   :  { %2105 = vmatpush1.bf16.msra.mxu0 %v5376_v2  ;;  %2146 = vmatpush1.bf16.msra.mxu1 %v5379_v3  ;;  %v5394_v2 = vld [vmem:[#allocation12 + $0x104] ss:$16 sps:$4 sm:$0xff]   ;;  %v5397_v3 = vld [vmem:[#allocation12 + $0x10c] ss:$16 sps:$4 sm:$0xff]  }
 0x3fd   :  { %2106 = vmatprep.subr.bf16.mxu0 %v5382_v4  ;;  %2147 = vmatprep.subr.bf16.mxu1 %v5385_v5  ;;  %6799 = vst [vmem:[#allocation50_spill] sm:$0xff] %v5394_v2  ;;  %6800 = vst [vmem:[#allocation51_spill] sm:$0xff] %v5397_v3  ;;  %v5400_v4 = vld [vmem:[#allocation12 + $0x100] ss:$16 sps:$4 sm:$0xff]   ;;  %v5403_v5 = vld [vmem:[#allocation12 + $0x108] ss:$16 sps:$4 sm:$0xff]  }
 0x3fe   :  { %6801 = vst [vmem:[#allocation52_spill] sm:$0xff] %v5400_v4  ;;  %6802 = vst [vmem:[#allocation53_spill] sm:$0xff] %v5403_v5 }
 0x400   :  { %2107 = vmatpush1.bf16.msra.mxu0 %v5388_v60  ;;  %2148 = vmatpush1.bf16.msra.mxu1 %v5391_v63  ;;  %v5406_v60 = vld [vmem:[#allocation12 + $0x124] ss:$16 sps:$4 sm:$0xff]   ;;  %v5409_v63 = vld [vmem:[#allocation12 + $0x12c] ss:$16 sps:$4 sm:$0xff]  }
 0x401   :  { %2108 = vmatprep.subr.bf16.mxu0 %v5394_v2  ;;  %2149 = vmatprep.subr.bf16.mxu1 %v5397_v3  ;;  %6803 = vst [vmem:[#allocation54_spill] sm:$0xff] %v5406_v60  ;;  %6804 = vst [vmem:[#allocation55_spill] sm:$0xff] %v5409_v63  ;;  %v5412_v2 = vld [vmem:[#allocation12 + $0x120] ss:$16 sps:$4 sm:$0xff]   ;;  %v5415_v3 = vld [vmem:[#allocation12 + $0x128] ss:$16 sps:$4 sm:$0xff]  }
 0x402   :  { %6805 = vst [vmem:[#allocation56_spill] sm:$0xff] %v5412_v2  ;;  %6806 = vst [vmem:[#allocation57_spill] sm:$0xff] %v5415_v3 }
 0x404   :  { %2109 = vmatpush1.bf16.msra.mxu0 %v5400_v4  ;;  %2150 = vmatpush1.bf16.msra.mxu1 %v5403_v5  ;;  %v5418_v4 = vld [vmem:[#allocation12 + $0x144] ss:$16 sps:$4 sm:$0xff]   ;;  %v5421_v5 = vld [vmem:[#allocation12 + $0x14c] ss:$16 sps:$4 sm:$0xff]  }
 0x405   :  { %2110 = vmatprep.subr.bf16.mxu0 %v5406_v60  ;;  %2151 = vmatprep.subr.bf16.mxu1 %v5409_v63  ;;  %6807 = vst [vmem:[#allocation58_spill] sm:$0xff] %v5418_v4  ;;  %6808 = vst [vmem:[#allocation59_spill] sm:$0xff] %v5421_v5  ;;  %v5424_v60 = vld [vmem:[#allocation12 + $0x140] ss:$16 sps:$4 sm:$0xff]   ;;  %v5427_v63 = vld [vmem:[#allocation12 + $0x148] ss:$16 sps:$4 sm:$0xff]  }
 0x406   :  { %6809 = vst [vmem:[#allocation60_spill] sm:$0xff] %v5424_v60  ;;  %6810 = vst [vmem:[#allocation61_spill] sm:$0xff] %v5427_v63 }
 0x408   :  { %2111 = vmatpush1.bf16.msra.mxu0 %v5412_v2  ;;  %2152 = vmatpush1.bf16.msra.mxu1 %v5415_v3  ;;  %v5430_v2 = vld [vmem:[#allocation12 + $0x164] ss:$16 sps:$4 sm:$0xff]   ;;  %v5433_v3 = vld [vmem:[#allocation12 + $0x16c] ss:$16 sps:$4 sm:$0xff]  }
 0x409   :  { %2112 = vmatprep.subr.bf16.mxu0 %v5418_v4  ;;  %2153 = vmatprep.subr.bf16.mxu1 %v5421_v5  ;;  %6811 = vst [vmem:[#allocation62_spill] sm:$0xff] %v5430_v2  ;;  %6812 = vst [vmem:[#allocation63_spill] sm:$0xff] %v5433_v3  ;;  %v5436_v4 = vld [vmem:[#allocation12 + $0x160] ss:$16 sps:$4 sm:$0xff]   ;;  %v5439_v5 = vld [vmem:[#allocation12 + $0x168] ss:$16 sps:$4 sm:$0xff]  }
 0x40a   :  { %6813 = vst [vmem:[#allocation64_spill] sm:$0xff] %v5436_v4  ;;  %6814 = vst [vmem:[#allocation65_spill] sm:$0xff] %v5439_v5 }
 0x40c   :  { %2113 = vmatpush1.bf16.msra.mxu0 %v5424_v60  ;;  %2154 = vmatpush1.bf16.msra.mxu1 %v5427_v63  ;;  %v5442_v60 = vld [vmem:[#allocation12 + $0x184] ss:$16 sps:$4 sm:$0xff]   ;;  %v5445_v63 = vld [vmem:[#allocation12 + $0x18c] ss:$16 sps:$4 sm:$0xff]  }
 0x40d   :  { %2114 = vmatprep.subr.bf16.mxu0 %v5430_v2  ;;  %2155 = vmatprep.subr.bf16.mxu1 %v5433_v3  ;;  %6815 = vst [vmem:[#allocation66_spill] sm:$0xff] %v5442_v60  ;;  %6816 = vst [vmem:[#allocation67_spill] sm:$0xff] %v5445_v63  ;;  %v5448_v2 = vld [vmem:[#allocation12 + $0x180] ss:$16 sps:$4 sm:$0xff]   ;;  %v5451_v3 = vld [vmem:[#allocation12 + $0x188] ss:$16 sps:$4 sm:$0xff]  }
 0x40e   :  { %6817 = vst [vmem:[#allocation68_spill] sm:$0xff] %v5448_v2  ;;  %6818 = vst [vmem:[#allocation69_spill] sm:$0xff] %v5451_v3 }
 0x410   :  { %2115 = vmatpush1.bf16.msra.mxu0 %v5436_v4  ;;  %2156 = vmatpush1.bf16.msra.mxu1 %v5439_v5  ;;  %v5454_v4 = vld [vmem:[#allocation12 + $0x1a4] ss:$16 sps:$4 sm:$0xff]   ;;  %v5457_v5 = vld [vmem:[#allocation12 + $0x1ac] ss:$16 sps:$4 sm:$0xff]  }
 0x411   :  { %2116 = vmatprep.subr.bf16.mxu0 %v5442_v60  ;;  %2157 = vmatprep.subr.bf16.mxu1 %v5445_v63  ;;  %6819 = vst [vmem:[#allocation15_spill] sm:$0xff] %v5454_v4  ;;  %6820 = vst [vmem:[#allocation16_spill] sm:$0xff] %v5457_v5  ;;  %v5460_v60 = vld [vmem:[#allocation12 + $0x1a0] ss:$16 sps:$4 sm:$0xff]   ;;  %v5463_v63 = vld [vmem:[#allocation12 + $0x1a8] ss:$16 sps:$4 sm:$0xff]  }
 0x412   :  { %6821 = vst [vmem:[#allocation21_spill] sm:$0xff] %v5460_v60  ;;  %6822 = vst [vmem:[#allocation75_spill] sm:$0xff] %v5463_v63 }
 0x414   :  { %2117 = vmatpush1.bf16.msra.mxu0 %v5448_v2  ;;  %2158 = vmatpush1.bf16.msra.mxu1 %v5451_v3  ;;  %v5466_v2 = vld [vmem:[#allocation12 + $0x1c4] ss:$16 sps:$4 sm:$0xff]   ;;  %v5469_v3 = vld [vmem:[#allocation12 + $0x1cc] ss:$16 sps:$4 sm:$0xff]  }
 0x415   :  { %2118 = vmatprep.subr.bf16.mxu0 %v5454_v4  ;;  %2159 = vmatprep.subr.bf16.mxu1 %v5457_v5  ;;  %6823 = vst [vmem:[#allocation76_spill] sm:$0xff] %v5466_v2  ;;  %6824 = vst [vmem:[#allocation77_spill] sm:$0xff] %v5469_v3  ;;  %v5472_v4 = vld [vmem:[#allocation12 + $0x1c0] ss:$16 sps:$4 sm:$0xff]   ;;  %v5475_v5 = vld [vmem:[#allocation12 + $0x1c8] ss:$16 sps:$4 sm:$0xff]  }
 0x416   :  { %6825 = vst [vmem:[#allocation78_spill] sm:$0xff] %v5472_v4  ;;  %6826 = vst [vmem:[#allocation22_spill] sm:$0xff] %v5475_v5 }
 0x418   :  { %2119 = vmatpush1.bf16.msra.mxu0 %v5460_v60  ;;  %2160 = vmatpush1.bf16.msra.mxu1 %v5463_v63  ;;  %v5478_v60 = vld [vmem:[#allocation12 + $0x1e4] ss:$16 sps:$4 sm:$0xff]   ;;  %v5481_v63 = vld [vmem:[#allocation12 + $0x1ec] ss:$16 sps:$4 sm:$0xff]  }
 0x419   :  { %2120 = vmatprep.subr.bf16.mxu0 %v5466_v2  ;;  %2161 = vmatprep.subr.bf16.mxu1 %v5469_v3  ;;  %6827 = vst [vmem:[#allocation23_spill] sm:$0xff] %v5478_v60  ;;  %6828 = vst [vmem:[#allocation24_spill] sm:$0xff] %v5481_v63  ;;  %v5484_v2 = vld [vmem:[#allocation12 + $0x1e0] ss:$16 sps:$4 sm:$0xff]   ;;  %v5487_v3 = vld [vmem:[#allocation12 + $0x1e8] ss:$16 sps:$4 sm:$0xff]  }
 0x41a   :  { %6829 = vst [vmem:[#allocation25_spill] sm:$0xff] %v5484_v2  ;;  %6830 = vst [vmem:[#allocation26_spill] sm:$0xff] %v5487_v3 }
 0x41c   :  { %2121 = vmatpush1.bf16.msra.mxu0 %v5472_v4  ;;  %2162 = vmatpush1.bf16.msra.mxu1 %v5475_v5 }
 0x41d   :  { %2122 = vmatprep.subr.bf16.mxu0 %v5478_v60  ;;  %2163 = vmatprep.subr.bf16.mxu1 %v5481_v63 }
 0x420   :  { %2123 = vmatpush1.bf16.msra.mxu0 %v5484_v2  ;;  %2164 = vmatpush1.bf16.msra.mxu1 %v5487_v3 }
 0x421   :  { %2271 = vmatprep.subr.bf16.mxu0 %v6755_v52  ;;  %2312 = vmatprep.subr.bf16.mxu1 %v6756_v54 }
 0x496   :  { %v1835_v5 = vpop.f32.mrb[36].mxu0  ;;  %v1876_v4 = vpop.f32.mrb[36].mxu1 }
 0x497   :  { %v1836_v60 = vadd.f32 %v1835_v5, %v6757_v57  ;;  %v1837_v59 = vpop.f32.mrb[37].mxu0  ;;  %v1878_v58 = vpop.f32.mrb[37].mxu1  ;;  %v1877_v54 = vadd.f32 %v1876_v4, %v6760_v9  ;;  %v6831_v4 = vld [vmem:[#allocation79_spill] sm:$0xff]  ;;  %v6834_v9 = vld [vmem:[#allocation82_spill] sm:$0xff] }
 0x498   :  { %v1838_v63 = vadd.f32 %v1837_v59, %v6758_v61  ;;  %v1839_v56 = vpop.f32.mrb[38].mxu0  ;;  %v1880_v55 = vpop.f32.mrb[38].mxu1  ;;  %v1879_v52 = vadd.f32 %v1878_v58, %v6759_v25 }
 0x499   :  { %v3624_v51 = vmul.f32 -1.442695, %v1836_v60  ;;  %v1840_v2 = vpop.f32.mrb[39].mxu0  ;;  %v1881_v50 = vpop.f32.mrb[39].mxu1 }
 0x49a   :  { %v3625_v49 = vmul.f32 -1.442695, %v1838_v63  ;;  %v3626_v3 = vmul.f32 -1.442695, %v1879_v52 }
 0x49b   :  { %3988 = vpow2.f32 %v3624_v51 }
 0x49c   :  { %3990 = vpow2.f32 %v3625_v49 }
 0x49d   :  { %3992 = vpow2.f32 %v3626_v3  ;;  %v6832_v3 = vld [vmem:[#allocation80_spill] sm:$0xff] }
 0x49e   :  { %3994 = vtanh.f32 %v1877_v54 }
 0x4a5   :  { %v3989_v48 = vpop.eup %3988 }
 0x4a6   :  { %v3991_v47 = vpop.eup %3990  ;;  %v1886_v5 = vadd.f32 1.0, %v3989_v48 }
 0x4a7   :  { %v1892_v57 = vadd.f32 1.0, %v3991_v47  ;;  %v3993_v55 = vpop.eup %3992 }
 0x4a8   :  { %3996 = vrcp.f32 %v1886_v5  ;;  %v3995_v56 = vpop.eup %3994  ;;  %v1899_v51 = vadd.f32 1.0, %v3993_v55 }
 0x4a9   :  { %3998 = vrcp.f32 %v1892_v57  ;;  %v6833_v57 = vld [vmem:[#allocation81_spill] sm:$0xff] }
 0x4aa   :  { %4000 = vrcp.f32 %v1899_v51 }
 0x4b2   :  { %v3997_v59 = vpop.eup %3996 }
 0x4b3   :  { %v3999_v50 = vpop.eup %3998  ;;  %v1903_v60 = vmul.f32 %v3997_v59, %v3995_v56 }
 0x4b4   :  { %v1902_v49 = vmul.f32 %v3999_v50, %v5249_v43 }
 0x4b6   :  { %v5497_v58 = vadd.f32 %v1903_v60, %v1902_v49  ;;  %v2014_v63 = vpop.f32.mrb[40].mxu0  ;;  %v2055_v2 = vpop.f32.mrb[40].mxu1 }
 0x4b7   :  { %v2062_v48 = vadd.f32 %v2014_v63, %v6831_v4  ;;  %v2064_v52 = vadd.f32 %v2055_v2, %v6832_v3  ;;  %v2016_v47 = vpop.f32.mrb[41].mxu0  ;;  %v2057_v54 = vpop.f32.mrb[41].mxu1 }
 0x4b8   :  { %v2063_v5 = vadd.f32 %v2016_v47, %v6833_v57  ;;  %v2065_v25 = vadd.f32 %v2057_v54, %v6834_v9  ;;  %v2018_v61 = vpop.f32.mrb[42].mxu0  ;;  %v2059_v56 = vpop.f32.mrb[42].mxu1  ;;  %4002 = vtanh.f32 %v5497_v58 }
 0x4b9   :  { %v3631_v43 = vmul.f32 -1.442695, %v2062_v48  ;;  %v2019_v55 = vpop.f32.mrb[43].mxu0  ;;  %v2060_v59 = vpop.f32.mrb[43].mxu1 }
 0x4ba   :  { %v3632_v50 = vmul.f32 -1.442695, %v2063_v5  ;;  %v4001_v60 = vpop.eup %4000  ;;  %v3633_v49 = vmul.f32 -1.442695, %v2065_v25 }
 0x4bb   :  { %4004 = vpow2.f32 %v3631_v43 }
 0x4bc   :  { %4006 = vpow2.f32 %v3632_v50 }
 0x4bd   :  { %4008 = vtanh.f32 %v2064_v52 }
 0x4be   :  { %4010 = vpow2.f32 %v3633_v49 }
 0x4c2   :  { %v4003_v51 = vpop.eup %4002 }
 0x4c3   :  { %v1906_v63 = vmul.f32 %v4003_v51, %v4001_v60 }
 0x4c5   :  { %v4005_v2 = vpop.eup %4004  ;;  %v1908_v4 = vcombine.high %v1906_v63, %v1906_v63  ;;  %v1915_v3 = vrot.slane %v1906_v63, %v5068_v29  ;;  %v2091_v9 = vpack.c.bf16 %v1906_v63, %v1906_v63 }
 0x4c6   :  { %v4007_v61 = vpop.eup %4006  ;;  %v2069_v47 = vadd.f32 1.0, %v4005_v2 }
 0x4c7   :  { %v2075_v54 = vadd.f32 1.0, %v4007_v61  ;;  %v1922_v48 = vrot.slane %v1908_v4, %v5068_v29  ;;  %v1923_v57 = vcombine.high %v1915_v3, %v1915_v3  ;;  %v1931_v5 = vrot.slane %v1915_v3, %v5068_v29  ;;  %3627 = vst.sshfl [vmem:[#allocation3 + $0x2] sm:$0x1 pattern:$0x73625140] %v1915_v3  ;;  %2124 = vmatprep.mubr.bf16.mxu0 %v2091_v9  ;;  %v4009_v51 = vpop.eup %4008 }
 0x4c8   :  { %2165 = vmatprep.mubr.bf16.mxu1 %v2091_v9  ;;  %4012 = vrcp.f32 %v2069_v47  ;;  %v4011_v49 = vpop.eup %4010 }
 0x4c9   :  { %4014 = vrcp.f32 %v2075_v54  ;;  %v1924_v25 = vcombine.high %v1922_v48, %v1922_v48  ;;  %v1938_v52 = vrot.slane %v1922_v48, %v5068_v29  ;;  %v1945_v56 = vrot.slane %v1923_v57, %v5068_v29  ;;  %3628 = vst.sshfl [vmem:[#allocation3 + $0xa] sm:$0x1 pattern:$0x73625140] %v1923_v57 }
 0x4ca   :  { %3629 = vst.sshfl [vmem:[#allocation3 + $0x22] sm:$0x1 pattern:$0x73625140] %v1922_v48  ;;  %v1953_v43 = vcombine.high %v1931_v5, %v1931_v5  ;;  %v2082_v3 = vadd.f32 1.0, %v4011_v49  ;;  %v6866_v5 = vld [vmem:[#allocation58_spill] sm:$0xff] }
 0x4cb   :  { %v1952_v55 = vrot.slane %v1924_v25, %v5068_v29  ;;  %v1954_v59 = vcombine.high %v1938_v52, %v1938_v52  ;;  %v1955_v50 = vcombine.high %v1945_v56, %v1945_v56  ;;  %3630 = vst.sshfl [vmem:[#allocation3 + $0x2a] sm:$0x1 pattern:$0x73625140] %v1924_v25  ;;  %v6867_v25 = vld [vmem:[#allocation59_spill] sm:$0xff]  ;;  %v6868_v52 = vld [vmem:[#allocation60_spill] sm:$0xff] }
 0x4cc   :  { %1967 = vst [vmem:[#allocation3 + $0x12] sm:$0x1] %v1953_v43  ;;  %4016 = vrcp.f32 %v2082_v3  ;;  %v6869_v56 = vld [vmem:[#allocation61_spill] sm:$0xff]  ;;  %v6870_v43 = vld [vmem:[#allocation62_spill] sm:$0xff]  ;;  %v6876_v49 = vld [vmem:[#allocation68_spill] sm:$0xff] }
 0x4cd   :  { %v1956_v60 = vcombine.high %v1952_v55, %v1952_v55  ;;  %1968 = vst [vmem:[#allocation3 + $0x1a] sm:$0x1] %v1955_v50  ;;  %1971 = vst [vmem:[#allocation3 + $0x32] sm:$0x1] %v1954_v59  ;;  %v6871_v55 = vld [vmem:[#allocation63_spill] sm:$0xff]  ;;  %v6872_v59 = vld [vmem:[#allocation64_spill] sm:$0xff] }
 0x4ce   :  { %v6873_v50 = vld [vmem:[#allocation65_spill] sm:$0xff] }
 0x4cf   :  { %1972 = vst [vmem:[#allocation3 + $0x3a] sm:$0x1] %v1956_v60  ;;  %v6874_v60 = vld [vmem:[#allocation66_spill] sm:$0xff]  ;;  %v6880_v3 = vld [vmem:[#allocation21_spill] sm:$0xff] }
 0x4d2   :  { %v4013_v63 = vpop.eup %4012 }
 0x4d3   :  { %v4015_v2 = vpop.eup %4014  ;;  %v2086_v4 = vmul.f32 %v4013_v63, %v4009_v51  ;;  %v6875_v51 = vld [vmem:[#allocation67_spill] sm:$0xff]  ;;  %v6877_v63 = vld [vmem:[#allocation69_spill] sm:$0xff] }
 0x4d4   :  { %v2085_v9 = vmul.f32 %v4015_v2, %v5263_v1  ;;  %v6855_v1 = vld [vmem:[#allocation47_spill] sm:$0xff] }
 0x4d5   :  { %v6878_v2 = vld [vmem:[#allocation15_spill] sm:$0xff] }
 0x4d6   :  { %v5511_v61 = vadd.f32 %v2086_v4, %v2085_v9  ;;  %v4017_v47 = vpop.eup %4016  ;;  %v6879_v4 = vld [vmem:[#allocation16_spill] sm:$0xff]  ;;  %v6881_v9 = vld [vmem:[#allocation75_spill] sm:$0xff] }
 0x4d8   :  { %4018 = vtanh.f32 %v5511_v61 }
 0x4e2   :  { %v4019_v54 = vpop.eup %4018 }
 0x4e3   :  { %v2089_v48 = vmul.f32 %v4019_v54, %v4017_v47  ;;  %v6882_v47 = vld [vmem:[#allocation76_spill] sm:$0xff]  ;;  %v6883_v54 = vld [vmem:[#allocation77_spill] sm:$0xff] }
 0x4e5   :  { %v2090_v57 = vpack.c.bf16 %v2089_v48, %v2089_v48  ;;  %v6884_v48 = vld [vmem:[#allocation78_spill] sm:$0xff] }
 0x4e7   :  { %2125 = vmatmul.mubr.bf16.vlgmr.msra.gmra.mrb[44].mxu0 %v2090_v57  ;;  %2166 = vmatmul.mubr.bf16.vlgmr.msra.gmra.mrb[44].mxu1 %v2090_v57 }
 0x4e8   :  { %2272 = vmatpush1.bf16.msra.mxu0 %v5084_v44  ;;  %2313 = vmatpush1.bf16.msra.mxu1 %v5087_v24  ;;  %v6835_v44 = vld [vmem:[#allocation32_spill] sm:$0xff]  ;;  %v6836_v24 = vld [vmem:[#allocation33_spill] sm:$0xff] }
 0x4e9   :  { %2273 = vmatprep.subr.bf16.mxu0 %v5090_v16  ;;  %2314 = vmatprep.subr.bf16.mxu1 %v5093_v18  ;;  %v6837_v16 = vld [vmem:[#allocation34_spill] sm:$0xff]  ;;  %v6838_v18 = vld [vmem:[#allocation35_spill] sm:$0xff] }
 0x4ea   :  { %2303 = vmatprep.mubr.bf16.mxu0 %v6649_v20  ;;  %2344 = vmatprep.mubr.bf16.mxu1 %v6649_v20 }
 0x4ec   :  { %2274 = vmatpush1.bf16.msra.mxu0 %v5098_v6  ;;  %2315 = vmatpush1.bf16.msra.mxu1 %v5101_v17  ;;  %v6839_v6 = vld [vmem:[#allocation36_spill] sm:$0xff]  ;;  %v6840_v17 = vld [vmem:[#allocation37_spill] sm:$0xff] }
 0x4ed   :  { %2275 = vmatprep.subr.bf16.mxu0 %v5104_v32  ;;  %2316 = vmatprep.subr.bf16.mxu1 %v5107_v62  ;;  %v6841_v32 = vld [vmem:[#allocation38_spill] sm:$0xff]  ;;  %v6842_v62 = vld [vmem:[#allocation39_spill] sm:$0xff] }
 0x4f0   :  { %2276 = vmatpush1.bf16.msra.mxu0 %v5110_v22  ;;  %2317 = vmatpush1.bf16.msra.mxu1 %v5113_v19  ;;  %v6843_v22 = vld [vmem:[#allocation40_spill] sm:$0xff]  ;;  %v6844_v19 = vld [vmem:[#allocation41_spill] sm:$0xff] }
 0x4f1   :  { %2277 = vmatprep.subr.bf16.mxu0 %v5116_v53  ;;  %2318 = vmatprep.subr.bf16.mxu1 %v5119_v27  ;;  %v6845_v53 = vld [vmem:[#allocation42_spill] sm:$0xff]  ;;  %v6846_v27 = vld [vmem:[#allocation43_spill] sm:$0xff] }
 0x4f4   :  { %2278 = vmatpush1.bf16.msra.mxu0 %v5122_v28  ;;  %2319 = vmatpush1.bf16.msra.mxu1 %v5125_v33  ;;  %v6847_v28 = vld [vmem:[#allocation44_spill] sm:$0xff]  ;;  %v6848_v33 = vld [vmem:[#allocation45_spill] sm:$0xff] }
 0x4f5   :  { %2279 = vmatprep.subr.bf16.mxu0 %v6766_v0  ;;  %2320 = vmatprep.subr.bf16.mxu1 %v6767_v30  ;;  %v6856_v0 = vld [vmem:[#allocation48_spill] sm:$0xff]  ;;  %v6857_v30 = vld [vmem:[#allocation49_spill] sm:$0xff] }
 0x4f8   :  { %2280 = vmatpush1.bf16.msra.mxu0 %v6768_v7  ;;  %2321 = vmatpush1.bf16.msra.mxu1 %v6769_v8  ;;  %v6858_v7 = vld [vmem:[#allocation50_spill] sm:$0xff]  ;;  %v6859_v8 = vld [vmem:[#allocation51_spill] sm:$0xff] }
 0x4f9   :  { %2281 = vmatprep.subr.bf16.mxu0 %v6770_v10  ;;  %2322 = vmatprep.subr.bf16.mxu1 %v6771_v11  ;;  %v6860_v10 = vld [vmem:[#allocation52_spill] sm:$0xff]  ;;  %v6861_v11 = vld [vmem:[#allocation53_spill] sm:$0xff] }
 0x4fc   :  { %2282 = vmatpush1.bf16.msra.mxu0 %v6772_v12  ;;  %2323 = vmatpush1.bf16.msra.mxu1 %v6773_v13  ;;  %v6862_v12 = vld [vmem:[#allocation54_spill] sm:$0xff]  ;;  %v6863_v13 = vld [vmem:[#allocation55_spill] sm:$0xff] }
 0x4fd   :  { %2283 = vmatprep.subr.bf16.mxu0 %v6774_v14  ;;  %2324 = vmatprep.subr.bf16.mxu1 %v6775_v15  ;;  %v6864_v14 = vld [vmem:[#allocation56_spill] sm:$0xff]  ;;  %v6865_v15 = vld [vmem:[#allocation57_spill] sm:$0xff] }
 0x500   :  { %2284 = vmatpush1.bf16.msra.mxu0 %v5158_v31  ;;  %2325 = vmatpush1.bf16.msra.mxu1 %v5161_v26  ;;  %v6853_v31 = vld [vmem:[#allocation74_spill] sm:$0xff] }
 0x501   :  { %2285 = vmatprep.subr.bf16.mxu0 %v5164_v23  ;;  %2326 = vmatprep.subr.bf16.mxu1 %v5167_v35  ;;  %v6849_v23 = vld [vmem:[#allocation70_spill] sm:$0xff]  ;;  %v6850_v35 = vld [vmem:[#allocation71_spill] sm:$0xff] }
 0x502   :  { %v6854_v26 = vld [vmem:[#allocation46_spill] sm:$0xff] }
 0x504   :  { %2286 = vmatpush1.bf16.msra.mxu0 %v5170_v34  ;;  %2327 = vmatpush1.bf16.msra.mxu1 %v5173_v21  ;;  %v6851_v34 = vld [vmem:[#allocation72_spill] sm:$0xff]  ;;  %v6852_v21 = vld [vmem:[#allocation73_spill] sm:$0xff] }
 0x505   :  { %2383 = vmatprep.subr.bf16.mxu0 %v5298_v36  ;;  %2424 = vmatprep.subr.bf16.mxu1 %v5301_v37 }
 0x507   :  { %2304 = vmatmul.mubr.bf16.vlgmr.msra.gmra.mrb[48].mxu0 %v2090_v57  ;;  %2345 = vmatmul.mubr.bf16.vlgmr.msra.gmra.mrb[48].mxu1 %v2090_v57  ;;  %v6885_v57 = vld [vmem:[#allocation22_spill] sm:$0xff] }
 0x508   :  { %2384 = vmatpush1.bf16.msra.mxu0 %v5304_v38  ;;  %2425 = vmatpush1.bf16.msra.mxu1 %v5307_v39 }
 0x509   :  { %2385 = vmatprep.subr.bf16.mxu0 %v5310_v40  ;;  %2426 = vmatprep.subr.bf16.mxu1 %v5313_v41 }
 0x50c   :  { %2386 = vmatpush1.bf16.msra.mxu0 %v5316_v42  ;;  %2427 = vmatpush1.bf16.msra.mxu1 %v5319_v45 }
 0x50d   :  { %2387 = vmatprep.subr.bf16.mxu0 %v5322_v46  ;;  %2428 = vmatprep.subr.bf16.mxu1 %v6835_v44 }
 0x510   :  { %2388 = vmatpush1.bf16.msra.mxu0 %v6836_v24  ;;  %2429 = vmatpush1.bf16.msra.mxu1 %v6837_v16 }
 0x511   :  { %2389 = vmatprep.subr.bf16.mxu0 %v6838_v18  ;;  %2430 = vmatprep.subr.bf16.mxu1 %v6839_v6 }
 0x514   :  { %2390 = vmatpush1.bf16.msra.mxu0 %v6840_v17  ;;  %2431 = vmatpush1.bf16.msra.mxu1 %v6841_v32 }
 0x515   :  { %2391 = vmatprep.subr.bf16.mxu0 %v6842_v62  ;;  %2432 = vmatprep.subr.bf16.mxu1 %v6843_v22 }
 0x518   :  { %2392 = vmatpush1.bf16.msra.mxu0 %v6844_v19  ;;  %2433 = vmatpush1.bf16.msra.mxu1 %v6845_v53 }
 0x519   :  { %2393 = vmatprep.subr.bf16.mxu0 %v6846_v27  ;;  %2434 = vmatprep.subr.bf16.mxu1 %v6847_v28 }
 0x51c   :  { %2394 = vmatpush1.bf16.msra.mxu0 %v6848_v33  ;;  %2435 = vmatpush1.bf16.msra.mxu1 %v6849_v23 }
 0x51d   :  { %2395 = vmatprep.subr.bf16.mxu0 %v6850_v35  ;;  %2436 = vmatprep.subr.bf16.mxu1 %v6851_v34 }
 0x520   :  { %2396 = vmatpush1.bf16.msra.mxu0 %v6852_v21  ;;  %2437 = vmatpush1.bf16.msra.mxu1 %v6853_v31 }
 0x521   :  { %2397 = vmatprep.subr.bf16.mxu0 %v6854_v26  ;;  %2438 = vmatprep.subr.bf16.mxu1 %v6855_v1 }
 0x524   :  { %2398 = vmatpush1.bf16.msra.mxu0 %v6856_v0  ;;  %2439 = vmatpush1.bf16.msra.mxu1 %v6857_v30 }
 0x525   :  { %2399 = vmatprep.subr.bf16.mxu0 %v6858_v7  ;;  %2440 = vmatprep.subr.bf16.mxu1 %v6859_v8 }
 0x528   :  { %2400 = vmatpush1.bf16.msra.mxu0 %v6860_v10  ;;  %2441 = vmatpush1.bf16.msra.mxu1 %v6861_v11 }
 0x529   :  { %2401 = vmatprep.subr.bf16.mxu0 %v6862_v12  ;;  %2442 = vmatprep.subr.bf16.mxu1 %v6863_v13 }
 0x52c   :  { %2402 = vmatpush1.bf16.msra.mxu0 %v6864_v14  ;;  %2443 = vmatpush1.bf16.msra.mxu1 %v6865_v15 }
 0x52d   :  { %2403 = vmatprep.subr.bf16.mxu0 %v6866_v5  ;;  %2444 = vmatprep.subr.bf16.mxu1 %v6867_v25 }
 0x530   :  { %2404 = vmatpush1.bf16.msra.mxu0 %v6868_v52  ;;  %2445 = vmatpush1.bf16.msra.mxu1 %v6869_v56 }
 0x531   :  { %2405 = vmatprep.subr.bf16.mxu0 %v6870_v43  ;;  %2446 = vmatprep.subr.bf16.mxu1 %v6871_v55 }
 0x534   :  { %2406 = vmatpush1.bf16.msra.mxu0 %v6872_v59  ;;  %2447 = vmatpush1.bf16.msra.mxu1 %v6873_v50 }
 0x535   :  { %2407 = vmatprep.subr.bf16.mxu0 %v6874_v60  ;;  %2448 = vmatprep.subr.bf16.mxu1 %v6875_v51  ;;  %v6886_v51 = vld [vmem:[#allocation23_spill] sm:$0xff]  ;;  %v6893_v60 = vld [vmem:[#allocation18_spill] sm:$0xff] }
 0x538   :  { %2408 = vmatpush1.bf16.msra.mxu0 %v6876_v49  ;;  %2449 = vmatpush1.bf16.msra.mxu1 %v6877_v63  ;;  %v6887_v49 = vld [vmem:[#allocation24_spill] sm:$0xff]  ;;  %v6888_v63 = vld [vmem:[#allocation25_spill] sm:$0xff] }
 0x539   :  { %2409 = vmatprep.subr.bf16.mxu0 %v6878_v2  ;;  %2450 = vmatprep.subr.bf16.mxu1 %v6879_v4  ;;  %v6889_v2 = vld [vmem:[#allocation26_spill] sm:$0xff]  ;;  %v5610_v4 = vld [vmem:[#allocation10 + $0x4] ss:$16 sps:$4 sm:$0xff]  }
 0x53a   :  { %6890 = vst [vmem:[#allocation27_spill] sm:$0xff] %v5610_v4 }
 0x53c   :  { %2410 = vmatpush1.bf16.msra.mxu0 %v6880_v3  ;;  %2451 = vmatpush1.bf16.msra.mxu1 %v6881_v9  ;;  %v5613_v9 = vld [vmem:[#allocation10 + $0xc] ss:$16 sps:$4 sm:$0xff]  }
 0x53d   :  { %2411 = vmatprep.subr.bf16.mxu0 %v6882_v47  ;;  %2452 = vmatprep.subr.bf16.mxu1 %v6883_v54  ;;  %6891 = vst [vmem:[#allocation28_spill] sm:$0xff] %v5613_v9  ;;  %v6892_v47 = vld [vmem:[#allocation17_spill] sm:$0xff] }
 0x540   :  { %2412 = vmatpush1.bf16.msra.mxu0 %v6884_v48  ;;  %2453 = vmatpush1.bf16.msra.mxu1 %v6885_v57 }
 0x541   :  { %2413 = vmatprep.subr.bf16.mxu0 %v6886_v51  ;;  %2454 = vmatprep.subr.bf16.mxu1 %v6887_v49 }
 0x544   :  { %2414 = vmatpush1.bf16.msra.mxu0 %v6888_v63  ;;  %2455 = vmatpush1.bf16.msra.mxu1 %v6889_v2 }
 0x545   :  { %2562 = vmatprep.subr.bf16.mxu0 %v5610_v4  ;;  %2603 = vmatprep.subr.bf16.mxu1 %v5613_v9  ;;  %v6894_v4 = vld [vmem:[#allocation19_spill] sm:$0xff]  ;;  %v6895_v9 = vld [vmem:[#allocation20_spill] sm:$0xff] }
 0x5ba   :  { %v2126_v54 = vpop.f32.mrb[44].mxu0  ;;  %v2167_v48 = vpop.f32.mrb[44].mxu1 }
 0x5bb   :  { %v2127_v57 = vadd.f32 %v2126_v54, %v6892_v47  ;;  %v2128_v3 = vpop.f32.mrb[45].mxu0  ;;  %v2169_v51 = vpop.f32.mrb[45].mxu1  ;;  %v2168_v25 = vadd.f32 %v2167_v48, %v6895_v9  ;;  %v6896_v48 = vld [vmem:[#allocation83_spill] sm:$0xff]  ;;  %v6899_v9 = vld [vmem:[#allocation86_spill] sm:$0xff] }
 0x5bc   :  { %v2129_v49 = vadd.f32 %v2128_v3, %v6893_v60  ;;  %v2130_v50 = vpop.f32.mrb[46].mxu0  ;;  %v2171_v63 = vpop.f32.mrb[46].mxu1  ;;  %v2170_v56 = vadd.f32 %v2169_v51, %v6894_v4 }
 0x5bd   :  { %v3634_v59 = vmul.f32 -1.442695, %v2127_v57  ;;  %v2131_v2 = vpop.f32.mrb[47].mxu0  ;;  %v2172_v55 = vpop.f32.mrb[47].mxu1 }
 0x5be   :  { %v3635_v43 = vmul.f32 -1.442695, %v2129_v49  ;;  %v3636_v52 = vmul.f32 -1.442695, %v2170_v56 }
 0x5bf   :  { %4020 = vpow2.f32 %v3634_v59 }
 0x5c0   :  { %4022 = vpow2.f32 %v3635_v43 }
 0x5c1   :  { %4024 = vpow2.f32 %v3636_v52  ;;  %v6897_v52 = vld [vmem:[#allocation84_spill] sm:$0xff] }
 0x5c2   :  { %4026 = vtanh.f32 %v2168_v25 }
 0x5c9   :  { %v4021_v5 = vpop.eup %4020 }
 0x5ca   :  { %v4023_v15 = vpop.eup %4022  ;;  %v2177_v54 = vadd.f32 1.0, %v4021_v5 }
 0x5cb   :  { %v2183_v47 = vadd.f32 1.0, %v4023_v15  ;;  %v4025_v50 = vpop.eup %4024 }
 0x5cc   :  { %4028 = vrcp.f32 %v2177_v54  ;;  %v4027_v63 = vpop.eup %4026  ;;  %v2190_v59 = vadd.f32 1.0, %v4025_v50 }
 0x5cd   :  { %4030 = vrcp.f32 %v2183_v47  ;;  %v6898_v47 = vld [vmem:[#allocation85_spill] sm:$0xff] }
 0x5ce   :  { %4032 = vrcp.f32 %v2190_v59 }
 0x5d6   :  { %v4029_v2 = vpop.eup %4028 }
 0x5d7   :  { %v4031_v55 = vpop.eup %4030  ;;  %v2194_v49 = vmul.f32 %v4029_v2, %v4027_v63 }
 0x5d8   :  { %v2193_v43 = vmul.f32 %v4031_v55, %v5497_v58 }
 0x5da   :  { %v5621_v51 = vadd.f32 %v2194_v49, %v2193_v43  ;;  %v2305_v56 = vpop.f32.mrb[48].mxu0  ;;  %v2346_v3 = vpop.f32.mrb[48].mxu1 }
 0x5db   :  { %v2353_v5 = vadd.f32 %v2305_v56, %v6896_v48  ;;  %v2355_v25 = vadd.f32 %v2346_v3, %v6897_v52  ;;  %v2307_v15 = vpop.f32.mrb[49].mxu0  ;;  %v2348_v57 = vpop.f32.mrb[49].mxu1 }
 0x5dc   :  { %v2354_v54 = vadd.f32 %v2307_v15, %v6898_v47  ;;  %v2356_v4 = vadd.f32 %v2348_v57, %v6899_v9  ;;  %v2309_v60 = vpop.f32.mrb[50].mxu0  ;;  %v2350_v63 = vpop.f32.mrb[50].mxu1  ;;  %4034 = vtanh.f32 %v5621_v51 }
 0x5dd   :  { %v3641_v58 = vmul.f32 -1.442695, %v2353_v5  ;;  %v2310_v50 = vpop.f32.mrb[51].mxu0  ;;  %v2351_v2 = vpop.f32.mrb[51].mxu1 }
 0x5de   :  { %v3642_v55 = vmul.f32 -1.442695, %v2354_v54  ;;  %v4033_v49 = vpop.eup %4032  ;;  %v3643_v43 = vmul.f32 -1.442695, %v2356_v4 }
 0x5df   :  { %4036 = vpow2.f32 %v3641_v58 }
 0x5e0   :  { %4038 = vpow2.f32 %v3642_v55 }
 0x5e1   :  { %4040 = vtanh.f32 %v2355_v25 }
 0x5e2   :  { %4042 = vpow2.f32 %v3643_v43 }
 0x5e6   :  { %v4035_v59 = vpop.eup %4034 }
 0x5e7   :  { %v2197_v56 = vmul.f32 %v4035_v59, %v4033_v49 }
 0x5e9   :  { %v4037_v3 = vpop.eup %4036  ;;  %v2199_v48 = vcombine.high %v2197_v56, %v2197_v56  ;;  %v2206_v52 = vrot.slane %v2197_v56, %v5068_v29  ;;  %v2382_v9 = vpack.c.bf16 %v2197_v56, %v2197_v56 }
 0x5ea   :  { %v4039_v60 = vpop.eup %4038  ;;  %v2360_v15 = vadd.f32 1.0, %v4037_v3 }
 0x5eb   :  { %v2366_v57 = vadd.f32 1.0, %v4039_v60  ;;  %v2213_v5 = vrot.slane %v2199_v48, %v5068_v29  ;;  %v2214_v47 = vcombine.high %v2206_v52, %v2206_v52  ;;  %v2222_v54 = vrot.slane %v2206_v52, %v5068_v29  ;;  %3637 = vst.sshfl [vmem:[#allocation3 + $0x3] sm:$0x1 pattern:$0x73625140] %v2206_v52  ;;  %2415 = vmatprep.mubr.bf16.mxu0 %v2382_v9  ;;  %v4041_v59 = vpop.eup %4040 }
 0x5ec   :  { %2456 = vmatprep.mubr.bf16.mxu1 %v2382_v9  ;;  %4044 = vrcp.f32 %v2360_v15  ;;  %v4043_v43 = vpop.eup %4042 }
 0x5ed   :  { %4046 = vrcp.f32 %v2366_v57  ;;  %v2215_v4 = vcombine.high %v2213_v5, %v2213_v5  ;;  %v2229_v25 = vrot.slane %v2213_v5, %v5068_v29  ;;  %v2236_v63 = vrot.slane %v2214_v47, %v5068_v29  ;;  %3638 = vst.sshfl [vmem:[#allocation3 + $0xb] sm:$0x1 pattern:$0x73625140] %v2214_v47 }
 0x5ee   :  { %3639 = vst.sshfl [vmem:[#allocation3 + $0x23] sm:$0x1 pattern:$0x73625140] %v2213_v5  ;;  %v2244_v58 = vcombine.high %v2222_v54, %v2222_v54  ;;  %v2373_v52 = vadd.f32 1.0, %v4043_v43 }
 0x5ef   :  { %v2243_v50 = vrot.slane %v2215_v4, %v5068_v29  ;;  %v2245_v2 = vcombine.high %v2229_v25, %v2229_v25  ;;  %v2246_v55 = vcombine.high %v2236_v63, %v2236_v63  ;;  %3640 = vst.sshfl [vmem:[#allocation3 + $0x2b] sm:$0x1 pattern:$0x73625140] %v2215_v4  ;;  %v5642_v54 = vld [vmem:[#allocation10] ss:$16 sps:$4 sm:$0xff]  }
 0x5f0   :  { %2258 = vst [vmem:[#allocation3 + $0x13] sm:$0x1] %v2244_v58  ;;  %4048 = vrcp.f32 %v2373_v52  ;;  %v5645_v4 = vld [vmem:[#allocation10 + $0x8] ss:$16 sps:$4 sm:$0xff]   ;;  %v5651_v25 = vld [vmem:[#allocation10 + $0x2c] ss:$16 sps:$4 sm:$0xff]  }
 0x5f1   :  { %v2247_v49 = vcombine.high %v2243_v50, %v2243_v50  ;;  %2259 = vst [vmem:[#allocation3 + $0x1b] sm:$0x1] %v2246_v55  ;;  %2262 = vst [vmem:[#allocation3 + $0x33] sm:$0x1] %v2245_v2  ;;  %v5656_v63 = vld [vmem:[#allocation10 + $0x20] ss:$16 sps:$4 sm:$0xff]  }
 0x5f2   :  { %v5659_v58 = vld [vmem:[#allocation10 + $0x28] ss:$16 sps:$4 sm:$0xff]   ;;  %v5662_v50 = vld [vmem:[#allocation10 + $0x44] ss:$16 sps:$4 sm:$0xff]   ;;  %v5665_v2 = vld [vmem:[#allocation10 + $0x4c] ss:$16 sps:$4 sm:$0xff]  }
 0x5f3   :  { %2263 = vst [vmem:[#allocation3 + $0x3b] sm:$0x1] %v2247_v49  ;;  %v5668_v55 = vld [vmem:[#allocation10 + $0x40] ss:$16 sps:$4 sm:$0xff]   ;;  %v5671_v49 = vld [vmem:[#allocation10 + $0x48] ss:$16 sps:$4 sm:$0xff]  }
 0x5f4   :  { %v5677_v43 = vld [vmem:[#allocation10 + $0x6c] ss:$16 sps:$4 sm:$0xff]  }
 0x5f5   :  { %v5689_v52 = vld [vmem:[#allocation10 + $0x8c] ss:$16 sps:$4 sm:$0xff]  }
 0x5f6   :  { %v4045_v56 = vpop.eup %4044  ;;  %6901 = vst [vmem:[#allocation30_spill] sm:$0xff] %v5689_v52 }
 0x5f7   :  { %v4047_v3 = vpop.eup %4046  ;;  %v2377_v48 = vmul.f32 %v4045_v56, %v4041_v59  ;;  %v5674_v59 = vld [vmem:[#allocation10 + $0x64] ss:$16 sps:$4 sm:$0xff]   ;;  %v5680_v56 = vld [vmem:[#allocation10 + $0x60] ss:$16 sps:$4 sm:$0xff]  }
 0x5f8   :  { %v2376_v9 = vmul.f32 %v4047_v3, %v5511_v61  ;;  %v5648_v61 = vld [vmem:[#allocation10 + $0x24] ss:$16 sps:$4 sm:$0xff]   ;;  %v5683_v3 = vld [vmem:[#allocation10 + $0x68] ss:$16 sps:$4 sm:$0xff]  }
 0x5fa   :  { %v5635_v60 = vadd.f32 %v2377_v48, %v2376_v9  ;;  %v4049_v15 = vpop.eup %4048  ;;  %v5686_v48 = vld [vmem:[#allocation10 + $0x84] ss:$16 sps:$4 sm:$0xff]   ;;  %v5692_v9 = vld [vmem:[#allocation10 + $0x80] ss:$16 sps:$4 sm:$0xff]  }
 0x5fb   :  { %6900 = vst [vmem:[#allocation29_spill] sm:$0xff] %v5686_v48  ;;  %6902 = vst [vmem:[#allocation31_spill] sm:$0xff] %v5692_v9 }
 0x5fc   :  { %4050 = vtanh.f32 %v5635_v60 }
 0x606   :  { %v4051_v57 = vpop.eup %4050 }
 0x607   :  { %v2380_v5 = vmul.f32 %v4051_v57, %v4049_v15  ;;  %v5695_v15 = vld [vmem:[#allocation10 + $0x88] ss:$16 sps:$4 sm:$0xff]   ;;  %v5698_v57 = vld [vmem:[#allocation10 + $0xa4] ss:$16 sps:$4 sm:$0xff]  }
 0x608   :  { %6903 = vst [vmem:[#allocation79_spill] sm:$0xff] %v5695_v15  ;;  %6904 = vst [vmem:[#allocation80_spill] sm:$0xff] %v5698_v57 }
 0x609   :  { %v5638_v47 = vpack.c.bf16 %v2380_v5, %v2380_v5  ;;  %v5701_v5 = vld [vmem:[#allocation10 + $0xac] ss:$16 sps:$4 sm:$0xff]  }
 0x60a   :  { %6905 = vst [vmem:[#allocation81_spill] sm:$0xff] %v5701_v5 }
 0x60b   :  { %2416 = vmatmul.mubr.bf16.vlgmr.msra.gmra.mrb[52].mxu0 %v5638_v47  ;;  %2457 = vmatmul.mubr.bf16.vlgmr.msra.gmra.mrb[52].mxu1 %v5638_v47 }
 0x60c   :  { %2563 = vmatpush1.bf16.msra.mxu0 %v5642_v54  ;;  %2604 = vmatpush1.bf16.msra.mxu1 %v5645_v4 }
 0x60d   :  { %2564 = vmatprep.subr.bf16.mxu0 %v5648_v61  ;;  %2605 = vmatprep.subr.bf16.mxu1 %v5651_v25 }
 0x60e   :  { %2594 = vmatprep.mubr.bf16.mxu0 %v6649_v20  ;;  %2635 = vmatprep.mubr.bf16.mxu1 %v6649_v20 }
 0x610   :  { %2565 = vmatpush1.bf16.msra.mxu0 %v5656_v63  ;;  %2606 = vmatpush1.bf16.msra.mxu1 %v5659_v58 }
 0x611   :  { %2566 = vmatprep.subr.bf16.mxu0 %v5662_v50  ;;  %2607 = vmatprep.subr.bf16.mxu1 %v5665_v2 }
 0x614   :  { %2567 = vmatpush1.bf16.msra.mxu0 %v5668_v55  ;;  %2608 = vmatpush1.bf16.msra.mxu1 %v5671_v49 }
 0x615   :  { %2568 = vmatprep.subr.bf16.mxu0 %v5674_v59  ;;  %2609 = vmatprep.subr.bf16.mxu1 %v5677_v43 }
 0x618   :  { %2569 = vmatpush1.bf16.msra.mxu0 %v5680_v56  ;;  %2610 = vmatpush1.bf16.msra.mxu1 %v5683_v3 }
 0x619   :  { %2570 = vmatprep.subr.bf16.mxu0 %v5686_v48  ;;  %2611 = vmatprep.subr.bf16.mxu1 %v5689_v52  ;;  %v5704_v48 = vld [vmem:[#allocation10 + $0xa0] ss:$16 sps:$4 sm:$0xff]   ;;  %v5707_v52 = vld [vmem:[#allocation10 + $0xa8] ss:$16 sps:$4 sm:$0xff]  }
 0x61a   :  { %6906 = vst [vmem:[#allocation82_spill] sm:$0xff] %v5704_v48  ;;  %6907 = vst [vmem:[#allocation32_spill] sm:$0xff] %v5707_v52 }
 0x61c   :  { %2571 = vmatpush1.bf16.msra.mxu0 %v5692_v9  ;;  %2612 = vmatpush1.bf16.msra.mxu1 %v5695_v15  ;;  %v5710_v9 = vld [vmem:[#allocation10 + $0xc4] ss:$16 sps:$4 sm:$0xff]   ;;  %v5713_v15 = vld [vmem:[#allocation10 + $0xcc] ss:$16 sps:$4 sm:$0xff]  }
 0x61d   :  { %2572 = vmatprep.subr.bf16.mxu0 %v5698_v57  ;;  %2613 = vmatprep.subr.bf16.mxu1 %v5701_v5  ;;  %6908 = vst [vmem:[#allocation33_spill] sm:$0xff] %v5710_v9  ;;  %6909 = vst [vmem:[#allocation34_spill] sm:$0xff] %v5713_v15  ;;  %v5716_v57 = vld [vmem:[#allocation10 + $0xc0] ss:$16 sps:$4 sm:$0xff]   ;;  %v5719_v5 = vld [vmem:[#allocation10 + $0xc8] ss:$16 sps:$4 sm:$0xff]  }
 0x620   :  { %2573 = vmatpush1.bf16.msra.mxu0 %v5704_v48  ;;  %2614 = vmatpush1.bf16.msra.mxu1 %v5707_v52  ;;  %v5722_v48 = vld [vmem:[#allocation10 + $0xe4] ss:$16 sps:$4 sm:$0xff]   ;;  %v5725_v52 = vld [vmem:[#allocation10 + $0xec] ss:$16 sps:$4 sm:$0xff]  }
 0x621   :  { %2574 = vmatprep.subr.bf16.mxu0 %v5710_v9  ;;  %2615 = vmatprep.subr.bf16.mxu1 %v5713_v15  ;;  %v5728_v9 = vld [vmem:[#allocation10 + $0xe0] ss:$16 sps:$4 sm:$0xff]   ;;  %v5731_v15 = vld [vmem:[#allocation10 + $0xe8] ss:$16 sps:$4 sm:$0xff]  }
 0x624   :  { %2575 = vmatpush1.bf16.msra.mxu0 %v5716_v57  ;;  %2616 = vmatpush1.bf16.msra.mxu1 %v5719_v5 }
 0x625   :  { %2576 = vmatprep.subr.bf16.mxu0 %v5722_v48  ;;  %2617 = vmatprep.subr.bf16.mxu1 %v5725_v52 }
 0x628   :  { %2577 = vmatpush1.bf16.msra.mxu0 %v5728_v9  ;;  %2618 = vmatpush1.bf16.msra.mxu1 %v5731_v15 }
 0x629   :  { %2674 = vmatprep.subr.bf16.mxu0 %v5298_v36  ;;  %2715 = vmatprep.subr.bf16.mxu1 %v5301_v37  ;;  %v6910_v36 = vld [vmem:[#allocation57_spill] sm:$0xff]  ;;  %v6911_v37 = vld [vmem:[#allocation58_spill] sm:$0xff] }
 0x62b   :  { %2595 = vmatmul.mubr.bf16.vlgmr.msra.gmra.mrb[56].mxu0 %v5638_v47  ;;  %2636 = vmatmul.mubr.bf16.vlgmr.msra.gmra.mrb[56].mxu1 %v5638_v47 }
 0x62c   :  { %2675 = vmatpush1.bf16.msra.mxu0 %v5304_v38  ;;  %2716 = vmatpush1.bf16.msra.mxu1 %v5307_v39  ;;  %v6912_v38 = vld [vmem:[#allocation59_spill] sm:$0xff]  ;;  %v6913_v39 = vld [vmem:[#allocation60_spill] sm:$0xff] }
 0x62d   :  { %2676 = vmatprep.subr.bf16.mxu0 %v5310_v40  ;;  %2717 = vmatprep.subr.bf16.mxu1 %v5313_v41  ;;  %v6914_v40 = vld [vmem:[#allocation61_spill] sm:$0xff]  ;;  %v6915_v41 = vld [vmem:[#allocation62_spill] sm:$0xff] }
 0x630   :  { %2677 = vmatpush1.bf16.msra.mxu0 %v5316_v42  ;;  %2718 = vmatpush1.bf16.msra.mxu1 %v5319_v45  ;;  %v6916_v42 = vld [vmem:[#allocation63_spill] sm:$0xff]  ;;  %v6917_v45 = vld [vmem:[#allocation64_spill] sm:$0xff] }
 0x631   :  { %2678 = vmatprep.subr.bf16.mxu0 %v5322_v46  ;;  %2719 = vmatprep.subr.bf16.mxu1 %v6835_v44  ;;  %v6918_v46 = vld [vmem:[#allocation65_spill] sm:$0xff]  ;;  %v6919_v44 = vld [vmem:[#allocation66_spill] sm:$0xff] }
 0x634   :  { %2679 = vmatpush1.bf16.msra.mxu0 %v6836_v24  ;;  %2720 = vmatpush1.bf16.msra.mxu1 %v6837_v16  ;;  %v6920_v24 = vld [vmem:[#allocation67_spill] sm:$0xff]  ;;  %v6921_v16 = vld [vmem:[#allocation68_spill] sm:$0xff] }
 0x635   :  { %2680 = vmatprep.subr.bf16.mxu0 %v6838_v18  ;;  %2721 = vmatprep.subr.bf16.mxu1 %v6839_v6  ;;  %v6922_v18 = vld [vmem:[#allocation69_spill] sm:$0xff]  ;;  %v6923_v6 = vld [vmem:[#allocation15_spill] sm:$0xff] }
 0x638   :  { %2681 = vmatpush1.bf16.msra.mxu0 %v6840_v17  ;;  %2722 = vmatpush1.bf16.msra.mxu1 %v6841_v32  ;;  %v6924_v17 = vld [vmem:[#allocation16_spill] sm:$0xff]  ;;  %v6925_v32 = vld [vmem:[#allocation21_spill] sm:$0xff] }
 0x639   :  { %2682 = vmatprep.subr.bf16.mxu0 %v6842_v62  ;;  %2723 = vmatprep.subr.bf16.mxu1 %v6843_v22  ;;  %v6926_v62 = vld [vmem:[#allocation75_spill] sm:$0xff]  ;;  %v6927_v22 = vld [vmem:[#allocation76_spill] sm:$0xff] }
 0x63c   :  { %2683 = vmatpush1.bf16.msra.mxu0 %v6844_v19  ;;  %2724 = vmatpush1.bf16.msra.mxu1 %v6845_v53  ;;  %v6928_v19 = vld [vmem:[#allocation77_spill] sm:$0xff]  ;;  %v6929_v53 = vld [vmem:[#allocation78_spill] sm:$0xff] }
 0x63d   :  { %2684 = vmatprep.subr.bf16.mxu0 %v6846_v27  ;;  %2725 = vmatprep.subr.bf16.mxu1 %v6847_v28  ;;  %v6930_v27 = vld [vmem:[#allocation22_spill] sm:$0xff]  ;;  %v6931_v28 = vld [vmem:[#allocation23_spill] sm:$0xff] }
 0x640   :  { %2685 = vmatpush1.bf16.msra.mxu0 %v6848_v33  ;;  %2726 = vmatpush1.bf16.msra.mxu1 %v6849_v23  ;;  %v6932_v33 = vld [vmem:[#allocation24_spill] sm:$0xff]  ;;  %v6933_v23 = vld [vmem:[#allocation25_spill] sm:$0xff] }
 0x641   :  { %2686 = vmatprep.subr.bf16.mxu0 %v6850_v35  ;;  %2727 = vmatprep.subr.bf16.mxu1 %v6851_v34  ;;  %v6934_v35 = vld [vmem:[#allocation26_spill] sm:$0xff]  ;;  %v6935_v34 = vld [vmem:[#allocation27_spill] sm:$0xff] }
 0x644   :  { %2687 = vmatpush1.bf16.msra.mxu0 %v6852_v21  ;;  %2728 = vmatpush1.bf16.msra.mxu1 %v6853_v31  ;;  %v6936_v21 = vld [vmem:[#allocation28_spill] sm:$0xff] }
 0x645   :  { %2688 = vmatprep.subr.bf16.mxu0 %v6854_v26  ;;  %2729 = vmatprep.subr.bf16.mxu1 %v6855_v1  ;;  %v6937_v1 = vld [vmem:[#allocation17_spill] sm:$0xff] }
 0x648   :  { %2689 = vmatpush1.bf16.msra.mxu0 %v6856_v0  ;;  %2730 = vmatpush1.bf16.msra.mxu1 %v6857_v30 }
 0x649   :  { %2690 = vmatprep.subr.bf16.mxu0 %v6858_v7  ;;  %2731 = vmatprep.subr.bf16.mxu1 %v6859_v8  ;;  %v6938_v8 = vld [vmem:[#allocation18_spill] sm:$0xff] }
 0x64c   :  { %2691 = vmatpush1.bf16.msra.mxu0 %v6860_v10  ;;  %2732 = vmatpush1.bf16.msra.mxu1 %v6861_v11 }
 0x64d   :  { %2692 = vmatprep.subr.bf16.mxu0 %v6862_v12  ;;  %2733 = vmatprep.subr.bf16.mxu1 %v6863_v13 }
 0x650   :  { %2693 = vmatpush1.bf16.msra.mxu0 %v6864_v14  ;;  %2734 = vmatpush1.bf16.msra.mxu1 %v6910_v36 }
 0x651   :  { %2694 = vmatprep.subr.bf16.mxu0 %v6911_v37  ;;  %2735 = vmatprep.subr.bf16.mxu1 %v6912_v38  ;;  %v6939_v37 = vld [vmem:[#allocation19_spill] sm:$0xff] }
 0x654   :  { %2695 = vmatpush1.bf16.msra.mxu0 %v6913_v39  ;;  %2736 = vmatpush1.bf16.msra.mxu1 %v6914_v40  ;;  %v6940_v40 = vld [vmem:[#allocation20_spill] sm:$0xff] }
 0x655   :  { %2696 = vmatprep.subr.bf16.mxu0 %v6915_v41  ;;  %2737 = vmatprep.subr.bf16.mxu1 %v6916_v42 }
 0x658   :  { %2697 = vmatpush1.bf16.msra.mxu0 %v6917_v45  ;;  %2738 = vmatpush1.bf16.msra.mxu1 %v6918_v46 }
 0x659   :  { %2698 = vmatprep.subr.bf16.mxu0 %v6919_v44  ;;  %2739 = vmatprep.subr.bf16.mxu1 %v6920_v24 }
 0x65c   :  { %2699 = vmatpush1.bf16.msra.mxu0 %v6921_v16  ;;  %2740 = vmatpush1.bf16.msra.mxu1 %v6922_v18 }
 0x65d   :  { %2700 = vmatprep.subr.bf16.mxu0 %v6923_v6  ;;  %2741 = vmatprep.subr.bf16.mxu1 %v6924_v17 }
 0x660   :  { %2701 = vmatpush1.bf16.msra.mxu0 %v6925_v32  ;;  %2742 = vmatpush1.bf16.msra.mxu1 %v6926_v62 }
 0x661   :  { %2702 = vmatprep.subr.bf16.mxu0 %v6927_v22  ;;  %2743 = vmatprep.subr.bf16.mxu1 %v6928_v19 }
 0x664   :  { %2703 = vmatpush1.bf16.msra.mxu0 %v6929_v53  ;;  %2744 = vmatpush1.bf16.msra.mxu1 %v6930_v27  ;;  %v6941_v27 = vld [vmem:[#allocation87_spill] sm:$0xff] }
 0x665   :  { %2704 = vmatprep.subr.bf16.mxu0 %v6931_v28  ;;  %2745 = vmatprep.subr.bf16.mxu1 %v6932_v33  ;;  %v6942_v33 = vld [vmem:[#allocation88_spill] sm:$0xff] }
 0x668   :  { %2705 = vmatpush1.bf16.msra.mxu0 %v6933_v23  ;;  %2746 = vmatpush1.bf16.msra.mxu1 %v6934_v35 }
 0x669   :  { %2853 = vmatprep.subr.bf16.mxu0 %v6935_v34  ;;  %2894 = vmatprep.subr.bf16.mxu1 %v6936_v21 }
 0x6de   :  { %v2417_v31 = vpop.f32.mrb[52].mxu0  ;;  %v2458_v26 = vpop.f32.mrb[52].mxu1 }
 0x6df   :  { %v2418_v0 = vadd.f32 %v2417_v31, %v6937_v1  ;;  %v2419_v30 = vpop.f32.mrb[53].mxu0  ;;  %v2460_v7 = vpop.f32.mrb[53].mxu1  ;;  %v2459_v41 = vadd.f32 %v2458_v26, %v6940_v40  ;;  %v6943_v26 = vld [vmem:[#allocation89_spill] sm:$0xff] }
 0x6e0   :  { %v2420_v10 = vadd.f32 %v2419_v30, %v6938_v8  ;;  %v2421_v11 = vpop.f32.mrb[54].mxu0  ;;  %v2462_v12 = vpop.f32.mrb[54].mxu1  ;;  %v2461_v38 = vadd.f32 %v2460_v7, %v6939_v37  ;;  %v6944_v30 = vld [vmem:[#allocation90_spill] sm:$0xff] }
 0x6e1   :  { %v3644_v13 = vmul.f32 -1.442695, %v2418_v0  ;;  %v2422_v14 = vpop.f32.mrb[55].mxu0  ;;  %v2463_v47 = vpop.f32.mrb[55].mxu1 }
 0x6e2   :  { %v3645_v36 = vmul.f32 -1.442695, %v2420_v10  ;;  %v3646_v39 = vmul.f32 -1.442695, %v2461_v38 }
 0x6e3   :  { %4052 = vpow2.f32 %v3644_v13 }
 0x6e4   :  { %4054 = vpow2.f32 %v3645_v36 }
 0x6e5   :  { %4056 = vpow2.f32 %v3646_v39 }
 0x6e6   :  { %4058 = vtanh.f32 %v2459_v41 }
 0x6ed   :  { %v4053_v42 = vpop.eup %4052 }
 0x6ee   :  { %v4055_v45 = vpop.eup %4054  ;;  %v2468_v46 = vadd.f32 1.0, %v4053_v42 }
 0x6ef   :  { %v2474_v44 = vadd.f32 1.0, %v4055_v45  ;;  %v4057_v24 = vpop.eup %4056 }
 0x6f0   :  { %4060 = vrcp.f32 %v2468_v46  ;;  %v4059_v16 = vpop.eup %4058  ;;  %v2481_v32 = vadd.f32 1.0, %v4057_v24 }
 0x6f1   :  { %4062 = vrcp.f32 %v2474_v44 }
 0x6f2   :  { %4064 = vrcp.f32 %v2481_v32 }
 0x6fa   :  { %v4061_v18 = vpop.eup %4060 }
 0x6fb   :  { %v4063_v6 = vpop.eup %4062  ;;  %v2485_v17 = vmul.f32 %v4061_v18, %v4059_v16 }
 0x6fc   :  { %v2484_v62 = vmul.f32 %v4063_v6, %v5621_v51  ;;  %v4065_v47 = vpop.eup %4064 }
 0x6fe   :  { %v5807_v22 = vadd.f32 %v2485_v17, %v2484_v62  ;;  %v2596_v19 = vpop.f32.mrb[56].mxu0  ;;  %v2637_v53 = vpop.f32.mrb[56].mxu1 }
 0x6ff   :  { %v2644_v28 = vadd.f32 %v2596_v19, %v6941_v27  ;;  %v2646_v23 = vadd.f32 %v2637_v53, %v6942_v33  ;;  %v2598_v35 = vpop.f32.mrb[57].mxu0  ;;  %v2639_v31 = vpop.f32.mrb[57].mxu1 }
 0x700   :  { %v2645_v0 = vadd.f32 %v2598_v35, %v6943_v26  ;;  %v2647_v7 = vadd.f32 %v2639_v31, %v6944_v30  ;;  %v2600_v10 = vpop.f32.mrb[58].mxu0  ;;  %v2641_v11 = vpop.f32.mrb[58].mxu1  ;;  %4066 = vtanh.f32 %v5807_v22 }
 0x701   :  { %v3651_v51 = vmul.f32 -1.442695, %v2644_v28  ;;  %v2601_v12 = vpop.f32.mrb[59].mxu0  ;;  %v2642_v13 = vpop.f32.mrb[59].mxu1 }
 0x702   :  { %v3652_v14 = vmul.f32 -1.442695, %v2645_v0  ;;  %v3653_v38 = vmul.f32 -1.442695, %v2647_v7 }
 0x703   :  { %4068 = vpow2.f32 %v3651_v51 }
 0x704   :  { %4070 = vpow2.f32 %v3652_v14 }
 0x705   :  { %4072 = vtanh.f32 %v2646_v23 }
 0x706   :  { %4074 = vpow2.f32 %v3653_v38  ;;  %v6948_v38 = vld [vmem:[#allocation79_spill] sm:$0xff] }
 0x70a   :  { %v4067_v36 = vpop.eup %4066 }
 0x70b   :  { %v2488_v39 = vmul.f32 %v4067_v36, %v4065_v47  ;;  %v6946_v47 = vld [vmem:[#allocation30_spill] sm:$0xff]  ;;  %v6947_v36 = vld [vmem:[#allocation31_spill] sm:$0xff] }
 0x70d   :  { %v4069_v41 = vpop.eup %4068  ;;  %v2490_v42 = vcombine.high %v2488_v39, %v2488_v39  ;;  %v2497_v45 = vrot.slane %v2488_v39, %v5068_v29  ;;  %v2673_v46 = vpack.c.bf16 %v2488_v39, %v2488_v39  ;;  %v6949_v39 = vld [vmem:[#allocation80_spill] sm:$0xff] }
 0x70e   :  { %v4071_v44 = vpop.eup %4070  ;;  %v2651_v24 = vadd.f32 1.0, %v4069_v41  ;;  %v6950_v41 = vld [vmem:[#allocation81_spill] sm:$0xff] }
 0x70f   :  { %v2657_v16 = vadd.f32 1.0, %v4071_v44  ;;  %v2504_v18 = vrot.slane %v2490_v42, %v5068_v29  ;;  %v2505_v6 = vcombine.high %v2497_v45, %v2497_v45  ;;  %v2513_v17 = vrot.slane %v2497_v45, %v5068_v29  ;;  %3647 = vst.sshfl [vmem:[#allocation3 + $0x4] sm:$0x1 pattern:$0x73625140] %v2497_v45  ;;  %2706 = vmatprep.mubr.bf16.mxu0 %v2673_v46  ;;  %v4073_v35 = vpop.eup %4072  ;;  %v6951_v42 = vld [vmem:[#allocation82_spill] sm:$0xff] }
 0x710   :  { %2747 = vmatprep.mubr.bf16.mxu1 %v2673_v46  ;;  %4076 = vrcp.f32 %v2651_v24  ;;  %v4075_v31 = vpop.eup %4074  ;;  %v6952_v45 = vld [vmem:[#allocation32_spill] sm:$0xff]  ;;  %v6953_v46 = vld [vmem:[#allocation33_spill] sm:$0xff]  ;;  %v6954_v44 = vld [vmem:[#allocation34_spill] sm:$0xff] }
 0x711   :  { %4078 = vrcp.f32 %v2657_v16  ;;  %v2506_v32 = vcombine.high %v2504_v18, %v2504_v18  ;;  %v2520_v62 = vrot.slane %v2504_v18, %v5068_v29  ;;  %v2527_v19 = vrot.slane %v2505_v6, %v5068_v29  ;;  %3648 = vst.sshfl [vmem:[#allocation3 + $0xc] sm:$0x1 pattern:$0x73625140] %v2505_v6  ;;  %v5856_v24 = vld [vmem:[#allocation12 + $0x4] ss:$16 sps:$4 sm:$0xff]  }
 0x712   :  { %3649 = vst.sshfl [vmem:[#allocation3 + $0x24] sm:$0x1 pattern:$0x73625140] %v2504_v18  ;;  %v2535_v53 = vcombine.high %v2513_v17, %v2513_v17  ;;  %v2664_v7 = vadd.f32 1.0, %v4075_v31 }
 0x713   :  { %v2534_v27 = vrot.slane %v2506_v32, %v5068_v29  ;;  %v2536_v28 = vcombine.high %v2520_v62, %v2520_v62  ;;  %v2537_v33 = vcombine.high %v2527_v19, %v2527_v19  ;;  %3650 = vst.sshfl [vmem:[#allocation3 + $0x2c] sm:$0x1 pattern:$0x73625140] %v2506_v32  ;;  %v5859_v16 = vld [vmem:[#allocation12 + $0xc] ss:$16 sps:$4 sm:$0xff]  }
 0x714   :  { %2549 = vst [vmem:[#allocation3 + $0x14] sm:$0x1] %v2535_v53  ;;  %4080 = vrcp.f32 %v2664_v7  ;;  %v5862_v18 = vld [vmem:[#allocation12] ss:$16 sps:$4 sm:$0xff]   ;;  %v5865_v6 = vld [vmem:[#allocation12 + $0x8] ss:$16 sps:$4 sm:$0xff]  }
 0x715   :  { %v2538_v23 = vcombine.high %v2534_v27, %v2534_v27  ;;  %2550 = vst [vmem:[#allocation3 + $0x1c] sm:$0x1] %v2537_v33  ;;  %2553 = vst [vmem:[#allocation3 + $0x34] sm:$0x1] %v2536_v28  ;;  %v5868_v17 = vld [vmem:[#allocation12 + $0x24] ss:$16 sps:$4 sm:$0xff]  }
 0x716   :  { %v5871_v32 = vld [vmem:[#allocation12 + $0x2c] ss:$16 sps:$4 sm:$0xff]   ;;  %v5874_v62 = vld [vmem:[#allocation12 + $0x20] ss:$16 sps:$4 sm:$0xff]   ;;  %v5877_v19 = vld [vmem:[#allocation12 + $0x28] ss:$16 sps:$4 sm:$0xff]  }
 0x717   :  { %2554 = vst [vmem:[#allocation3 + $0x3c] sm:$0x1] %v2538_v23  ;;  %v5880_v53 = vld [vmem:[#allocation12 + $0x44] ss:$16 sps:$4 sm:$0xff]   ;;  %v5883_v27 = vld [vmem:[#allocation12 + $0x4c] ss:$16 sps:$4 sm:$0xff]  }
 0x718   :  { %6955 = vst [vmem:[#allocation35_spill] sm:$0xff] %v5883_v27  ;;  %v5886_v28 = vld [vmem:[#allocation12 + $0x40] ss:$16 sps:$4 sm:$0xff]   ;;  %v5889_v33 = vld [vmem:[#allocation12 + $0x48] ss:$16 sps:$4 sm:$0xff]  }
 0x719   :  { %6956 = vst [vmem:[#allocation36_spill] sm:$0xff] %v5886_v28  ;;  %6957 = vst [vmem:[#allocation37_spill] sm:$0xff] %v5889_v33  ;;  %v5892_v23 = vld [vmem:[#allocation12 + $0x64] ss:$16 sps:$4 sm:$0xff]   ;;  %v5898_v31 = vld [vmem:[#allocation12 + $0x60] ss:$16 sps:$4 sm:$0xff]  }
 0x71a   :  { %v4077_v26 = vpop.eup %4076  ;;  %6958 = vst [vmem:[#allocation38_spill] sm:$0xff] %v5892_v23  ;;  %6960 = vst [vmem:[#allocation40_spill] sm:$0xff] %v5898_v31  ;;  %v5910_v7 = vld [vmem:[#allocation12 + $0x80] ss:$16 sps:$4 sm:$0xff]  }
 0x71b   :  { %v4079_v0 = vpop.eup %4078  ;;  %v2668_v30 = vmul.f32 %v4077_v26, %v4073_v35  ;;  %v5895_v35 = vld [vmem:[#allocation12 + $0x6c] ss:$16 sps:$4 sm:$0xff]   ;;  %v5901_v26 = vld [vmem:[#allocation12 + $0x68] ss:$16 sps:$4 sm:$0xff]   ;;  %6964 = vst [vmem:[#allocation44_spill] sm:$0xff] %v5910_v7 }
 0x71c   :  { %v2667_v10 = vmul.f32 %v4079_v0, %v5635_v60  ;;  %v6945_v60 = vld [vmem:[#allocation29_spill] sm:$0xff]  ;;  %6959 = vst [vmem:[#allocation39_spill] sm:$0xff] %v5895_v35  ;;  %6961 = vst [vmem:[#allocation41_spill] sm:$0xff] %v5901_v26 }
 0x71d   :  { %v5904_v0 = vld [vmem:[#allocation12 + $0x84] ss:$16 sps:$4 sm:$0xff]  }
 0x71e   :  { %v5821_v11 = vadd.f32 %v2668_v30, %v2667_v10  ;;  %v4081_v51 = vpop.eup %4080  ;;  %6962 = vst [vmem:[#allocation42_spill] sm:$0xff] %v5904_v0  ;;  %v5907_v30 = vld [vmem:[#allocation12 + $0x8c] ss:$16 sps:$4 sm:$0xff]   ;;  %v5913_v10 = vld [vmem:[#allocation12 + $0x88] ss:$16 sps:$4 sm:$0xff]  }
 0x71f   :  { %6963 = vst [vmem:[#allocation43_spill] sm:$0xff] %v5907_v30  ;;  %6965 = vst [vmem:[#allocation45_spill] sm:$0xff] %v5913_v10 }
 0x720   :  { %4082 = vtanh.f32 %v5821_v11 }
 0x72a   :  { %v4083_v12 = vpop.eup %4082 }
 0x72b   :  { %v2671_v13 = vmul.f32 %v4083_v12, %v4081_v51  ;;  %v5916_v51 = vld [vmem:[#allocation12 + $0xa4] ss:$16 sps:$4 sm:$0xff]   ;;  %v5919_v12 = vld [vmem:[#allocation12 + $0xac] ss:$16 sps:$4 sm:$0xff]  }
 0x72c   :  { %6966 = vst [vmem:[#allocation70_spill] sm:$0xff] %v5916_v51  ;;  %6967 = vst [vmem:[#allocation71_spill] sm:$0xff] %v5919_v12 }
 0x72d   :  { %v2672_v14 = vpack.c.bf16 %v2671_v13, %v2671_v13  ;;  %v5922_v13 = vld [vmem:[#allocation12 + $0xa0] ss:$16 sps:$4 sm:$0xff]  }
 0x72e   :  { %6968 = vst [vmem:[#allocation72_spill] sm:$0xff] %v5922_v13 }
 0x72f   :  { %2707 = vmatmul.mubr.bf16.vlgmr.msra.gmra.mrb[60].mxu0 %v2672_v14  ;;  %2748 = vmatmul.mubr.bf16.vlgmr.msra.gmra.mrb[60].mxu1 %v2672_v14 }
 0x730   :  { %2854 = vmatpush1.bf16.msra.mxu0 %v5642_v54  ;;  %2895 = vmatpush1.bf16.msra.mxu1 %v5645_v4 }
 0x731   :  { %2855 = vmatprep.subr.bf16.mxu0 %v5648_v61  ;;  %2896 = vmatprep.subr.bf16.mxu1 %v5651_v25 }
 0x732   :  { %2885 = vmatprep.mubr.bf16.mxu0 %v6649_v20  ;;  %2926 = vmatprep.mubr.bf16.mxu1 %v6649_v20 }
 0x734   :  { %2856 = vmatpush1.bf16.msra.mxu0 %v5656_v63  ;;  %2897 = vmatpush1.bf16.msra.mxu1 %v5659_v58 }
 0x735   :  { %2857 = vmatprep.subr.bf16.mxu0 %v5662_v50  ;;  %2898 = vmatprep.subr.bf16.mxu1 %v5665_v2 }
 0x738   :  { %2858 = vmatpush1.bf16.msra.mxu0 %v5668_v55  ;;  %2899 = vmatpush1.bf16.msra.mxu1 %v5671_v49 }
 0x739   :  { %2859 = vmatprep.subr.bf16.mxu0 %v5674_v59  ;;  %2900 = vmatprep.subr.bf16.mxu1 %v5677_v43 }
 0x73c   :  { %2860 = vmatpush1.bf16.msra.mxu0 %v5680_v56  ;;  %2901 = vmatpush1.bf16.msra.mxu1 %v5683_v3 }
 0x73d   :  { %2861 = vmatprep.subr.bf16.mxu0 %v6945_v60  ;;  %2902 = vmatprep.subr.bf16.mxu1 %v6946_v47 }
 0x740   :  { %2862 = vmatpush1.bf16.msra.mxu0 %v6947_v36  ;;  %2903 = vmatpush1.bf16.msra.mxu1 %v6948_v38 }
 0x741   :  { %2863 = vmatprep.subr.bf16.mxu0 %v6949_v39  ;;  %2904 = vmatprep.subr.bf16.mxu1 %v6950_v41 }
 0x744   :  { %2864 = vmatpush1.bf16.msra.mxu0 %v6951_v42  ;;  %2905 = vmatpush1.bf16.msra.mxu1 %v6952_v45 }
 0x745   :  { %2865 = vmatprep.subr.bf16.mxu0 %v6953_v46  ;;  %2906 = vmatprep.subr.bf16.mxu1 %v6954_v44 }
 0x748   :  { %2866 = vmatpush1.bf16.msra.mxu0 %v5716_v57  ;;  %2907 = vmatpush1.bf16.msra.mxu1 %v5719_v5 }
 0x749   :  { %2867 = vmatprep.subr.bf16.mxu0 %v5722_v48  ;;  %2908 = vmatprep.subr.bf16.mxu1 %v5725_v52 }
 0x74c   :  { %2868 = vmatpush1.bf16.msra.mxu0 %v5728_v9  ;;  %2909 = vmatpush1.bf16.msra.mxu1 %v5731_v15 }
 0x74d   :  { %2965 = vmatprep.subr.bf16.mxu0 %v5856_v24  ;;  %3006 = vmatprep.subr.bf16.mxu1 %v5859_v16 }
 0x74f   :  { %2886 = vmatmul.mubr.bf16.vlgmr.msra.gmra.mrb[64].mxu0 %v2672_v14  ;;  %2927 = vmatmul.mubr.bf16.vlgmr.msra.gmra.mrb[64].mxu1 %v2672_v14  ;;  %v5925_v14 = vld [vmem:[#allocation12 + $0xa8] ss:$16 sps:$4 sm:$0xff]  }
 0x750   :  { %2966 = vmatpush1.bf16.msra.mxu0 %v5862_v18  ;;  %3007 = vmatpush1.bf16.msra.mxu1 %v5865_v6  ;;  %6969 = vst [vmem:[#allocation73_spill] sm:$0xff] %v5925_v14 }
 0x751   :  { %2967 = vmatprep.subr.bf16.mxu0 %v5868_v17  ;;  %3008 = vmatprep.subr.bf16.mxu1 %v5871_v32 }
 0x754   :  { %2968 = vmatpush1.bf16.msra.mxu0 %v5874_v62  ;;  %3009 = vmatpush1.bf16.msra.mxu1 %v5877_v19 }
 0x755   :  { %2969 = vmatprep.subr.bf16.mxu0 %v5880_v53  ;;  %3010 = vmatprep.subr.bf16.mxu1 %v5883_v27 }
 0x758   :  { %2970 = vmatpush1.bf16.msra.mxu0 %v5886_v28  ;;  %3011 = vmatpush1.bf16.msra.mxu1 %v5889_v33 }
 0x759   :  { %2971 = vmatprep.subr.bf16.mxu0 %v5892_v23  ;;  %3012 = vmatprep.subr.bf16.mxu1 %v5895_v35 }
 0x75c   :  { %2972 = vmatpush1.bf16.msra.mxu0 %v5898_v31  ;;  %3013 = vmatpush1.bf16.msra.mxu1 %v5901_v26 }
 0x75d   :  { %2973 = vmatprep.subr.bf16.mxu0 %v5904_v0  ;;  %3014 = vmatprep.subr.bf16.mxu1 %v5907_v30 }
 0x760   :  { %2974 = vmatpush1.bf16.msra.mxu0 %v5910_v7  ;;  %3015 = vmatpush1.bf16.msra.mxu1 %v5913_v10  ;;  %v5928_v7 = vld [vmem:[#allocation12 + $0xc4] ss:$16 sps:$4 sm:$0xff]   ;;  %v5931_v10 = vld [vmem:[#allocation12 + $0xcc] ss:$16 sps:$4 sm:$0xff]  }
 0x761   :  { %2975 = vmatprep.subr.bf16.mxu0 %v5916_v51  ;;  %3016 = vmatprep.subr.bf16.mxu1 %v5919_v12  ;;  %6970 = vst [vmem:[#allocation74_spill] sm:$0xff] %v5928_v7  ;;  %6971 = vst [vmem:[#allocation46_spill] sm:$0xff] %v5931_v10  ;;  %v5934_v51 = vld [vmem:[#allocation12 + $0xc0] ss:$16 sps:$4 sm:$0xff]   ;;  %v5937_v12 = vld [vmem:[#allocation12 + $0xc8] ss:$16 sps:$4 sm:$0xff]  }
 0x762   :  { %6972 = vst [vmem:[#allocation47_spill] sm:$0xff] %v5934_v51  ;;  %6973 = vst [vmem:[#allocation48_spill] sm:$0xff] %v5937_v12 }
 0x764   :  { %2976 = vmatpush1.bf16.msra.mxu0 %v5922_v13  ;;  %3017 = vmatpush1.bf16.msra.mxu1 %v5925_v14  ;;  %v5940_v13 = vld [vmem:[#allocation12 + $0xe4] ss:$16 sps:$4 sm:$0xff]   ;;  %v5943_v14 = vld [vmem:[#allocation12 + $0xec] ss:$16 sps:$4 sm:$0xff]  }
 0x765   :  { %2977 = vmatprep.subr.bf16.mxu0 %v5928_v7  ;;  %3018 = vmatprep.subr.bf16.mxu1 %v5931_v10  ;;  %6974 = vst [vmem:[#allocation49_spill] sm:$0xff] %v5940_v13  ;;  %6975 = vst [vmem:[#allocation50_spill] sm:$0xff] %v5943_v14  ;;  %v5946_v7 = vld [vmem:[#allocation12 + $0xe0] ss:$16 sps:$4 sm:$0xff]   ;;  %v5949_v10 = vld [vmem:[#allocation12 + $0xe8] ss:$16 sps:$4 sm:$0xff]  }
 0x766   :  { %6976 = vst [vmem:[#allocation51_spill] sm:$0xff] %v5946_v7  ;;  %6977 = vst [vmem:[#allocation52_spill] sm:$0xff] %v5949_v10 }
 0x768   :  { %2978 = vmatpush1.bf16.msra.mxu0 %v5934_v51  ;;  %3019 = vmatpush1.bf16.msra.mxu1 %v5937_v12  ;;  %v5952_v51 = vld [vmem:[#allocation12 + $0x104] ss:$16 sps:$4 sm:$0xff]   ;;  %v5955_v12 = vld [vmem:[#allocation12 + $0x10c] ss:$16 sps:$4 sm:$0xff]  }
 0x769   :  { %2979 = vmatprep.subr.bf16.mxu0 %v5940_v13  ;;  %3020 = vmatprep.subr.bf16.mxu1 %v5943_v14  ;;  %6978 = vst [vmem:[#allocation53_spill] sm:$0xff] %v5952_v51  ;;  %6979 = vst [vmem:[#allocation54_spill] sm:$0xff] %v5955_v12  ;;  %v5958_v13 = vld [vmem:[#allocation12 + $0x100] ss:$16 sps:$4 sm:$0xff]   ;;  %v5961_v14 = vld [vmem:[#allocation12 + $0x108] ss:$16 sps:$4 sm:$0xff]  }
 0x76a   :  { %6980 = vst [vmem:[#allocation55_spill] sm:$0xff] %v5958_v13  ;;  %6981 = vst [vmem:[#allocation56_spill] sm:$0xff] %v5961_v14 }
 0x76c   :  { %2980 = vmatpush1.bf16.msra.mxu0 %v5946_v7  ;;  %3021 = vmatpush1.bf16.msra.mxu1 %v5949_v10  ;;  %v5964_v7 = vld [vmem:[#allocation12 + $0x124] ss:$16 sps:$4 sm:$0xff]   ;;  %v5967_v10 = vld [vmem:[#allocation12 + $0x12c] ss:$16 sps:$4 sm:$0xff]  }
 0x76d   :  { %2981 = vmatprep.subr.bf16.mxu0 %v5952_v51  ;;  %3022 = vmatprep.subr.bf16.mxu1 %v5955_v12  ;;  %6982 = vst [vmem:[#allocation83_spill] sm:$0xff] %v5964_v7  ;;  %6983 = vst [vmem:[#allocation84_spill] sm:$0xff] %v5967_v10  ;;  %v5970_v51 = vld [vmem:[#allocation12 + $0x120] ss:$16 sps:$4 sm:$0xff]   ;;  %v5973_v12 = vld [vmem:[#allocation12 + $0x128] ss:$16 sps:$4 sm:$0xff]  }
 0x76e   :  { %6984 = vst [vmem:[#allocation85_spill] sm:$0xff] %v5970_v51  ;;  %6985 = vst [vmem:[#allocation86_spill] sm:$0xff] %v5973_v12 }
 0x770   :  { %2982 = vmatpush1.bf16.msra.mxu0 %v5958_v13  ;;  %3023 = vmatpush1.bf16.msra.mxu1 %v5961_v14  ;;  %v5976_v13 = vld [vmem:[#allocation12 + $0x144] ss:$16 sps:$4 sm:$0xff]   ;;  %v5979_v14 = vld [vmem:[#allocation12 + $0x14c] ss:$16 sps:$4 sm:$0xff]  }
 0x771   :  { %2983 = vmatprep.subr.bf16.mxu0 %v5964_v7  ;;  %3024 = vmatprep.subr.bf16.mxu1 %v5967_v10  ;;  %6986 = vst [vmem:[#allocation57_spill] sm:$0xff] %v5976_v13  ;;  %6987 = vst [vmem:[#allocation58_spill] sm:$0xff] %v5979_v14  ;;  %v5982_v7 = vld [vmem:[#allocation12 + $0x140] ss:$16 sps:$4 sm:$0xff]   ;;  %v5985_v10 = vld [vmem:[#allocation12 + $0x148] ss:$16 sps:$4 sm:$0xff]  }
 0x772   :  { %6988 = vst [vmem:[#allocation59_spill] sm:$0xff] %v5982_v7  ;;  %6989 = vst [vmem:[#allocation60_spill] sm:$0xff] %v5985_v10 }
 0x774   :  { %2984 = vmatpush1.bf16.msra.mxu0 %v5970_v51  ;;  %3025 = vmatpush1.bf16.msra.mxu1 %v5973_v12  ;;  %v5988_v51 = vld [vmem:[#allocation12 + $0x164] ss:$16 sps:$4 sm:$0xff]   ;;  %v5991_v12 = vld [vmem:[#allocation12 + $0x16c] ss:$16 sps:$4 sm:$0xff]  }
 0x775   :  { %2985 = vmatprep.subr.bf16.mxu0 %v5976_v13  ;;  %3026 = vmatprep.subr.bf16.mxu1 %v5979_v14  ;;  %6990 = vst [vmem:[#allocation61_spill] sm:$0xff] %v5988_v51  ;;  %6991 = vst [vmem:[#allocation62_spill] sm:$0xff] %v5991_v12  ;;  %v5994_v13 = vld [vmem:[#allocation12 + $0x160] ss:$16 sps:$4 sm:$0xff]   ;;  %v5997_v14 = vld [vmem:[#allocation12 + $0x168] ss:$16 sps:$4 sm:$0xff]  }
 0x776   :  { %6992 = vst [vmem:[#allocation63_spill] sm:$0xff] %v5994_v13  ;;  %6993 = vst [vmem:[#allocation64_spill] sm:$0xff] %v5997_v14 }
 0x778   :  { %2986 = vmatpush1.bf16.msra.mxu0 %v5982_v7  ;;  %3027 = vmatpush1.bf16.msra.mxu1 %v5985_v10  ;;  %v6000_v7 = vld [vmem:[#allocation12 + $0x184] ss:$16 sps:$4 sm:$0xff]   ;;  %v6003_v10 = vld [vmem:[#allocation12 + $0x18c] ss:$16 sps:$4 sm:$0xff]  }
 0x779   :  { %2987 = vmatprep.subr.bf16.mxu0 %v5988_v51  ;;  %3028 = vmatprep.subr.bf16.mxu1 %v5991_v12  ;;  %6994 = vst [vmem:[#allocation65_spill] sm:$0xff] %v6000_v7  ;;  %6995 = vst [vmem:[#allocation66_spill] sm:$0xff] %v6003_v10  ;;  %v6006_v51 = vld [vmem:[#allocation12 + $0x180] ss:$16 sps:$4 sm:$0xff]   ;;  %v6009_v12 = vld [vmem:[#allocation12 + $0x188] ss:$16 sps:$4 sm:$0xff]  }
 0x77a   :  { %6996 = vst [vmem:[#allocation67_spill] sm:$0xff] %v6006_v51  ;;  %6997 = vst [vmem:[#allocation68_spill] sm:$0xff] %v6009_v12 }
 0x77c   :  { %2988 = vmatpush1.bf16.msra.mxu0 %v5994_v13  ;;  %3029 = vmatpush1.bf16.msra.mxu1 %v5997_v14  ;;  %v6012_v13 = vld [vmem:[#allocation12 + $0x1a4] ss:$16 sps:$4 sm:$0xff]   ;;  %v6015_v14 = vld [vmem:[#allocation12 + $0x1ac] ss:$16 sps:$4 sm:$0xff]  }
 0x77d   :  { %2989 = vmatprep.subr.bf16.mxu0 %v6000_v7  ;;  %3030 = vmatprep.subr.bf16.mxu1 %v6003_v10  ;;  %6998 = vst [vmem:[#allocation69_spill] sm:$0xff] %v6012_v13  ;;  %6999 = vst [vmem:[#allocation15_spill] sm:$0xff] %v6015_v14  ;;  %v6018_v7 = vld [vmem:[#allocation12 + $0x1a0] ss:$16 sps:$4 sm:$0xff]   ;;  %v6021_v10 = vld [vmem:[#allocation12 + $0x1a8] ss:$16 sps:$4 sm:$0xff]  }
 0x77e   :  { %7000 = vst [vmem:[#allocation16_spill] sm:$0xff] %v6018_v7  ;;  %7001 = vst [vmem:[#allocation21_spill] sm:$0xff] %v6021_v10 }
 0x780   :  { %2990 = vmatpush1.bf16.msra.mxu0 %v6006_v51  ;;  %3031 = vmatpush1.bf16.msra.mxu1 %v6009_v12  ;;  %v6024_v51 = vld [vmem:[#allocation12 + $0x1c4] ss:$16 sps:$4 sm:$0xff]   ;;  %v6027_v12 = vld [vmem:[#allocation12 + $0x1cc] ss:$16 sps:$4 sm:$0xff]  }
 0x781   :  { %2991 = vmatprep.subr.bf16.mxu0 %v6012_v13  ;;  %3032 = vmatprep.subr.bf16.mxu1 %v6015_v14  ;;  %7002 = vst [vmem:[#allocation75_spill] sm:$0xff] %v6024_v51  ;;  %7003 = vst [vmem:[#allocation76_spill] sm:$0xff] %v6027_v12  ;;  %v6030_v13 = vld [vmem:[#allocation12 + $0x1c0] ss:$16 sps:$4 sm:$0xff]   ;;  %v6033_v14 = vld [vmem:[#allocation12 + $0x1c8] ss:$16 sps:$4 sm:$0xff]  }
 0x782   :  { %7004 = vst [vmem:[#allocation77_spill] sm:$0xff] %v6030_v13  ;;  %7005 = vst [vmem:[#allocation78_spill] sm:$0xff] %v6033_v14 }
 0x784   :  { %2992 = vmatpush1.bf16.msra.mxu0 %v6018_v7  ;;  %3033 = vmatpush1.bf16.msra.mxu1 %v6021_v10  ;;  %v6036_v7 = vld [vmem:[#allocation12 + $0x1e4] ss:$16 sps:$4 sm:$0xff]   ;;  %v6039_v10 = vld [vmem:[#allocation12 + $0x1ec] ss:$16 sps:$4 sm:$0xff]  }
 0x785   :  { %2993 = vmatprep.subr.bf16.mxu0 %v6024_v51  ;;  %3034 = vmatprep.subr.bf16.mxu1 %v6027_v12  ;;  %7006 = vst [vmem:[#allocation22_spill] sm:$0xff] %v6036_v7  ;;  %7007 = vst [vmem:[#allocation23_spill] sm:$0xff] %v6039_v10  ;;  %v6042_v51 = vld [vmem:[#allocation12 + $0x1e0] ss:$16 sps:$4 sm:$0xff]   ;;  %v6045_v12 = vld [vmem:[#allocation12 + $0x1e8] ss:$16 sps:$4 sm:$0xff]  }
 0x786   :  { %7008 = vst [vmem:[#allocation24_spill] sm:$0xff] %v6042_v51  ;;  %7009 = vst [vmem:[#allocation25_spill] sm:$0xff] %v6045_v12 }
 0x788   :  { %2994 = vmatpush1.bf16.msra.mxu0 %v6030_v13  ;;  %3035 = vmatpush1.bf16.msra.mxu1 %v6033_v14 }
 0x789   :  { %2995 = vmatprep.subr.bf16.mxu0 %v6036_v7  ;;  %3036 = vmatprep.subr.bf16.mxu1 %v6039_v10 }
 0x78c   :  { %2996 = vmatpush1.bf16.msra.mxu0 %v6042_v51  ;;  %3037 = vmatpush1.bf16.msra.mxu1 %v6045_v12 }
 0x78d   :  { %3144 = vmatprep.subr.bf16.mxu0 %v6935_v34  ;;  %3185 = vmatprep.subr.bf16.mxu1 %v6936_v21 }
 0x802   :  { %v2708_v14 = vpop.f32.mrb[60].mxu0  ;;  %v2749_v13 = vpop.f32.mrb[60].mxu1 }
 0x803   :  { %v2709_v7 = vadd.f32 %v2708_v14, %v6937_v1  ;;  %v2710_v30 = vpop.f32.mrb[61].mxu0  ;;  %v2751_v0 = vpop.f32.mrb[61].mxu1  ;;  %v2750_v21 = vadd.f32 %v2749_v13, %v6940_v40  ;;  %v7010_v13 = vld [vmem:[#allocation91_spill] sm:$0xff]  ;;  %v7013_v40 = vld [vmem:[#allocation94_spill] sm:$0xff] }
 0x804   :  { %v2711_v10 = vadd.f32 %v2710_v30, %v6938_v8  ;;  %v2712_v26 = vpop.f32.mrb[62].mxu0  ;;  %v2753_v31 = vpop.f32.mrb[62].mxu1  ;;  %v2752_v34 = vadd.f32 %v2751_v0, %v6939_v37 }
 0x805   :  { %v3654_v35 = vmul.f32 -1.442695, %v2709_v7  ;;  %v2713_v51 = vpop.f32.mrb[63].mxu0  ;;  %v2754_v23 = vpop.f32.mrb[63].mxu1 }
 0x806   :  { %v3655_v33 = vmul.f32 -1.442695, %v2711_v10  ;;  %v3656_v12 = vmul.f32 -1.442695, %v2752_v34 }
 0x807   :  { %4084 = vpow2.f32 %v3654_v35 }
 0x808   :  { %4086 = vpow2.f32 %v3655_v33 }
 0x809   :  { %4088 = vpow2.f32 %v3656_v12  ;;  %v7011_v12 = vld [vmem:[#allocation92_spill] sm:$0xff] }
 0x80a   :  { %4090 = vtanh.f32 %v2750_v21 }
 0x811   :  { %v4085_v28 = vpop.eup %4084 }
 0x812   :  { %v4087_v27 = vpop.eup %4086  ;;  %v2759_v14 = vadd.f32 1.0, %v4085_v28 }
 0x813   :  { %v2765_v1 = vadd.f32 1.0, %v4087_v27  ;;  %v4089_v31 = vpop.eup %4088 }
 0x814   :  { %4092 = vrcp.f32 %v2759_v14  ;;  %v4091_v26 = vpop.eup %4090  ;;  %v2772_v35 = vadd.f32 1.0, %v4089_v31 }
 0x815   :  { %4094 = vrcp.f32 %v2765_v1  ;;  %v7012_v1 = vld [vmem:[#allocation93_spill] sm:$0xff] }
 0x816   :  { %4096 = vrcp.f32 %v2772_v35 }
 0x81e   :  { %v4093_v30 = vpop.eup %4092 }
 0x81f   :  { %v4095_v23 = vpop.eup %4094  ;;  %v2776_v7 = vmul.f32 %v4093_v30, %v4091_v26 }
 0x820   :  { %v2775_v33 = vmul.f32 %v4095_v23, %v5807_v22 }
 0x822   :  { %v6055_v0 = vadd.f32 %v2776_v7, %v2775_v33  ;;  %v2887_v10 = vpop.f32.mrb[64].mxu0  ;;  %v2928_v51 = vpop.f32.mrb[64].mxu1 }
 0x823   :  { %v2935_v28 = vadd.f32 %v2887_v10, %v7010_v13  ;;  %v2937_v34 = vadd.f32 %v2928_v51, %v7011_v12  ;;  %v2889_v27 = vpop.f32.mrb[65].mxu0  ;;  %v2930_v21 = vpop.f32.mrb[65].mxu1 }
 0x824   :  { %v2936_v14 = vadd.f32 %v2889_v27, %v7012_v1  ;;  %v2938_v37 = vadd.f32 %v2930_v21, %v7013_v40  ;;  %v2891_v8 = vpop.f32.mrb[66].mxu0  ;;  %v2932_v26 = vpop.f32.mrb[66].mxu1  ;;  %4098 = vtanh.f32 %v6055_v0 }
 0x825   :  { %v3661_v22 = vmul.f32 -1.442695, %v2935_v28  ;;  %v2892_v31 = vpop.f32.mrb[67].mxu0  ;;  %v2933_v30 = vpop.f32.mrb[67].mxu1 }
 0x826   :  { %v3662_v23 = vmul.f32 -1.442695, %v2936_v14  ;;  %v4097_v7 = vpop.eup %4096  ;;  %v3663_v33 = vmul.f32 -1.442695, %v2938_v37 }
 0x827   :  { %4100 = vpow2.f32 %v3661_v22 }
 0x828   :  { %4102 = vpow2.f32 %v3662_v23 }
 0x829   :  { %4104 = vtanh.f32 %v2937_v34 }
 0x82a   :  { %4106 = vpow2.f32 %v3663_v33 }
 0x82e   :  { %v4099_v35 = vpop.eup %4098 }
 0x82f   :  { %v2779_v10 = vmul.f32 %v4099_v35, %v4097_v7 }
 0x831   :  { %v4101_v51 = vpop.eup %4100  ;;  %v2781_v13 = vcombine.high %v2779_v10, %v2779_v10  ;;  %v2788_v12 = vrot.slane %v2779_v10, %v5068_v29  ;;  %v2964_v40 = vpack.c.bf16 %v2779_v10, %v2779_v10 }
 0x832   :  { %v4103_v8 = vpop.eup %4102  ;;  %v2942_v27 = vadd.f32 1.0, %v4101_v51 }
 0x833   :  { %v2948_v21 = vadd.f32 1.0, %v4103_v8  ;;  %v2795_v28 = vrot.slane %v2781_v13, %v5068_v29  ;;  %v2796_v1 = vcombine.high %v2788_v12, %v2788_v12  ;;  %v2804_v14 = vrot.slane %v2788_v12, %v5068_v29  ;;  %3657 = vst.sshfl [vmem:[#allocation3 + $0x5] sm:$0x1 pattern:$0x73625140] %v2788_v12  ;;  %2997 = vmatprep.mubr.bf16.mxu0 %v2964_v40  ;;  %v4105_v35 = vpop.eup %4104 }
 0x834   :  { %3038 = vmatprep.mubr.bf16.mxu1 %v2964_v40  ;;  %4108 = vrcp.f32 %v2942_v27  ;;  %v4107_v33 = vpop.eup %4106 }
 0x835   :  { %4110 = vrcp.f32 %v2948_v21  ;;  %v2797_v37 = vcombine.high %v2795_v28, %v2795_v28  ;;  %v2811_v34 = vrot.slane %v2795_v28, %v5068_v29  ;;  %v2818_v26 = vrot.slane %v2796_v1, %v5068_v29  ;;  %3658 = vst.sshfl [vmem:[#allocation3 + $0xd] sm:$0x1 pattern:$0x73625140] %v2796_v1 }
 0x836   :  { %3659 = vst.sshfl [vmem:[#allocation3 + $0x25] sm:$0x1 pattern:$0x73625140] %v2795_v28  ;;  %v2826_v22 = vcombine.high %v2804_v14, %v2804_v14  ;;  %v2955_v12 = vadd.f32 1.0, %v4107_v33  ;;  %v7055_v14 = vld [vmem:[#allocation67_spill] sm:$0xff] }
 0x837   :  { %v2825_v31 = vrot.slane %v2797_v37, %v5068_v29  ;;  %v2827_v30 = vcombine.high %v2811_v34, %v2811_v34  ;;  %v2828_v23 = vcombine.high %v2818_v26, %v2818_v26  ;;  %3660 = vst.sshfl [vmem:[#allocation3 + $0x2d] sm:$0x1 pattern:$0x73625140] %v2797_v37  ;;  %v7056_v37 = vld [vmem:[#allocation68_spill] sm:$0xff]  ;;  %v7057_v34 = vld [vmem:[#allocation69_spill] sm:$0xff] }
 0x838   :  { %2840 = vst [vmem:[#allocation3 + $0x15] sm:$0x1] %v2826_v22  ;;  %4112 = vrcp.f32 %v2955_v12  ;;  %v7058_v26 = vld [vmem:[#allocation15_spill] sm:$0xff]  ;;  %v7059_v22 = vld [vmem:[#allocation16_spill] sm:$0xff]  ;;  %v7065_v33 = vld [vmem:[#allocation22_spill] sm:$0xff] }
 0x839   :  { %v2829_v7 = vcombine.high %v2825_v31, %v2825_v31  ;;  %2841 = vst [vmem:[#allocation3 + $0x1d] sm:$0x1] %v2828_v23  ;;  %2844 = vst [vmem:[#allocation3 + $0x35] sm:$0x1] %v2827_v30  ;;  %v7060_v31 = vld [vmem:[#allocation21_spill] sm:$0xff]  ;;  %v7061_v30 = vld [vmem:[#allocation75_spill] sm:$0xff] }
 0x83a   :  { %v7062_v23 = vld [vmem:[#allocation76_spill] sm:$0xff] }
 0x83b   :  { %2845 = vst [vmem:[#allocation3 + $0x3d] sm:$0x1] %v2829_v7  ;;  %v7063_v7 = vld [vmem:[#allocation77_spill] sm:$0xff] }
 0x83e   :  { %v4109_v10 = vpop.eup %4108 }
 0x83f   :  { %v4111_v51 = vpop.eup %4110  ;;  %v2959_v13 = vmul.f32 %v4109_v10, %v4105_v35  ;;  %v7064_v35 = vld [vmem:[#allocation78_spill] sm:$0xff]  ;;  %v7066_v10 = vld [vmem:[#allocation23_spill] sm:$0xff] }
 0x840   :  { %v2958_v40 = vmul.f32 %v4111_v51, %v5821_v11  ;;  %v7035_v11 = vld [vmem:[#allocation51_spill] sm:$0xff]  ;;  %v7067_v51 = vld [vmem:[#allocation24_spill] sm:$0xff] }
 0x842   :  { %v6069_v8 = vadd.f32 %v2959_v13, %v2958_v40  ;;  %v4113_v27 = vpop.eup %4112  ;;  %v7068_v13 = vld [vmem:[#allocation25_spill] sm:$0xff] }
 0x844   :  { %4114 = vtanh.f32 %v6069_v8 }
 0x84e   :  { %v4115_v21 = vpop.eup %4114 }
 0x84f   :  { %v2962_v28 = vmul.f32 %v4115_v21, %v4113_v27  ;;  %v7069_v27 = vld [vmem:[#allocation17_spill] sm:$0xff] }
 0x851   :  { %v2963_v1 = vpack.c.bf16 %v2962_v28, %v2962_v28 }
 0x853   :  { %2998 = vmatmul.mubr.bf16.vlgmr.msra.gmra.mrb[68].mxu0 %v2963_v1  ;;  %3039 = vmatmul.mubr.bf16.vlgmr.msra.gmra.mrb[68].mxu1 %v2963_v1 }
 0x854   :  { %3145 = vmatpush1.bf16.msra.mxu0 %v5642_v54  ;;  %3186 = vmatpush1.bf16.msra.mxu1 %v5645_v4  ;;  %v7015_v54 = vld [vmem:[#allocation36_spill] sm:$0xff]  ;;  %v7016_v4 = vld [vmem:[#allocation37_spill] sm:$0xff] }
 0x855   :  { %3146 = vmatprep.subr.bf16.mxu0 %v5648_v61  ;;  %3187 = vmatprep.subr.bf16.mxu1 %v5651_v25  ;;  %v7017_v61 = vld [vmem:[#allocation38_spill] sm:$0xff]  ;;  %v7018_v25 = vld [vmem:[#allocation39_spill] sm:$0xff] }
 0x856   :  { %3176 = vmatprep.mubr.bf16.mxu0 %v6649_v20  ;;  %3217 = vmatprep.mubr.bf16.mxu1 %v6649_v20  ;;  %v7014_v20 = vld [vmem:[#allocation35_spill] sm:$0xff] }
 0x858   :  { %3147 = vmatpush1.bf16.msra.mxu0 %v5656_v63  ;;  %3188 = vmatpush1.bf16.msra.mxu1 %v5659_v58  ;;  %v7019_v63 = vld [vmem:[#allocation40_spill] sm:$0xff]  ;;  %v7020_v58 = vld [vmem:[#allocation41_spill] sm:$0xff] }
 0x859   :  { %3148 = vmatprep.subr.bf16.mxu0 %v5662_v50  ;;  %3189 = vmatprep.subr.bf16.mxu1 %v5665_v2  ;;  %v7021_v50 = vld [vmem:[#allocation42_spill] sm:$0xff]  ;;  %v7022_v2 = vld [vmem:[#allocation43_spill] sm:$0xff] }
 0x85c   :  { %3149 = vmatpush1.bf16.msra.mxu0 %v5668_v55  ;;  %3190 = vmatpush1.bf16.msra.mxu1 %v5671_v49  ;;  %v7023_v55 = vld [vmem:[#allocation44_spill] sm:$0xff]  ;;  %v7024_v49 = vld [vmem:[#allocation45_spill] sm:$0xff] }
 0x85d   :  { %3150 = vmatprep.subr.bf16.mxu0 %v5674_v59  ;;  %3191 = vmatprep.subr.bf16.mxu1 %v5677_v43  ;;  %v7025_v59 = vld [vmem:[#allocation70_spill] sm:$0xff]  ;;  %v7026_v43 = vld [vmem:[#allocation71_spill] sm:$0xff] }
 0x860   :  { %3151 = vmatpush1.bf16.msra.mxu0 %v5680_v56  ;;  %3192 = vmatpush1.bf16.msra.mxu1 %v5683_v3  ;;  %v7027_v56 = vld [vmem:[#allocation72_spill] sm:$0xff]  ;;  %v7028_v3 = vld [vmem:[#allocation73_spill] sm:$0xff] }
 0x861   :  { %3152 = vmatprep.subr.bf16.mxu0 %v6945_v60  ;;  %3193 = vmatprep.subr.bf16.mxu1 %v6946_v47  ;;  %v7036_v60 = vld [vmem:[#allocation52_spill] sm:$0xff]  ;;  %v7037_v47 = vld [vmem:[#allocation53_spill] sm:$0xff] }
 0x864   :  { %3153 = vmatpush1.bf16.msra.mxu0 %v6947_v36  ;;  %3194 = vmatpush1.bf16.msra.mxu1 %v6948_v38  ;;  %v7038_v36 = vld [vmem:[#allocation54_spill] sm:$0xff]  ;;  %v7039_v38 = vld [vmem:[#allocation55_spill] sm:$0xff] }
 0x865   :  { %3154 = vmatprep.subr.bf16.mxu0 %v6949_v39  ;;  %3195 = vmatprep.subr.bf16.mxu1 %v6950_v41  ;;  %v7040_v39 = vld [vmem:[#allocation56_spill] sm:$0xff]  ;;  %v7041_v41 = vld [vmem:[#allocation83_spill] sm:$0xff] }
 0x868   :  { %3155 = vmatpush1.bf16.msra.mxu0 %v6951_v42  ;;  %3196 = vmatpush1.bf16.msra.mxu1 %v6952_v45  ;;  %v7042_v42 = vld [vmem:[#allocation84_spill] sm:$0xff]  ;;  %v7043_v45 = vld [vmem:[#allocation85_spill] sm:$0xff] }
 0x869   :  { %3156 = vmatprep.subr.bf16.mxu0 %v6953_v46  ;;  %3197 = vmatprep.subr.bf16.mxu1 %v6954_v44  ;;  %v7044_v46 = vld [vmem:[#allocation86_spill] sm:$0xff]  ;;  %v7045_v44 = vld [vmem:[#allocation57_spill] sm:$0xff] }
 0x86c   :  { %3157 = vmatpush1.bf16.msra.mxu0 %v5716_v57  ;;  %3198 = vmatpush1.bf16.msra.mxu1 %v5719_v5  ;;  %v7033_v57 = vld [vmem:[#allocation49_spill] sm:$0xff]  ;;  %v7034_v5 = vld [vmem:[#allocation50_spill] sm:$0xff] }
 0x86d   :  { %3158 = vmatprep.subr.bf16.mxu0 %v5722_v48  ;;  %3199 = vmatprep.subr.bf16.mxu1 %v5725_v52  ;;  %v7029_v48 = vld [vmem:[#allocation74_spill] sm:$0xff] }
 0x86e   :  { %v7030_v52 = vld [vmem:[#allocation46_spill] sm:$0xff] }
 0x870   :  { %3159 = vmatpush1.bf16.msra.mxu0 %v5728_v9  ;;  %3200 = vmatpush1.bf16.msra.mxu1 %v5731_v15  ;;  %v7031_v9 = vld [vmem:[#allocation47_spill] sm:$0xff]  ;;  %v7032_v15 = vld [vmem:[#allocation48_spill] sm:$0xff] }
 0x871   :  { %3256 = vmatprep.subr.bf16.mxu0 %v5856_v24  ;;  %3297 = vmatprep.subr.bf16.mxu1 %v5859_v16  ;;  %v7046_v24 = vld [vmem:[#allocation58_spill] sm:$0xff]  ;;  %v7047_v16 = vld [vmem:[#allocation59_spill] sm:$0xff] }
 0x873   :  { %3177 = vmatmul.mubr.bf16.vlgmr.msra.gmra.mrb[72].mxu0 %v2963_v1  ;;  %3218 = vmatmul.mubr.bf16.vlgmr.msra.gmra.mrb[72].mxu1 %v2963_v1 }
 0x874   :  { %3257 = vmatpush1.bf16.msra.mxu0 %v5862_v18  ;;  %3298 = vmatpush1.bf16.msra.mxu1 %v5865_v6  ;;  %v7048_v18 = vld [vmem:[#allocation60_spill] sm:$0xff]  ;;  %v7049_v6 = vld [vmem:[#allocation61_spill] sm:$0xff] }
 0x875   :  { %3258 = vmatprep.subr.bf16.mxu0 %v5868_v17  ;;  %3299 = vmatprep.subr.bf16.mxu1 %v5871_v32  ;;  %v7050_v17 = vld [vmem:[#allocation62_spill] sm:$0xff]  ;;  %v7051_v32 = vld [vmem:[#allocation63_spill] sm:$0xff] }
 0x878   :  { %3259 = vmatpush1.bf16.msra.mxu0 %v5874_v62  ;;  %3300 = vmatpush1.bf16.msra.mxu1 %v5877_v19  ;;  %v7052_v62 = vld [vmem:[#allocation64_spill] sm:$0xff]  ;;  %v7053_v19 = vld [vmem:[#allocation65_spill] sm:$0xff] }
 0x879   :  { %3260 = vmatprep.subr.bf16.mxu0 %v5880_v53  ;;  %3301 = vmatprep.subr.bf16.mxu1 %v7014_v20  ;;  %v7054_v53 = vld [vmem:[#allocation66_spill] sm:$0xff] }
 0x87a   :  { %v7070_v20 = vld [vmem:[#allocation18_spill] sm:$0xff] }
 0x87c   :  { %3261 = vmatpush1.bf16.msra.mxu0 %v7015_v54  ;;  %3302 = vmatpush1.bf16.msra.mxu1 %v7016_v4 }
 0x87d   :  { %3262 = vmatprep.subr.bf16.mxu0 %v7017_v61  ;;  %3303 = vmatprep.subr.bf16.mxu1 %v7018_v25 }
 0x880   :  { %3263 = vmatpush1.bf16.msra.mxu0 %v7019_v63  ;;  %3304 = vmatpush1.bf16.msra.mxu1 %v7020_v58 }
 0x881   :  { %3264 = vmatprep.subr.bf16.mxu0 %v7021_v50  ;;  %3305 = vmatprep.subr.bf16.mxu1 %v7022_v2  ;;  %v7071_v2 = vld [vmem:[#allocation19_spill] sm:$0xff] }
 0x884   :  { %3265 = vmatpush1.bf16.msra.mxu0 %v7023_v55  ;;  %3306 = vmatpush1.bf16.msra.mxu1 %v7024_v49 }
 0x885   :  { %3266 = vmatprep.subr.bf16.mxu0 %v7025_v59  ;;  %3307 = vmatprep.subr.bf16.mxu1 %v7026_v43  ;;  %v7072_v59 = vld [vmem:[#allocation20_spill] sm:$0xff] }
 0x888   :  { %3267 = vmatpush1.bf16.msra.mxu0 %v7027_v56  ;;  %3308 = vmatpush1.bf16.msra.mxu1 %v7028_v3 }
 0x889   :  { %3268 = vmatprep.subr.bf16.mxu0 %v7029_v48  ;;  %3309 = vmatprep.subr.bf16.mxu1 %v7030_v52 }
 0x88c   :  { %3269 = vmatpush1.bf16.msra.mxu0 %v7031_v9  ;;  %3310 = vmatpush1.bf16.msra.mxu1 %v7032_v15 }
 0x88d   :  { %3270 = vmatprep.subr.bf16.mxu0 %v7033_v57  ;;  %3311 = vmatprep.subr.bf16.mxu1 %v7034_v5 }
 0x890   :  { %3271 = vmatpush1.bf16.msra.mxu0 %v7035_v11  ;;  %3312 = vmatpush1.bf16.msra.mxu1 %v7036_v60 }
 0x891   :  { %3272 = vmatprep.subr.bf16.mxu0 %v7037_v47  ;;  %3313 = vmatprep.subr.bf16.mxu1 %v7038_v36 }
 0x894   :  { %3273 = vmatpush1.bf16.msra.mxu0 %v7039_v38  ;;  %3314 = vmatpush1.bf16.msra.mxu1 %v7040_v39 }
 0x895   :  { %3274 = vmatprep.subr.bf16.mxu0 %v7041_v41  ;;  %3315 = vmatprep.subr.bf16.mxu1 %v7042_v42  ;;  %v7073_v41 = vld [vmem:[#allocation95_spill] sm:$0xff] }
 0x898   :  { %3275 = vmatpush1.bf16.msra.mxu0 %v7043_v45  ;;  %3316 = vmatpush1.bf16.msra.mxu1 %v7044_v46  ;;  %v7074_v45 = vld [vmem:[#allocation96_spill] sm:$0xff] }
 0x899   :  { %3276 = vmatprep.subr.bf16.mxu0 %v7045_v44  ;;  %3317 = vmatprep.subr.bf16.mxu1 %v7046_v24 }
 0x89c   :  { %3277 = vmatpush1.bf16.msra.mxu0 %v7047_v16  ;;  %3318 = vmatpush1.bf16.msra.mxu1 %v7048_v18  ;;  %v7075_v16 = vld [vmem:[#allocation97_spill] sm:$0xff] }
 0x89d   :  { %3278 = vmatprep.subr.bf16.mxu0 %v7049_v6  ;;  %3319 = vmatprep.subr.bf16.mxu1 %v7050_v17  ;;  %v7076_v6 = vld [vmem:[#allocation98_spill] sm:$0xff] }
 0x8a0   :  { %3279 = vmatpush1.bf16.msra.mxu0 %v7051_v32  ;;  %3320 = vmatpush1.bf16.msra.mxu1 %v7052_v62 }
 0x8a1   :  { %3280 = vmatprep.subr.bf16.mxu0 %v7053_v19  ;;  %3321 = vmatprep.subr.bf16.mxu1 %v7054_v53 }
 0x8a4   :  { %3281 = vmatpush1.bf16.msra.mxu0 %v7055_v14  ;;  %3322 = vmatpush1.bf16.msra.mxu1 %v7056_v37 }
 0x8a5   :  { %3282 = vmatprep.subr.bf16.mxu0 %v7057_v34  ;;  %3323 = vmatprep.subr.bf16.mxu1 %v7058_v26 }
 0x8a8   :  { %3283 = vmatpush1.bf16.msra.mxu0 %v7059_v22  ;;  %3324 = vmatpush1.bf16.msra.mxu1 %v7060_v31 }
 0x8a9   :  { %3284 = vmatprep.subr.bf16.mxu0 %v7061_v30  ;;  %3325 = vmatprep.subr.bf16.mxu1 %v7062_v23 }
 0x8ac   :  { %3285 = vmatpush1.bf16.msra.mxu0 %v7063_v7  ;;  %3326 = vmatpush1.bf16.msra.mxu1 %v7064_v35 }
 0x8ad   :  { %3286 = vmatprep.subr.bf16.mxu0 %v7065_v33  ;;  %3327 = vmatprep.subr.bf16.mxu1 %v7066_v10 }
 0x8b0   :  { %3287 = vmatpush1.bf16.msra.mxu0 %v7067_v51  ;;  %3328 = vmatpush1.bf16.msra.mxu1 %v7068_v13 }
 0x926   :  { %v2999_v12 = vpop.f32.mrb[68].mxu0  ;;  %v3040_v40 = vpop.f32.mrb[68].mxu1 }
 0x927   :  { %v3000_v21 = vadd.f32 %v2999_v12, %v7069_v27  ;;  %v3001_v28 = vpop.f32.mrb[69].mxu0  ;;  %v3042_v1 = vpop.f32.mrb[69].mxu1  ;;  %v3041_v43 = vadd.f32 %v3040_v40, %v7072_v59 }
 0x928   :  { %v3002_v54 = vadd.f32 %v3001_v28, %v7070_v20  ;;  %v3003_v4 = vpop.f32.mrb[70].mxu0  ;;  %v3044_v61 = vpop.f32.mrb[70].mxu1  ;;  %v3043_v55 = vadd.f32 %v3042_v1, %v7071_v2 }
 0x929   :  { %v3664_v25 = vmul.f32 -1.442695, %v3000_v21  ;;  %v3004_v63 = vpop.f32.mrb[71].mxu0  ;;  %v3045_v58 = vpop.f32.mrb[71].mxu1 }
 0x92a   :  { %v3665_v50 = vmul.f32 -1.442695, %v3002_v54  ;;  %v3666_v49 = vmul.f32 -1.442695, %v3043_v55 }
 0x92b   :  { %4116 = vpow2.f32 %v3664_v25 }
 0x92c   :  { %4118 = vpow2.f32 %v3665_v50 }
 0x92d   :  { %4120 = vpow2.f32 %v3666_v49 }
 0x92e   :  { %4122 = vtanh.f32 %v3041_v43 }
 0x935   :  { %v4117_v56 = vpop.eup %4116 }
 0x936   :  { %v4119_v3 = vpop.eup %4118  ;;  %v3050_v48 = vadd.f32 1.0, %v4117_v56 }
 0x937   :  { %v3056_v52 = vadd.f32 1.0, %v4119_v3  ;;  %v4121_v9 = vpop.eup %4120 }
 0x938   :  { %4124 = vrcp.f32 %v3050_v48  ;;  %v4123_v15 = vpop.eup %4122  ;;  %v3063_v60 = vadd.f32 1.0, %v4121_v9 }
 0x939   :  { %4126 = vrcp.f32 %v3056_v52 }
 0x93a   :  { %4128 = vrcp.f32 %v3063_v60 }
 0x942   :  { %v4125_v57 = vpop.eup %4124 }
 0x943   :  { %v4127_v5 = vpop.eup %4126  ;;  %v3067_v11 = vmul.f32 %v4125_v57, %v4123_v15 }
 0x944   :  { %v3066_v47 = vmul.f32 %v4127_v5, %v6055_v0  ;;  %v4129_v37 = vpop.eup %4128 }
 0x946   :  { %v6173_v36 = vadd.f32 %v3067_v11, %v3066_v47  ;;  %v3178_v38 = vpop.f32.mrb[72].mxu0  ;;  %v3219_v39 = vpop.f32.mrb[72].mxu1 }
 0x947   :  { %v3226_v42 = vadd.f32 %v3178_v38, %v7073_v41  ;;  %v3228_v46 = vadd.f32 %v3219_v39, %v7074_v45  ;;  %v3180_v44 = vpop.f32.mrb[73].mxu0  ;;  %v3221_v24 = vpop.f32.mrb[73].mxu1 }
 0x948   :  { %v3227_v18 = vadd.f32 %v3180_v44, %v7075_v16  ;;  %v3229_v17 = vadd.f32 %v3221_v24, %v7076_v6  ;;  %v3182_v32 = vpop.f32.mrb[74].mxu0  ;;  %v3223_v62 = vpop.f32.mrb[74].mxu1  ;;  %4130 = vtanh.f32 %v6173_v36 }
 0x949   :  { %v3671_v0 = vmul.f32 -1.442695, %v3226_v42  ;;  %v3183_v19 = vpop.f32.mrb[75].mxu0  ;;  %v3224_v53 = vpop.f32.mrb[75].mxu1 }
 0x94a   :  { %v3672_v14 = vmul.f32 -1.442695, %v3227_v18  ;;  %v3673_v26 = vmul.f32 -1.442695, %v3229_v17 }
 0x94b   :  { %4132 = vpow2.f32 %v3671_v0 }
 0x94c   :  { %4134 = vpow2.f32 %v3672_v14 }
 0x94d   :  { %4136 = vtanh.f32 %v3228_v46 }
 0x94e   :  { %4138 = vpow2.f32 %v3673_v26 }
 0x952   :  { %v4131_v34 = vpop.eup %4130 }
 0x953   :  { %v3070_v22 = vmul.f32 %v4131_v34, %v4129_v37 }
 0x955   :  { %v4133_v31 = vpop.eup %4132  ;;  %v3072_v30 = vcombine.high %v3070_v22, %v3070_v22  ;;  %v3079_v23 = vrot.slane %v3070_v22, %v5068_v29  ;;  %v3255_v7 = vpack.c.bf16 %v3070_v22, %v3070_v22 }
 0x956   :  { %v4135_v35 = vpop.eup %4134  ;;  %v3233_v33 = vadd.f32 1.0, %v4133_v31 }
 0x957   :  { %v3239_v10 = vadd.f32 1.0, %v4135_v35  ;;  %v3086_v51 = vrot.slane %v3072_v30, %v5068_v29  ;;  %v3087_v13 = vcombine.high %v3079_v23, %v3079_v23  ;;  %v3095_v12 = vrot.slane %v3079_v23, %v5068_v29  ;;  %3667 = vst.sshfl [vmem:[#allocation3 + $0x6] sm:$0x1 pattern:$0x73625140] %v3079_v23  ;;  %3288 = vmatprep.mubr.bf16.mxu0 %v3255_v7  ;;  %v4137_v63 = vpop.eup %4136 }
 0x958   :  { %3329 = vmatprep.mubr.bf16.mxu1 %v3255_v7  ;;  %4140 = vrcp.f32 %v3233_v33  ;;  %v4139_v58 = vpop.eup %4138 }
 0x959   :  { %4142 = vrcp.f32 %v3239_v10  ;;  %v3088_v40 = vcombine.high %v3086_v51, %v3086_v51  ;;  %v3102_v21 = vrot.slane %v3086_v51, %v5068_v29  ;;  %v3109_v28 = vrot.slane %v3087_v13, %v5068_v29  ;;  %3668 = vst.sshfl [vmem:[#allocation3 + $0xe] sm:$0x1 pattern:$0x73625140] %v3087_v13 }
 0x95a   :  { %3669 = vst.sshfl [vmem:[#allocation3 + $0x26] sm:$0x1 pattern:$0x73625140] %v3086_v51  ;;  %v3117_v1 = vcombine.high %v3095_v12, %v3095_v12  ;;  %v3246_v43 = vadd.f32 1.0, %v4139_v58 }
 0x95b   :  { %v3116_v54 = vrot.slane %v3088_v40, %v5068_v29  ;;  %v3118_v4 = vcombine.high %v3102_v21, %v3102_v21  ;;  %v3119_v61 = vcombine.high %v3109_v28, %v3109_v28  ;;  %3670 = vst.sshfl [vmem:[#allocation3 + $0x2e] sm:$0x1 pattern:$0x73625140] %v3088_v40 }
 0x95c   :  { %3131 = vst [vmem:[#allocation3 + $0x16] sm:$0x1] %v3117_v1  ;;  %4144 = vrcp.f32 %v3246_v43 }
 0x95d   :  { %v3120_v25 = vcombine.high %v3116_v54, %v3116_v54  ;;  %3132 = vst [vmem:[#allocation3 + $0x1e] sm:$0x1] %v3119_v61  ;;  %3135 = vst [vmem:[#allocation3 + $0x36] sm:$0x1] %v3118_v4 }
 0x95f   :  { %3136 = vst [vmem:[#allocation3 + $0x3e] sm:$0x1] %v3120_v25 }
 0x962   :  { %v4141_v50 = vpop.eup %4140 }
 0x963   :  { %v4143_v55 = vpop.eup %4142  ;;  %v3250_v49 = vmul.f32 %v4141_v50, %v4137_v63 }
 0x964   :  { %v3249_v56 = vmul.f32 %v4143_v55, %v6069_v8 }
 0x966   :  { %v3251_v3 = vadd.f32 %v3250_v49, %v3249_v56  ;;  %v4145_v48 = vpop.eup %4144 }
 0x968   :  { %4146 = vtanh.f32 %v3251_v3 }
 0x972   :  { %v4147_v52 = vpop.eup %4146 }
 0x973   :  { %v3253_v9 = vmul.f32 %v4147_v52, %v4145_v48 }
 0x975   :  { %v3254_v15 = vpack.c.bf16 %v3253_v9, %v3253_v9 }
 0x977   :  { %3289 = vmatmul.mubr.bf16.vlgmr.msra.gmra.mrb[76].mxu0 %v3254_v15  ;;  %3330 = vmatmul.mubr.bf16.vlgmr.msra.gmra.mrb[76].mxu1 %v3254_v15 }
 0xa4a   :  { %v3290_v57 = vpop.f32.mrb[76].mxu0  ;;  %v3331_v5 = vpop.f32.mrb[76].mxu1 }
 0xa4b   :  { %v3291_v11 = vadd.f32 %v3290_v57, %v7069_v27  ;;  %v3292_v60 = vpop.f32.mrb[77].mxu0  ;;  %v3333_v47 = vpop.f32.mrb[77].mxu1  ;;  %v3332_v16 = vadd.f32 %v3331_v5, %v7072_v59 }
 0xa4c   :  { %v3293_v38 = vadd.f32 %v3292_v60, %v7070_v20  ;;  %v3294_v39 = vpop.f32.mrb[78].mxu0  ;;  %v3335_v41 = vpop.f32.mrb[78].mxu1  ;;  %v3334_v44 = vadd.f32 %v3333_v47, %v7071_v2 }
 0xa4d   :  { %v3674_v8 = vmul.f32 -1.442695, %v3291_v11  ;;  %v3295_v42 = vpop.f32.mrb[79].mxu0  ;;  %v3336_v45 = vpop.f32.mrb[79].mxu1 }
 0xa4e   :  { %v3675_v46 = vmul.f32 -1.442695, %v3293_v38  ;;  %v3676_v24 = vmul.f32 -1.442695, %v3334_v44 }
 0xa4f   :  { %4148 = vpow2.f32 %v3674_v8 }
 0xa50   :  { %4150 = vpow2.f32 %v3675_v46 }
 0xa51   :  { %4152 = vpow2.f32 %v3676_v24 }
 0xa52   :  { %4154 = vtanh.f32 %v3332_v16 }
 0xa59   :  { %v4149_v18 = vpop.eup %4148 }
 0xa5a   :  { %v4151_v6 = vpop.eup %4150  ;;  %v3341_v27 = vadd.f32 1.0, %v4149_v18 }
 0xa5b   :  { %v3347_v17 = vadd.f32 1.0, %v4151_v6  ;;  %v4153_v20 = vpop.eup %4152 }
 0xa5c   :  { %4156 = vrcp.f32 %v3341_v27  ;;  %v4155_v32 = vpop.eup %4154  ;;  %v3354_v53 = vadd.f32 1.0, %v4153_v20 }
 0xa5d   :  { %4158 = vrcp.f32 %v3347_v17 }
 0xa5e   :  { %4160 = vrcp.f32 %v3354_v53 }
 0xa66   :  { %v4157_v62 = vpop.eup %4156 }
 0xa67   :  { %v4159_v0 = vpop.eup %4158  ;;  %v3358_v19 = vmul.f32 %v4157_v62, %v4155_v32 }
 0xa68   :  { %v3357_v14 = vmul.f32 %v4159_v0, %v6173_v36  ;;  %v4161_v59 = vpop.eup %4160 }
 0xa6a   :  { %v3359_v2 = vadd.f32 %v3358_v19, %v3357_v14 }
 0xa6c   :  { %4162 = vtanh.f32 %v3359_v2 }
 0xa76   :  { %v4163_v37 = vpop.eup %4162 }
 0xa77   :  { %v3361_v34 = vmul.f32 %v4163_v37, %v4161_v59 }
 0xa79   :  { %v3363_v26 = vcombine.high %v3361_v34, %v3361_v34  ;;  %v3370_v22 = vrot.slane %v3361_v34, %v5068_v29 }
 0xa7b   :  { %v3377_v31 = vrot.slane %v3363_v26, %v5068_v29  ;;  %v3378_v30 = vcombine.high %v3370_v22, %v3370_v22  ;;  %v3386_v23 = vrot.slane %v3370_v22, %v5068_v29  ;;  %3677 = vst.sshfl [vmem:[#allocation3 + $0x7] sm:$0x1 pattern:$0x73625140] %v3370_v22 }
 0xa7d   :  { %v3379_v7 = vcombine.high %v3377_v31, %v3377_v31  ;;  %v3393_v35 = vrot.slane %v3377_v31, %v5068_v29  ;;  %v3400_v36 = vrot.slane %v3378_v30, %v5068_v29  ;;  %v3408_v33 = vcombine.high %v3386_v23, %v3386_v23  ;;  %3678 = vst.sshfl [vmem:[#allocation3 + $0xf] sm:$0x1 pattern:$0x73625140] %v3378_v30 }
 0xa7e   :  { %3679 = vst.sshfl [vmem:[#allocation3 + $0x27] sm:$0x1 pattern:$0x73625140] %v3377_v31 }
 0xa7f   :  { %v3407_v10 = vrot.slane %v3379_v7, %v5068_v29  ;;  %v3409_v51 = vcombine.high %v3393_v35, %v3393_v35  ;;  %v3410_v13 = vcombine.high %v3400_v36, %v3400_v36  ;;  %3422 = vst [vmem:[#allocation3 + $0x17] sm:$0x1] %v3408_v33  ;;  %3680 = vst.sshfl [vmem:[#allocation3 + $0x2f] sm:$0x1 pattern:$0x73625140] %v3379_v7 }
 0xa81   :  { %v3411_v12 = vcombine.high %v3407_v10, %v3407_v10  ;;  %3423 = vst [vmem:[#allocation3 + $0x1f] sm:$0x1] %v3410_v13  ;;  %3426 = vst [vmem:[#allocation3 + $0x37] sm:$0x1] %v3409_v51 }
 0xa82   :  { %v3432_v40 = vld [vmem:[#allocation3] sm:$0xff] }
 0xa83   :  { %3427 = vst [vmem:[#allocation3 + $0x3f] sm:$0x1] %v3411_v12 }
 0xa84   :  { %v3433_v21 = vld [vmem:[#allocation3 + $0x8] sm:$0xff] }
 0xa85   :  { %v3684_v28 = vpack.c.bf16 %v3433_v21, %v3432_v40  ;;  %v3436_v1 = vld [vmem:[#allocation3 + $0x20] sm:$0xff] }
 0xa86   :  { %v3437_v54 = vld [vmem:[#allocation3 + $0x28] sm:$0xff]  ;;  %v3434_v61 = vld [vmem:[#allocation3 + $0x10] sm:$0xff] }
 0xa87   :  { %3685 = vst [vmem:[%s6216_s6] sm:$0xff] %v3684_v28   ;;  %v3694_v4 = vpack.c.bf16 %v3437_v54, %v3436_v1 }
 0xa88   :  { %v3435_v29 = vld [vmem:[#allocation3 + $0x18] sm:$0xff]  ;;  %v3438_v63 = vld [vmem:[#allocation3 + $0x30] sm:$0xff] }
 0xa89   :  { %v3689_v25 = vpack.c.bf16 %v3435_v29, %v3434_v61  ;;  %3702 = vst [vmem:[%s6216_s6 + $0x10] sm:$0xff] %v3694_v4  }
 0xa8a   :  { %v3439_v58 = vld [vmem:[#allocation3 + $0x38] sm:$0xff] }
 0xa8b   :  { %3701 = vst [vmem:[%s6216_s6 + $0x8] sm:$0xff] %v3689_v25   ;;  %v3699_v50 = vpack.c.bf16 %v3439_v58, %v3438_v63 }
 0xa8d   :  { %3703 = vst [vmem:[%s6216_s6 + $0x18] sm:$0xff] %v3699_v50  }
 0xa8e   :  { %3460 = vsyncpa [#allocation9], 1 }
 0xa8f   :  { %3461 = vsyncpa [#allocation11], 1 }

</bundles_post_ra>
